<compile_context>
chip_gen: v6e
topology: v6e:2x2x1
jax: 0.10.0
libtpu: 0.0.40
codegen_flags: <defaults>
</compile_context>

<pallas_src>
import numpy as np
import jax
import jax.numpy as jnp
from jax import lax
from jax.experimental import pallas as pl
from jax.experimental.pallas import tpu as pltpu


def _ceil128(x):
    return -(-x // 128) * 128


def _make_kernel(D, H, W, C, groups, pad_in, pad_hw, conv_dtype, eps=1e-5):
    S = D * H * W
    HW = H * W
    C2 = 2 * C
    Sp = S + 2 * pad_hw           # D-haloed lane extent of the im2col buffer
    Cg = C // groups
    inv_denom = 1.0 / float(S * Cg)

    def kernel(x_ref, f_ref, w1_ref, b1_ref, gamma_ref, beta_ref,
               w2_ref, b2_ref, gmat_ref, mask_ref, out_ref,
               gpad_ref, col_ref):
        # --- 1) zero-haloed, bf16, lane-flattened gate input --------------
        # Halos re-zeroed every step (scratch is per-core; do not rely on a
        # previous grid step having run on this core).
        zpad = jnp.zeros((C2, pad_in), conv_dtype)
        gpad_ref[:, 0:pad_in] = zpad
        gpad_ref[:, pad_in + S:pad_in + S + pad_in] = zpad
        gpad_ref[0:C, pad_in:pad_in + S] = x_ref[0].astype(conv_dtype)
        gpad_ref[C:C2, pad_in:pad_in + S] = f_ref[0].astype(conv_dtype)

        # --- 2) build the 9 (kh,kw) masked slabs ONCE over the D-haloed ---
        #        lane extent; the kd taps become pure lane windows later.
        base = pad_in - pad_hw
        for kh in range(3):
            for kw in range(3):
                t = kh * 3 + kw
                start = base + (kh - 1) * W + (kw - 1)
                slab = gpad_ref[:, start:start + Sp]          # (2C, Sp) bf16
                if kh == 1 and kw == 1:                       # all-ones mask
                    col_ref[t * C2:(t + 1) * C2, :] = slab
                else:
                    # mask is exactly 0/1 -> bf16 multiply is exact.
                    col_ref[t * C2:(t + 1) * C2, :] = slab * mask_ref[t]

        # --- 3) 3x3x3 conv (2C->C, pad=1) as 3 fat-K MXU matmuls ----------
        acc = jnp.zeros((C, S), jnp.float32)
        for kd in range(3):
            win = pad_hw + (kd - 1) * HW                      # static start
            acc = acc + jnp.dot(w1_ref[kd], col_ref[:, win:win + S],
                                preferred_element_type=jnp.float32)
        acc = acc + b1_ref[...]                               # (C,S) + (C,1)

        # --- 4) GroupNorm(groups, C): fused per-group sum/sumsq matmul ----
        stats = jnp.concatenate(
            [jnp.sum(acc, axis=1, keepdims=True),
             jnp.sum(acc * acc, axis=1, keepdims=True)], axis=1)   # (C, 2)
        gstats = jnp.dot(gmat_ref[...], stats,
                         preferred_element_type=jnp.float32)       # (C, 2)
        mean = gstats[:, 0:1] * inv_denom
        var = jnp.maximum(gstats[:, 1:2] * inv_denom - mean * mean, 0.0)
        y = (acc - mean) * lax.rsqrt(var + eps)
        y = y * gamma_ref[...] + beta_ref[...]

        # --- 5) SiLU (f32 VPU + EUP) --------------------------------------
        h = y * jax.nn.sigmoid(y)

        # --- 6) 1x1x1 conv (C -> 1) on the MXU + Sigmoid gate --------------
        gpre = jnp.dot(w2_ref[...], h,
                       preferred_element_type=jnp.float32)         # (1, S)
        gate = jax.nn.sigmoid(gpre + b2_ref[...])                  # (1, S)

        # --- 7) gated residual fusion; re-read x/f (short live ranges) -----
        out_ref[0] = x_ref[0] + gate * f_ref[0]

    return kernel


def _vmem_limit_bytes(C, S, Sp, pad_in, conv_bytes):
    """Generation-aware VMEM limit computed from the actual buffer sizes."""
    C2 = 2 * C
    scratch = C2 * (S + 2 * pad_in) * conv_bytes + 9 * C2 * Sp * conv_bytes
    io = 3 * 2 * C * S * 4                       # x, f, out (double-buffered f32)
    consts = (3 * C * 9 * C2) * conv_bytes + 9 * Sp * conv_bytes \
        + (C * C + 4 * C + 2) * 4
    needed = int((scratch + io + 2 * consts) * 1.25) + (4 << 20)
    try:
        phys = pltpu.get_tpu_info().vmem_capacity_bytes
    except Exception:
        phys = 64 * 1024 * 1024                  # conservative (v7x per-TC)
    return int(min(max(needed, 32 * 1024 * 1024), int(phys * 0.8)))


def adaptive_gating(x, fused, params, *, groups=8, conv_dtype=jnp.bfloat16):
    """x, fused: (N, C, D, H, W) float32 (PyTorch NCDHW-for-3D convention)."""
    N, C, D, H, W = x.shape
    S = D * H * W
    HW = H * W
    assert C % groups == 0 and C % 8 == 0
    Cg = C // groups
    if S % 128 != 0:
        # Still correct, but in/out stores become lane-masked (slower).
        # For production shapes pad W (or choose D,H,W) so D*H*W % 128 == 0.
        pass

    w1, b1 = params["w1"], params["b1"]            # (C, 2C, 3,3,3), (C,)
    gamma, beta = params["gamma"], params["beta"]  # (C,), (C,)
    w2, b2 = params["w2"], params["b2"]            # (1, C, 1,1,1), (1,)

    # channel-major, spatially-flattened layout == plain reshape of NCDHW:
    # no HBM-side transpose / concat / padded tensor is ever materialized.
    x_k = x.reshape(N, C, S)
    f_k = fused.reshape(N, C, S)

    # conv weights grouped by kd; columns ordered (kh, kw, cin) to match the
    # in-kernel im2col row stacking; cast once to the MXU streaming dtype.
    w1_k = jnp.transpose(w1, (2, 0, 3, 4, 1)).reshape(3, C, 9 * 2 * C)
    w1_k = w1_k.astype(conv_dtype)
    b1_k = b1.reshape(C, 1).astype(jnp.float32)
    gamma_k = gamma.reshape(C, 1).astype(jnp.float32)
    beta_k = beta.reshape(C, 1).astype(jnp.float32)
    w2_k = w2.reshape(1, C).astype(jnp.float32)
    b2_k = b2.reshape(1, 1).astype(jnp.float32)
    gid = np.arange(C) // Cg
    gmat = jnp.asarray((gid[:, None] == gid[None, :]).astype(np.float32))

    # Halo geometry: the im2col slabs span positions p in [-pad_hw, S+pad_hw)
    # (pad_hw = 128-aligned HW plane -> kd=1 window is lane-aligned); the
    # gate-input scratch needs an extra (W+1)-wide zero halo beyond that.
    pad_hw = _ceil128(HW)
    pad_in = _ceil128(pad_hw + W + 1)
    Sp = S + 2 * pad_hw

    # H/W-wrap masks for the 9 (kh, kw) lane shifts, defined over the full
    # D-haloed extent (periodic in HW); D boundaries handled by the zero halo.
    q = np.arange(Sp)
    p = q - pad_hw
    idx = np.mod(p, HW)
    w_i = idx % W
    h_i = idx // W
    mlist = []
    for kh in range(3):
        for kw in range(3):
            dh, dw = kh - 1, kw - 1
            ok = ((h_i + dh >= 0) & (h_i + dh < H) &
                  (w_i + dw >= 0) & (w_i + dw < W))
            mlist.append(ok.astype(np.float32))
    masks = jnp.asarray(np.stack(mlist)[:, None, :]).astype(conv_dtype)  # (9,1,Sp)

    conv_bytes = jnp.dtype(conv_dtype).itemsize
    kernel = _make_kernel(D, H, W, C, groups, pad_in, pad_hw, conv_dtype)

    out = pl.pallas_call(
        kernel,
        out_shape=jax.ShapeDtypeStruct((N, C, S), jnp.float32),
        grid_spec=pltpu.PrefetchScalarGridSpec(
            num_scalar_prefetch=0,
            grid=(N,),
            in_specs=[
                pl.BlockSpec((1, C, S), lambda b: (b, 0, 0)),          # x
                pl.BlockSpec((1, C, S), lambda b: (b, 0, 0)),          # fused
                pl.BlockSpec((3, C, 9 * 2 * C), lambda b: (0, 0, 0)),  # w1
                pl.BlockSpec((C, 1), lambda b: (0, 0)),                # b1
                pl.BlockSpec((C, 1), lambda b: (0, 0)),                # gamma
                pl.BlockSpec((C, 1), lambda b: (0, 0)),                # beta
                pl.BlockSpec((1, C), lambda b: (0, 0)),                # w2
                pl.BlockSpec((1, 1), lambda b: (0, 0)),                # b2
                pl.BlockSpec((C, C), lambda b: (0, 0)),                # gmat
                pl.BlockSpec((9, 1, Sp), lambda b: (0, 0, 0)),         # masks
            ],
            out_specs=pl.BlockSpec((1, C, S), lambda b: (b, 0, 0)),
            scratch_shapes=[
                pltpu.VMEM((2 * C, S + 2 * pad_in), conv_dtype),   # haloed gate-in
                pltpu.VMEM((9 * 2 * C, Sp), conv_dtype),           # hoisted im2col
            ],
        ),
        compiler_params=pltpu.CompilerParams(
            dimension_semantics=("parallel",),
            vmem_limit_bytes=_vmem_limit_bytes(C, S, Sp, pad_in, conv_bytes),
        ),
    )(x_k, f_k, w1_k, b1_k, gamma_k, beta_k, w2_k, b2_k, gmat, masks)

    return out.reshape(N, C, D, H, W)


def reference(x, fused, params, *, groups=8, eps=1e-5):
    """Pure-JAX reference mirroring the PyTorch module."""
    w1, b1 = params["w1"], params["b1"]
    gamma, beta = params["gamma"], params["beta"]
    w2, b2 = params["w2"], params["b2"]

    gi = jnp.concatenate([x, fused], axis=1)
    dn1 = lax.conv_dimension_numbers(gi.shape, w1.shape,
                                     ("NCDHW", "OIDHW", "NCDHW"))
    y = lax.conv_general_dilated(gi, w1, (1, 1, 1),
                                 ((1, 1), (1, 1), (1, 1)),
                                 dimension_numbers=dn1)
    y = y + b1[None, :, None, None, None]

    N, C, D, H, W = y.shape
    yr = y.reshape(N, groups, C // groups, D, H, W)
    mean = yr.mean(axis=(2, 3, 4, 5), keepdims=True)
    var = ((yr - mean) ** 2).mean(axis=(2, 3, 4, 5), keepdims=True)
    yn = ((yr - mean) * lax.rsqrt(var + eps)).reshape(N, C, D, H, W)
    yn = yn * gamma[None, :, None, None, None] + beta[None, :, None, None, None]

    h = yn * jax.nn.sigmoid(yn)
    dn2 = lax.conv_dimension_numbers(h.shape, w2.shape,
                                     ("NCDHW", "OIDHW", "NCDHW"))
    g = lax.conv_general_dilated(h, w2, (1, 1, 1), "VALID",
                                 dimension_numbers=dn2)
    g = jax.nn.sigmoid(g + b2[None, :, None, None, None])
    return x + g * fused


if __name__ == "__main__":
    key = jax.random.PRNGKey(0)
    # C > groups so the GroupNorm group reduction is actually exercised;
    # D*H*W = 512 is a multiple of 128 (lane-dense tiles).
    N, C, D, H, W = 2, 16, 8, 8, 8
    ks = jax.random.split(key, 8)
    x = jax.random.normal(ks[0], (N, C, D, H, W), jnp.float32)
    fused = jax.random.normal(ks[1], (N, C, D, H, W), jnp.float32)

    params = dict(
        w1=0.05 * jax.random.normal(ks[2], (C, 2 * C, 3, 3, 3), jnp.float32),
        b1=0.05 * jax.random.normal(ks[3], (C,), jnp.float32),
        gamma=1.0 + 0.1 * jax.random.normal(ks[4], (C,), jnp.float32),
        beta=0.1 * jax.random.normal(ks[5], (C,), jnp.float32),
        w2=0.2 * jax.random.normal(ks[6], (1, C, 1, 1, 1), jnp.float32),
        b2=0.1 * jax.random.normal(ks[7], (1,), jnp.float32),
    )

    out = adaptive_gating(x, fused, params, groups=8)
    out = jax.block_until_ready(out)

    ref = reference(x, fused, params, groups=8)
    # bf16 MXU inputs (f32 accumulate) on the 3x3x3 conv path => slightly
    # looser tolerance than a pure-f32 comparison.
    np.testing.assert_allclose(np.asarray(out), np.asarray(ref),
                               rtol=2e-2, atol=2e-2)
    print("KERNEL_OK")
</pallas_src>

<mosaic_0001>
module attributes {stable_mosaic.version = 11 : i64} {
  func.func @kernel(%arg0: i32, %arg1: memref<1x16x512xf32, #tpu.memory_space<vmem>>, %arg2: memref<1x16x512xf32, #tpu.memory_space<vmem>>, %arg3: memref<3x16x288xbf16, #tpu.memory_space<vmem>>, %arg4: memref<16x1xf32, #tpu.memory_space<vmem>>, %arg5: memref<16x1xf32, #tpu.memory_space<vmem>>, %arg6: memref<16x1xf32, #tpu.memory_space<vmem>>, %arg7: memref<1x16xf32, #tpu.memory_space<vmem>>, %arg8: memref<1x1xf32, #tpu.memory_space<vmem>>, %arg9: memref<16x16xf32, #tpu.memory_space<vmem>>, %arg10: memref<9x1x768xbf16, #tpu.memory_space<vmem>>, %arg11: memref<1x16x512xf32, #tpu.memory_space<vmem>>, %arg12: memref<32x1024xbf16, #tpu.memory_space<vmem>>, %arg13: memref<288x768xbf16, #tpu.memory_space<vmem>>) attributes {dimension_semantics = [#tpu.dimension_semantics<parallel>], iteration_bounds = array<i64: 2>, scalar_prefetch = 0 : i64, scratch_operands = 2 : i64, tpu.core_type = #tpu.core_type<tc>, window_params = [{transform_indices = @transform_0, window_bounds = array<i64: 1, 16, 512>}, {transform_indices = @transform_1, window_bounds = array<i64: 1, 16, 512>}, {pipeline_mode = #tpu.pipeline_mode<synchronous>, transform_indices = @transform_2, window_bounds = array<i64: 3, 16, 288>}, {pipeline_mode = #tpu.pipeline_mode<synchronous>, transform_indices = @transform_3, window_bounds = array<i64: 16, 1>}, {pipeline_mode = #tpu.pipeline_mode<synchronous>, transform_indices = @transform_4, window_bounds = array<i64: 16, 1>}, {pipeline_mode = #tpu.pipeline_mode<synchronous>, transform_indices = @transform_5, window_bounds = array<i64: 16, 1>}, {pipeline_mode = #tpu.pipeline_mode<synchronous>, transform_indices = @transform_6, window_bounds = array<i64: 1, 16>}, {pipeline_mode = #tpu.pipeline_mode<synchronous>, transform_indices = @transform_7, window_bounds = array<i64: 1, 1>}, {pipeline_mode = #tpu.pipeline_mode<synchronous>, transform_indices = @transform_8, window_bounds = array<i64: 16, 16>}, {pipeline_mode = #tpu.pipeline_mode<synchronous>, transform_indices = @transform_9, window_bounds = array<i64: 9, 1, 768>}, {transform_indices = @transform_10, window_bounds = array<i64: 1, 16, 512>}]} {
    %cst = arith.constant 0.000000e+00 : bf16
    %0 = vector.broadcast %cst : bf16 to vector<32x256xbf16>
    %c0 = arith.constant 0 : index
    %c0_0 = arith.constant 0 : index
    %1 = vector.load %arg12[%c0, %c0_0] : memref<32x1024xbf16, #tpu.memory_space<vmem>>, vector<32x256xbf16>
    tpu.vector_store %arg12[%c0, %c0_0], %0 {strides = array<i32>} : memref<32x1024xbf16, #tpu.memory_space<vmem>>, vector<32x256xbf16>,
    %c0_1 = arith.constant 0 : index
    %c768 = arith.constant 768 : index
    %2 = vector.load %arg12[%c0_1, %c768] : memref<32x1024xbf16, #tpu.memory_space<vmem>>, vector<32x256xbf16>
    tpu.vector_store %arg12[%c0_1, %c768], %0 {strides = array<i32>} : memref<32x1024xbf16, #tpu.memory_space<vmem>>, vector<32x256xbf16>,
    %c0_2 = arith.constant 0 : index
    %c0_3 = arith.constant 0 : index
    %c0_4 = arith.constant 0 : index
    %3 = vector.load %arg1[%c0_2, %c0_3, %c0_4] : memref<1x16x512xf32, #tpu.memory_space<vmem>>, vector<1x16x512xf32>
    %4 = vector.shape_cast %3 : vector<1x16x512xf32> to vector<16x512xf32>
    %5 = arith.truncf %4 : vector<16x512xf32> to vector<16x512xbf16>
    %c0_5 = arith.constant 0 : index
    %c256 = arith.constant 256 : index
    %6 = vector.load %arg12[%c0_5, %c256] : memref<32x1024xbf16, #tpu.memory_space<vmem>>, vector<16x512xbf16>
    tpu.vector_store %arg12[%c0_5, %c256], %5 {strides = array<i32>} : memref<32x1024xbf16, #tpu.memory_space<vmem>>, vector<16x512xbf16>,
    %c0_6 = arith.constant 0 : index
    %c0_7 = arith.constant 0 : index
    %c0_8 = arith.constant 0 : index
    %7 = vector.load %arg2[%c0_6, %c0_7, %c0_8] : memref<1x16x512xf32, #tpu.memory_space<vmem>>, vector<1x16x512xf32>
    %8 = vector.shape_cast %7 : vector<1x16x512xf32> to vector<16x512xf32>
    %9 = arith.truncf %8 : vector<16x512xf32> to vector<16x512xbf16>
    %c16 = arith.constant 16 : index
    %c256_9 = arith.constant 256 : index
    %10 = vector.load %arg12[%c16, %c256_9] : memref<32x1024xbf16, #tpu.memory_space<vmem>>, vector<16x512xbf16>
    tpu.vector_store %arg12[%c16, %c256_9], %9 {strides = array<i32>} : memref<32x1024xbf16, #tpu.memory_space<vmem>>, vector<16x512xbf16>,
    %c0_10 = arith.constant 0 : index
    %c119 = arith.constant 119 : index
    %11 = vector.load %arg12[%c0_10, %c119] : memref<32x1024xbf16, #tpu.memory_space<vmem>>, vector<32x768xbf16>
    %c0_11 = arith.constant 0 : index
    %c0_12 = arith.constant 0 : index
    %c0_13 = arith.constant 0 : index
    %12 = vector.load %arg10[%c0_11, %c0_12, %c0_13] : memref<9x1x768xbf16, #tpu.memory_space<vmem>>, vector<1x1x768xbf16>
    %13 = vector.shape_cast %12 : vector<1x1x768xbf16> to vector<1x768xbf16>
    %14 = vector.broadcast %13 : vector<1x768xbf16> to vector<32x768xbf16>
    %15 = arith.mulf %11, %14 : vector<32x768xbf16>
    %c0_14 = arith.constant 0 : index
    %c0_15 = arith.constant 0 : index
    %16 = vector.load %arg13[%c0_14, %c0_15] : memref<288x768xbf16, #tpu.memory_space<vmem>>, vector<32x768xbf16>
    tpu.vector_store %arg13[%c0_14, %c0_15], %15 {strides = array<i32>} : memref<288x768xbf16, #tpu.memory_space<vmem>>, vector<32x768xbf16>,
    %c0_16 = arith.constant 0 : index
    %c120 = arith.constant 120 : index
    %17 = vector.load %arg12[%c0_16, %c120] : memref<32x1024xbf16, #tpu.memory_space<vmem>>, vector<32x768xbf16>
    %c1 = arith.constant 1 : index
    %c0_17 = arith.constant 0 : index
    %c0_18 = arith.constant 0 : index
    %18 = vector.load %arg10[%c1, %c0_17, %c0_18] : memref<9x1x768xbf16, #tpu.memory_space<vmem>>, vector<1x1x768xbf16>
    %19 = vector.shape_cast %18 : vector<1x1x768xbf16> to vector<1x768xbf16>
    %20 = vector.broadcast %19 : vector<1x768xbf16> to vector<32x768xbf16>
    %21 = arith.mulf %17, %20 : vector<32x768xbf16>
    %c32 = arith.constant 32 : index
    %c0_19 = arith.constant 0 : index
    %22 = vector.load %arg13[%c32, %c0_19] : memref<288x768xbf16, #tpu.memory_space<vmem>>, vector<32x768xbf16>
    tpu.vector_store %arg13[%c32, %c0_19], %21 {strides = array<i32>} : memref<288x768xbf16, #tpu.memory_space<vmem>>, vector<32x768xbf16>,
    %c0_20 = arith.constant 0 : index
    %c121 = arith.constant 121 : index
    %23 = vector.load %arg12[%c0_20, %c121] : memref<32x1024xbf16, #tpu.memory_space<vmem>>, vector<32x768xbf16>
    %c2 = arith.constant 2 : index
    %c0_21 = arith.constant 0 : index
    %c0_22 = arith.constant 0 : index
    %24 = vector.load %arg10[%c2, %c0_21, %c0_22] : memref<9x1x768xbf16, #tpu.memory_space<vmem>>, vector<1x1x768xbf16>
    %25 = vector.shape_cast %24 : vector<1x1x768xbf16> to vector<1x768xbf16>
    %26 = vector.broadcast %25 : vector<1x768xbf16> to vector<32x768xbf16>
    %27 = arith.mulf %23, %26 : vector<32x768xbf16>
    %c64 = arith.constant 64 : index
    %c0_23 = arith.constant 0 : index
    %28 = vector.load %arg13[%c64, %c0_23] : memref<288x768xbf16, #tpu.memory_space<vmem>>, vector<32x768xbf16>
    tpu.vector_store %arg13[%c64, %c0_23], %27 {strides = array<i32>} : memref<288x768xbf16, #tpu.memory_space<vmem>>, vector<32x768xbf16>,
    %c0_24 = arith.constant 0 : index
    %c127 = arith.constant 127 : index
    %29 = vector.load %arg12[%c0_24, %c127] : memref<32x1024xbf16, #tpu.memory_space<vmem>>, vector<32x768xbf16>
    %c3 = arith.constant 3 : index
    %c0_25 = arith.constant 0 : index
    %c0_26 = arith.constant 0 : index
    %30 = vector.load %arg10[%c3, %c0_25, %c0_26] : memref<9x1x768xbf16, #tpu.memory_space<vmem>>, vector<1x1x768xbf16>
    %31 = vector.shape_cast %30 : vector<1x1x768xbf16> to vector<1x768xbf16>
    %32 = vector.broadcast %31 : vector<1x768xbf16> to vector<32x768xbf16>
    %33 = arith.mulf %29, %32 : vector<32x768xbf16>
    %c96 = arith.constant 96 : index
    %c0_27 = arith.constant 0 : index
    %34 = vector.load %arg13[%c96, %c0_27] : memref<288x768xbf16, #tpu.memory_space<vmem>>, vector<32x768xbf16>
    tpu.vector_store %arg13[%c96, %c0_27], %33 {strides = array<i32>} : memref<288x768xbf16, #tpu.memory_space<vmem>>, vector<32x768xbf16>,
    %c0_28 = arith.constant 0 : index
    %c128 = arith.constant 128 : index
    %35 = vector.load %arg12[%c0_28, %c128] : memref<32x1024xbf16, #tpu.memory_space<vmem>>, vector<32x768xbf16>
    %c128_29 = arith.constant 128 : index
    %c0_30 = arith.constant 0 : index
    %36 = vector.load %arg13[%c128_29, %c0_30] : memref<288x768xbf16, #tpu.memory_space<vmem>>, vector<32x768xbf16>
    tpu.vector_store %arg13[%c128_29, %c0_30], %35 {strides = array<i32>} : memref<288x768xbf16, #tpu.memory_space<vmem>>, vector<32x768xbf16>,
    %c0_31 = arith.constant 0 : index
    %c129 = arith.constant 129 : index
    %37 = vector.load %arg12[%c0_31, %c129] : memref<32x1024xbf16, #tpu.memory_space<vmem>>, vector<32x768xbf16>
    %c5 = arith.constant 5 : index
    %c0_32 = arith.constant 0 : index
    %c0_33 = arith.constant 0 : index
    %38 = vector.load %arg10[%c5, %c0_32, %c0_33] : memref<9x1x768xbf16, #tpu.memory_space<vmem>>, vector<1x1x768xbf16>
    %39 = vector.shape_cast %38 : vector<1x1x768xbf16> to vector<1x768xbf16>
    %40 = vector.broadcast %39 : vector<1x768xbf16> to vector<32x768xbf16>
    %41 = arith.mulf %37, %40 : vector<32x768xbf16>
    %c160 = arith.constant 160 : index
    %c0_34 = arith.constant 0 : index
    %42 = vector.load %arg13[%c160, %c0_34] : memref<288x768xbf16, #tpu.memory_space<vmem>>, vector<32x768xbf16>
    tpu.vector_store %arg13[%c160, %c0_34], %41 {strides = array<i32>} : memref<288x768xbf16, #tpu.memory_space<vmem>>, vector<32x768xbf16>,
    %c0_35 = arith.constant 0 : index
    %c135 = arith.constant 135 : index
    %43 = vector.load %arg12[%c0_35, %c135] : memref<32x1024xbf16, #tpu.memory_space<vmem>>, vector<32x768xbf16>
    %c6 = arith.constant 6 : index
    %c0_36 = arith.constant 0 : index
    %c0_37 = arith.constant 0 : index
    %44 = vector.load %arg10[%c6, %c0_36, %c0_37] : memref<9x1x768xbf16, #tpu.memory_space<vmem>>, vector<1x1x768xbf16>
    %45 = vector.shape_cast %44 : vector<1x1x768xbf16> to vector<1x768xbf16>
    %46 = vector.broadcast %45 : vector<1x768xbf16> to vector<32x768xbf16>
    %47 = arith.mulf %43, %46 : vector<32x768xbf16>
    %c192 = arith.constant 192 : index
    %c0_38 = arith.constant 0 : index
    %48 = vector.load %arg13[%c192, %c0_38] : memref<288x768xbf16, #tpu.memory_space<vmem>>, vector<32x768xbf16>
    tpu.vector_store %arg13[%c192, %c0_38], %47 {strides = array<i32>} : memref<288x768xbf16, #tpu.memory_space<vmem>>, vector<32x768xbf16>,
    %c0_39 = arith.constant 0 : index
    %c136 = arith.constant 136 : index
    %49 = vector.load %arg12[%c0_39, %c136] : memref<32x1024xbf16, #tpu.memory_space<vmem>>, vector<32x768xbf16>
    %c7 = arith.constant 7 : index
    %c0_40 = arith.constant 0 : index
    %c0_41 = arith.constant 0 : index
    %50 = vector.load %arg10[%c7, %c0_40, %c0_41] : memref<9x1x768xbf16, #tpu.memory_space<vmem>>, vector<1x1x768xbf16>
    %51 = vector.shape_cast %50 : vector<1x1x768xbf16> to vector<1x768xbf16>
    %52 = vector.broadcast %51 : vector<1x768xbf16> to vector<32x768xbf16>
    %53 = arith.mulf %49, %52 : vector<32x768xbf16>
    %c224 = arith.constant 224 : index
    %c0_42 = arith.constant 0 : index
    %54 = vector.load %arg13[%c224, %c0_42] : memref<288x768xbf16, #tpu.memory_space<vmem>>, vector<32x768xbf16>
    tpu.vector_store %arg13[%c224, %c0_42], %53 {strides = array<i32>} : memref<288x768xbf16, #tpu.memory_space<vmem>>, vector<32x768xbf16>,
    %c0_43 = arith.constant 0 : index
    %c137 = arith.constant 137 : index
    %55 = vector.load %arg12[%c0_43, %c137] : memref<32x1024xbf16, #tpu.memory_space<vmem>>, vector<32x768xbf16>
    %c8 = arith.constant 8 : index
    %c0_44 = arith.constant 0 : index
    %c0_45 = arith.constant 0 : index
    %56 = vector.load %arg10[%c8, %c0_44, %c0_45] : memref<9x1x768xbf16, #tpu.memory_space<vmem>>, vector<1x1x768xbf16>
    %57 = vector.shape_cast %56 : vector<1x1x768xbf16> to vector<1x768xbf16>
    %58 = vector.broadcast %57 : vector<1x768xbf16> to vector<32x768xbf16>
    %59 = arith.mulf %55, %58 : vector<32x768xbf16>
    %c256_46 = arith.constant 256 : index
    %c0_47 = arith.constant 0 : index
    %60 = vector.load %arg13[%c256_46, %c0_47] : memref<288x768xbf16, #tpu.memory_space<vmem>>, vector<32x768xbf16>
    tpu.vector_store %arg13[%c256_46, %c0_47], %59 {strides = array<i32>} : memref<288x768xbf16, #tpu.memory_space<vmem>>, vector<32x768xbf16>,
    %cst_48 = arith.constant 0.000000e+00 : f32
    %61 = vector.broadcast %cst_48 : f32 to vector<16x512xf32>
    %c0_49 = arith.constant 0 : index
    %c0_50 = arith.constant 0 : index
    %c0_51 = arith.constant 0 : index
    %62 = vector.load %arg3[%c0_49, %c0_50, %c0_51] : memref<3x16x288xbf16, #tpu.memory_space<vmem>>, vector<1x16x288xbf16>
    %63 = vector.shape_cast %62 : vector<1x16x288xbf16> to vector<16x288xbf16>
    %c0_52 = arith.constant 0 : index
    %c64_53 = arith.constant 64 : index
    %64 = vector.load %arg13[%c0_52, %c64_53] : memref<288x768xbf16, #tpu.memory_space<vmem>>, vector<288x512xbf16>
    %cst_54 = arith.constant dense<0.000000e+00> : vector<16x512xf32>
    %65 = tpu.matmul %63, %64, %cst_54 {dimension_numbers = #tpu.dot_dimension_numbers<[1], [0], [0], [1], [0, 0, 1, 1], [], []>} : vector<16x288xbf16>, vector<288x512xbf16>, vector<16x512xf32> -> vector<16x512xf32>
    %66 = arith.addf %61, %65 : vector<16x512xf32>
    %c1_55 = arith.constant 1 : index
    %c0_56 = arith.constant 0 : index
    %c0_57 = arith.constant 0 : index
    %67 = vector.load %arg3[%c1_55, %c0_56, %c0_57] : memref<3x16x288xbf16, #tpu.memory_space<vmem>>, vector<1x16x288xbf16>
    %68 = vector.shape_cast %67 : vector<1x16x288xbf16> to vector<16x288xbf16>
    %c0_58 = arith.constant 0 : index
    %c128_59 = arith.constant 128 : index
    %69 = vector.load %arg13[%c0_58, %c128_59] : memref<288x768xbf16, #tpu.memory_space<vmem>>, vector<288x512xbf16>
    %cst_60 = arith.constant dense<0.000000e+00> : vector<16x512xf32>
    %70 = tpu.matmul %68, %69, %cst_60 {dimension_numbers = #tpu.dot_dimension_numbers<[1], [0], [0], [1], [0, 0, 1, 1], [], []>} : vector<16x288xbf16>, vector<288x512xbf16>, vector<16x512xf32> -> vector<16x512xf32>
    %71 = arith.addf %66, %70 : vector<16x512xf32>
    %c2_61 = arith.constant 2 : index
    %c0_62 = arith.constant 0 : index
    %c0_63 = arith.constant 0 : index
    %72 = vector.load %arg3[%c2_61, %c0_62, %c0_63] : memref<3x16x288xbf16, #tpu.memory_space<vmem>>, vector<1x16x288xbf16>
    %73 = vector.shape_cast %72 : vector<1x16x288xbf16> to vector<16x288xbf16>
    %c0_64 = arith.constant 0 : index
    %c192_65 = arith.constant 192 : index
    %74 = vector.load %arg13[%c0_64, %c192_65] : memref<288x768xbf16, #tpu.memory_space<vmem>>, vector<288x512xbf16>
    %cst_66 = arith.constant dense<0.000000e+00> : vector<16x512xf32>
    %75 = tpu.matmul %73, %74, %cst_66 {dimension_numbers = #tpu.dot_dimension_numbers<[1], [0], [0], [1], [0, 0, 1, 1], [], []>} : vector<16x288xbf16>, vector<288x512xbf16>, vector<16x512xf32> -> vector<16x512xf32>
    %76 = arith.addf %71, %75 : vector<16x512xf32>
    %c0_67 = arith.constant 0 : index
    %c0_68 = arith.constant 0 : index
    %77 = vector.load %arg4[%c0_67, %c0_68] : memref<16x1xf32, #tpu.memory_space<vmem>>, vector<16x1xf32>
    %78 = vector.broadcast %77 : vector<16x1xf32> to vector<16x512xf32>
    %79 = arith.addf %76, %78 : vector<16x512xf32>
    %cst_69 = arith.constant dense<0.000000e+00> : vector<16xf32>
    %80 = vector.multi_reduction <add>, %79, %cst_69 [1] : vector<16x512xf32> to vector<16xf32>
    %81 = vector.shape_cast %80 : vector<16xf32> to vector<16x1xf32>
    %82 = arith.mulf %79, %79 : vector<16x512xf32>
    %cst_70 = arith.constant dense<0.000000e+00> : vector<16xf32>
    %83 = vector.multi_reduction <add>, %82, %cst_70 [1] : vector<16x512xf32> to vector<16xf32>
    %84 = vector.shape_cast %83 : vector<16xf32> to vector<16x1xf32>
    %85 = tpu.concatenate %81, %84 in 1 : vector<16x1xf32>, vector<16x1xf32> -> vector<16x2xf32>
    %c0_71 = arith.constant 0 : index
    %c0_72 = arith.constant 0 : index
    %86 = vector.load %arg9[%c0_71, %c0_72] : memref<16x16xf32, #tpu.memory_space<vmem>>, vector<16x16xf32>
    %cst_73 = arith.constant dense<0.000000e+00> : vector<16x2xf32>
    %87 = tpu.matmul %86, %85, %cst_73 {dimension_numbers = #tpu.dot_dimension_numbers<[1], [0], [0], [1], [0, 0, 1, 1], [], []>} : vector<16x16xf32>, vector<16x2xf32>, vector<16x2xf32> -> vector<16x2xf32>
    %88 = vector.extract_strided_slice %87 {offsets = [0, 0], sizes = [16, 1], strides = [1, 1]} : vector<16x2xf32> to vector<16x1xf32>
    %cst_74 = arith.constant 9.765625E-4 : f32
    %89 = vector.broadcast %cst_74 : f32 to vector<16x1xf32>
    %90 = arith.mulf %88, %89 : vector<16x1xf32>
    %91 = vector.extract_strided_slice %87 {offsets = [0, 1], sizes = [16, 1], strides = [1, 1]} : vector<16x2xf32> to vector<16x1xf32>
    %cst_75 = arith.constant 9.765625E-4 : f32
    %92 = vector.broadcast %cst_75 : f32 to vector<16x1xf32>
    %93 = arith.mulf %91, %92 : vector<16x1xf32>
    %94 = arith.mulf %90, %90 : vector<16x1xf32>
    %95 = arith.subf %93, %94 : vector<16x1xf32>
    %cst_76 = arith.constant 0.000000e+00 : f32
    %96 = vector.broadcast %cst_76 : f32 to vector<16x1xf32>
    %97 = arith.maximumf %95, %96 : vector<16x1xf32>
    %98 = vector.broadcast %90 : vector<16x1xf32> to vector<16x512xf32>
    %99 = arith.subf %79, %98 : vector<16x512xf32>
    %cst_77 = arith.constant 9.99999974E-6 : f32
    %100 = vector.broadcast %cst_77 : f32 to vector<16x1xf32>
    %101 = arith.addf %97, %100 : vector<16x1xf32>
    %102 = math.rsqrt %101 : vector<16x1xf32>
    %103 = vector.broadcast %102 : vector<16x1xf32> to vector<16x512xf32>
    %104 = arith.mulf %99, %103 : vector<16x512xf32>
    %c0_78 = arith.constant 0 : index
    %c0_79 = arith.constant 0 : index
    %105 = vector.load %arg5[%c0_78, %c0_79] : memref<16x1xf32, #tpu.memory_space<vmem>>, vector<16x1xf32>
    %106 = vector.broadcast %105 : vector<16x1xf32> to vector<16x512xf32>
    %107 = arith.mulf %104, %106 : vector<16x512xf32>
    %c0_80 = arith.constant 0 : index
    %c0_81 = arith.constant 0 : index
    %108 = vector.load %arg6[%c0_80, %c0_81] : memref<16x1xf32, #tpu.memory_space<vmem>>, vector<16x1xf32>
    %109 = vector.broadcast %108 : vector<16x1xf32> to vector<16x512xf32>
    %110 = arith.addf %107, %109 : vector<16x512xf32>
    %111 = arith.negf %110 : vector<16x512xf32>
    %112 = math.exp %111 : vector<16x512xf32>
    %cst_82 = arith.constant 1.000000e+00 : f32
    %113 = vector.broadcast %cst_82 : f32 to vector<16x512xf32>
    %114 = arith.addf %113, %112 : vector<16x512xf32>
    %115 = arith.divf %113, %114 : vector<16x512xf32>
    %116 = arith.mulf %110, %115 : vector<16x512xf32>
    %c0_83 = arith.constant 0 : index
    %c0_84 = arith.constant 0 : index
    %117 = vector.load %arg7[%c0_83, %c0_84] : memref<1x16xf32, #tpu.memory_space<vmem>>, vector<1x16xf32>
    %cst_85 = arith.constant dense<0.000000e+00> : vector<1x512xf32>
    %118 = tpu.matmul %117, %116, %cst_85 {dimension_numbers = #tpu.dot_dimension_numbers<[1], [0], [0], [1], [0, 0, 1, 1], [], []>} : vector<1x16xf32>, vector<16x512xf32>, vector<1x512xf32> -> vector<1x512xf32>
    %c0_86 = arith.constant 0 : index
    %c0_87 = arith.constant 0 : index
    %119 = vector.load %arg8[%c0_86, %c0_87] : memref<1x1xf32, #tpu.memory_space<vmem>>, vector<1x1xf32>
    %120 = vector.broadcast %119 : vector<1x1xf32> to vector<1x512xf32>
    %121 = arith.addf %118, %120 : vector<1x512xf32>
    %122 = arith.negf %121 : vector<1x512xf32>
    %123 = math.exp %122 : vector<1x512xf32>
    %cst_88 = arith.constant 1.000000e+00 : f32
    %124 = vector.broadcast %cst_88 : f32 to vector<1x512xf32>
    %125 = arith.addf %124, %123 : vector<1x512xf32>
    %126 = arith.divf %124, %125 : vector<1x512xf32>
    %c0_89 = arith.constant 0 : index
    %c0_90 = arith.constant 0 : index
    %c0_91 = arith.constant 0 : index
    %127 = vector.load %arg1[%c0_89, %c0_90, %c0_91] : memref<1x16x512xf32, #tpu.memory_space<vmem>>, vector<1x16x512xf32>
    %128 = vector.shape_cast %127 : vector<1x16x512xf32> to vector<16x512xf32>
    %c0_92 = arith.constant 0 : index
    %c0_93 = arith.constant 0 : index
    %c0_94 = arith.constant 0 : index
    %129 = vector.load %arg2[%c0_92, %c0_93, %c0_94] : memref<1x16x512xf32, #tpu.memory_space<vmem>>, vector<1x16x512xf32>
    %130 = vector.shape_cast %129 : vector<1x16x512xf32> to vector<16x512xf32>
    %131 = vector.broadcast %126 : vector<1x512xf32> to vector<16x512xf32>
    %132 = arith.mulf %131, %130 : vector<16x512xf32>
    %133 = arith.addf %128, %132 : vector<16x512xf32>
    %c0_95 = arith.constant 0 : index
    %c0_96 = arith.constant 0 : index
    %c0_97 = arith.constant 0 : index
    %134 = vector.load %arg11[%c0_95, %c0_96, %c0_97] : memref<1x16x512xf32, #tpu.memory_space<vmem>>, vector<1x16x512xf32>
    %135 = vector.shape_cast %134 : vector<1x16x512xf32> to vector<16x512xf32>
    %136 = vector.shape_cast %133 : vector<16x512xf32> to vector<1x16x512xf32>
    tpu.vector_store %arg11[%c0_95, %c0_96, %c0_97], %136 {strides = array<i32>} : memref<1x16x512xf32, #tpu.memory_space<vmem>>, vector<1x16x512xf32>,
    return
  }
  func.func @transform_0(%arg0: i32) -> (i32, i32, i32) {
    %c0_i32 = arith.constant 0 : i32
    %c0_i32_0 = arith.constant 0 : i32
    %c0_i32_1 = arith.constant 0 : i32
    return %arg0, %c0_i32, %c0_i32_0 : i32, i32, i32
  }
  func.func @transform_1(%arg0: i32) -> (i32, i32, i32) {
    %c0_i32 = arith.constant 0 : i32
    %c0_i32_0 = arith.constant 0 : i32
    %c0_i32_1 = arith.constant 0 : i32
    return %arg0, %c0_i32, %c0_i32_0 : i32, i32, i32
  }
  func.func @transform_2(%arg0: i32) -> (i32, i32, i32) {
    %c0_i32 = arith.constant 0 : i32
    %c0_i32_0 = arith.constant 0 : i32
    %c0_i32_1 = arith.constant 0 : i32
    %c0_i32_2 = arith.constant 0 : i32
    return %c0_i32, %c0_i32_0, %c0_i32_1 : i32, i32, i32
  }
  func.func @transform_3(%arg0: i32) -> (i32, i32) {
    %c0_i32 = arith.constant 0 : i32
    %c0_i32_0 = arith.constant 0 : i32
    %c0_i32_1 = arith.constant 0 : i32
    return %c0_i32, %c0_i32_0 : i32, i32
  }
  func.func @transform_4(%arg0: i32) -> (i32, i32) {
    %c0_i32 = arith.constant 0 : i32
    %c0_i32_0 = arith.constant 0 : i32
    %c0_i32_1 = arith.constant 0 : i32
    return %c0_i32, %c0_i32_0 : i32, i32
  }
  func.func @transform_5(%arg0: i32) -> (i32, i32) {
    %c0_i32 = arith.constant 0 : i32
    %c0_i32_0 = arith.constant 0 : i32
    %c0_i32_1 = arith.constant 0 : i32
    return %c0_i32, %c0_i32_0 : i32, i32
  }
  func.func @transform_6(%arg0: i32) -> (i32, i32) {
    %c0_i32 = arith.constant 0 : i32
    %c0_i32_0 = arith.constant 0 : i32
    %c0_i32_1 = arith.constant 0 : i32
    return %c0_i32, %c0_i32_0 : i32, i32
  }
  func.func @transform_7(%arg0: i32) -> (i32, i32) {
    %c0_i32 = arith.constant 0 : i32
    %c0_i32_0 = arith.constant 0 : i32
    %c0_i32_1 = arith.constant 0 : i32
    return %c0_i32, %c0_i32_0 : i32, i32
  }
  func.func @transform_8(%arg0: i32) -> (i32, i32) {
    %c0_i32 = arith.constant 0 : i32
    %c0_i32_0 = arith.constant 0 : i32
    %c0_i32_1 = arith.constant 0 : i32
    return %c0_i32, %c0_i32_0 : i32, i32
  }
  func.func @transform_9(%arg0: i32) -> (i32, i32, i32) {
    %c0_i32 = arith.constant 0 : i32
    %c0_i32_0 = arith.constant 0 : i32
    %c0_i32_1 = arith.constant 0 : i32
    %c0_i32_2 = arith.constant 0 : i32
    return %c0_i32, %c0_i32_0, %c0_i32_1 : i32, i32, i32
  }
  func.func @transform_10(%arg0: i32) -> (i32, i32, i32) {
    %c0_i32 = arith.constant 0 : i32
    %c0_i32_0 = arith.constant 0 : i32
    %c0_i32_1 = arith.constant 0 : i32
    return %arg0, %c0_i32, %c0_i32_0 : i32, i32, i32
  }
}

</mosaic_0001>

<bundles_post_ra>
// kernel: tpu_custom_call.1
= control target key start
LH: loop header
LB: loop body
LE: loop exit
PB: predicated region body
PF: predicated region fallthrough
CT: control target
= control target key end

     0   :  { %s9295_s0 = inlined_call_operand.vmem [shape: f32[2,16,512], index: 0, kind: input, shape index: {}]   ;;  %s9296_s1 = inlined_call_operand.hbm [shape: f32[2,16,512], index: 1, kind: input, shape index: {}]   ;;  %s9297_s2 = inlined_call_operand.hbm [shape: bf16[3,16,288], index: 2, kind: input, shape index: {}]   ;;  %s9298_s3 = inlined_call_operand.vmem [shape: f32[16,1], index: 3, kind: input, shape index: {}]   ;;  %s9299_s4 = inlined_call_operand.vmem [shape: f32[16,1], index: 4, kind: input, shape index: {}]   ;;  %s9300_s5 = inlined_call_operand.vmem [shape: f32[16,1], index: 5, kind: input, shape index: {}]   ;;  %s9301_s6 = inlined_call_operand.vmem [shape: f32[1,16], index: 6, kind: input, shape index: {}]   ;;  %s9302_s7 = inlined_call_operand.<no memory space> [shape: f32[1,1], index: 7, kind: input, shape index: {}]   ;;  %s9303_s8 = inlined_call_operand.vmem [shape: f32[16,16], index: 8, kind: input, shape index: {}]   ;;  %s9304_s9 = inlined_call_operand.vmem [shape: bf16[9,1,768], index: 9, kind: input, shape index: {}]   ;;  %s9305_s10 = inlined_call_operand.hbm [shape: f32[2,16,512], index: 10, kind: output, shape index: {}]  }
   0x1   :  { %9345 = sst [smem:[#allocation26_spill]] %s9297_s2  ;;  %v15_v0 = vstv %s9302_s7 }
   0x2   :  { %16 = vst [vmem:[#allocation4] sm:$0x1] %v15_v0 }
   0x3   :  { %17 = vsyncpa [#allocation6], 0 }
   0x4   :  { %19 = vsyncpa [#allocation6 + $0x1], 0 }
   0x5   :  { %20 = vsyncpa [#allocation9], 0 }
   0x6   :  { %21 = vsyncpa [#allocation7], 0 }
   0x7   :  { %23 = vsyncpa [#allocation7 + $0x1], 0  ;;  %s6927_s15 = smov 0   ;;  %s6929_s16 = smov 0  }
   0x8   :  { %s6931_s17 = smov 0   ;;  %s6933_s18 = smov 0  }
   0x9 LB: > { %s6948_s7 = sadd.s32 4294967295, %s6845_s18   ;;  %s5958_s19 = sadd.s32 4294967294, %s6845_s18   ;;  %s6845_s18 = sphi %s6933_s18, %s9450_s18   ;;  %s6841_s17 = sphi %s6931_s17, %s9453_s17   ;;  %s6837_s16 = sphi %s6929_s16, %s9452_s16   ;;  %s6833_s15 = sphi %s6927_s15, %s9451_s15  }
   0xa   : > { %p75_p0 = scmp.ne.s32.totalorder %s6837_s16, %s6833_s15  ;;  %p9309_p1 = scmp.eq.s32.totalorder %s6948_s7, 0 }
   0xb   : > { %p273_p3 = scmp.eq.s32.totalorder %s5958_s19, 1  ;;  %p5959_p5 = scmp.ge.s32.totalorder %s6845_s18, 1 }
   0xc   : > { %p6957_p4 = por %p9309_p1, %p75_p0  ;;  %p280_p7 = scmp.lt.s32.totalorder %s6845_s18, 3 }
   0xd   : > { %p6962_p6 = por %p273_p3, %p75_p0  ;;  %s6847_s23 = smov [#allocation8]  }
   0xe   : > { %s9346_s20 = scalar_select %p6957_p4, 1, 0 }
   0xf   : > { %s9347_s21 = scalar_select %p6962_p6, 1, 0 }
  0x10   : > { %p6967_p8 = pnand %p5959_p5, %p280_p7  ;;  %s292_s24 = sshll.u32 %s6847_s23, 4  ;;  %s293_s24 = int_to_ptr.vmem [resolvable:$true] %s292_s24 }
  0x11   : > { %9348 = sst [smem:[#allocation14_spill]] %s9347_s21  ;;  %s6981_s26 = sadd.s32 1, %s6845_s18  }
  0x12   : > { %s9349_s22 = scalar_select %p6967_p8, 1, 0 }
  0x13   : > { %p6328_p9 = pneg %p6967_p8  ;;  %9351 = sst [smem:[#allocation15_spill]] %s6981_s26 }
  0x14   : > { %s62_s27 = sadd.s32 1, %s6841_s17  ;;  %s59_s28 = ssub.s32 %s6845_s18, %s6981_s26 }
  0x15   : > { %p6976_p11 = pnand %p6328_p9, %p9309_p1  ;;  %s6734_s29 = scalar_lea.vmem %s293_s24, 1152 }
  0x16   : > { %p6735_p13 = scmp.ne.s32.totalorder %s293_s24, %s6734_s29  ;;  %p6742_p5 = scmp.lt.s32.totalorder %s293_s24, %s293_s24 }
  0x17   : > { %p6725_p12 = pneg %p6976_p11  ;;  %p6743_p7 = scmp.lt.s32.totalorder %s6734_s29, %s6734_s29 }
  0x19   : > { %p6737_p0 = pnand %p6735_p13, %p6725_p12  ;;  %p6744_p10 = por %p6743_p7, %p6742_p5 }
  0x1b   : > { %p6738_p3 = pneg %p6737_p0 }
  0x1d   : > { %p6745_p2 = pnand %p6744_p10, %p6738_p3 }
  0x1f   : > { %6748 = shalt.err (!%p6745_p2)
}
  0x20   : > { %s6848_s30 = smov 192   ;;  %s6849_s11 = smov 12  }
  0x21   : > { %s9352_s2 = sld [smem:[#allocation26_spill]]  ;;  %p60_p9 = scmp.eq.s32.totalorder %s59_s28, 0 }
  0x22   : > { %p69_p12 = scmp.ne.s32.totalorder %s6841_s17, %s6837_s16  ;;  %p70_p10 = scmp.eq.s32.totalorder %s6845_s18, 0 }
  0x23   : > { %p6341_p2 = scmp.lt.s32.totalorder %s6845_s18, 2  ;;  %p9353_p0 = scmp.eq.s32.totalorder %s6948_s7, 1 }
  0x24   : > { %s6998_s14 = scalar_select %p60_p9, %s6841_s17, %s62_s27  }
  0x25   : > { %p71_p13 = por %p70_p10, %p69_p12  ;;  %p7002_p3 = por %p9353_p0, %p69_p12 }
  0x26   : > { %s335_s23 = sand.u32 1, %s6841_s17   ;;  %s6298_s29 = sshll.u32 %s6845_s18, 10 }
  0x27   : > { %6331 = dma.hbm_to_vmem [thread:$0]  (!%p6976_p11), %s9352_s2, 1152, %s293_s24, [#allocation9], %s6848_s30, %s6848_s30, %s6849_s11  }
  0x28   : > { %s9354_s19 = scalar_select %p7002_p3, 1, 0 }
  0x29   : > { %s5962_s26 = sshll.u32 %s335_s23, 6  ;;  %s7011_s12 = scalar_lea.hbm %s9296_s1, %s6298_s29 }
  0x2a   : > { %s339_s24 = scalar_lea.vmem [#allocation5], %s5962_s26  ;;  %p7013_p11 = pnand %p6341_p2, %p71_p13 }
  0x2b   : > { %s346_s27 = sshll.u32 %s339_s24, 4  ;;  %s7019_s30 = scalar_lea.sflag [#allocation6], %s335_s23  ;;  %s7017_s27 = int_to_ptr.vmem [resolvable:$true] %s346_s27 }
  0x2c   : > { %s6749_s11 = scalar_lea.hbm %s7011_s12, 1024  ;;  %p6751_p7 = pneg %p7013_p11 }
  0x2d   : > { %p6750_p5 = scmp.ne.s32.totalorder %s7011_s12, %s6749_s11  ;;  %s6754_s26 = scalar_lea.hbm %s9296_s1, 2048 }
  0x2e   : > { %p6755_p10 = scmp.lt.s32.totalorder %s7011_s12, %s9296_s1  ;;  %p6756_p2 = scmp.lt.s32.totalorder %s6754_s26, %s6749_s11 }
  0x2f   : > { %p6752_p9 = pnand %p6751_p7, %p6750_p5 }
  0x30   : > { %p6757_p13 = por %p6756_p2, %p6755_p10 }
  0x31   : > { %p6753_p12 = pneg %p6752_p9 }
  0x33   : > { %p6758_p0 = pnand %p6757_p13, %p6753_p12 }
  0x35   : > { %6761 = shalt.err (!%p6758_p0)
}
  0x36   : > { %s6762_s23 = scalar_lea.vmem %s7017_s27, 1024  ;;  %s6850_s24 = smov [#allocation5]  }
  0x37   : > { %p6763_p1 = scmp.ne.s32.totalorder %s7017_s27, %s6762_s23  ;;  %s6767_s2 = sshll.u32 %s6850_s24, 4  ;;  %s6768_s2 = int_to_ptr.vmem [resolvable:$false] %s6767_s2 }
  0x38   : > { %s6769_s21 = scalar_lea.vmem %s6768_s2, 2048  ;;  %p6770_p9 = scmp.lt.s32.totalorder %s7017_s27, %s6768_s2 }
  0x39   : > { %p6765_p6 = pnand %p6763_p1, %p6751_p7  ;;  %p6771_p3 = scmp.lt.s32.totalorder %s6769_s21, %s6762_s23 }
  0x3b   : > { %p6766_p5 = pneg %p6765_p6  ;;  %p6772_p4 = por %p6771_p3, %p6770_p9 }
  0x3d   : > { %p6773_p8 = pnand %p6772_p4, %p6766_p5 }
  0x3f   : > { %6776 = shalt.err (!%p6773_p8)
}
  0x40   : > { %s6851_s11 = smov 512   ;;  %s6852_s13 = smov 32  }
  0x41   : > { %6335 = dma.hbm_to_vmem [thread:$0]  (!%p7013_p11), %s7011_s12, 1024, %s7017_s27, %s7019_s30, %s6851_s11, %s6851_s11, %s6852_s13  }
  0x42   : > { %p9356_p1 = scmp.ne.s32.totalorder %s9349_s22, 0 }
  0x44   : > { %358 = sbr.rel (%p9356_p1) target bundleno = 2064 (0x810), region = 60 }
  0x49   : > { %s7043_s26 = sand.u32 1, %s6837_s16   ;;  %p9357_p4 = scmp.ne.s32.totalorder %s9346_s20, 0 }
  0x4a   : > { %s5966_s2 = sshll.u32 %s7043_s26, 6  ;;  %s361_s29 = scalar_lea.sflag [#allocation6], %s7043_s26 }
  0x4b   : > { %s7049_s25 = scalar_lea.vmem [#allocation5], %s5966_s2 }
  0x4c   : > { %6820 = dma.done.wait (%p9357_p4), %s361_s29, 1024  }
  0x4d   : > { %6822 = vsyncadd (%p9357_p4), %s361_s29, 4294966272  ;;  %p9358_p6 = scmp.eq.s32.totalorder %s6948_s7, 0 }
  0x4f   : > { %6824 = dma.done.wait (%p9358_p6), [#allocation9], 1152   ;;  %p9359_p8 = pmov %p9358_p6 }
  0x50   : > { %v518_v1 = vlaneseq  ;;  %v6853_v2 = vmov 1966171168   ;;  %v6854_v7 = vmov 0   ;;  %v7066_v9 = vld [vmem:[%s9304_s9 + $0x30] sm:$0x3f]  ;;  %s6855_s21 = smov 9  }
  0x51   : > { %6826 = vsyncadd (%p9359_p8), [#allocation9], 4294966144  ;;  %v516_v3 = vunpack.c.l.s4 %v6853_v2  ;;  %419 = vst [vmem:[#allocation2 + $0x60] sm:$0xff] %v6854_v7  ;;  %3323 = vmatprep.mubr.bf16.mxu1 %v6854_v7  ;;  %6397 = vset.pattern.permute.xlu1 %v6854_v7  ;;  %v5990_v10 = vld [vmem:[%s9304_s9 + $0x12] sm:$0x3f]  ;;  %v2430_v13 = vcombine.high %v7066_v9, %v7066_v9  ;;  %s6856_s11 = smov 127  }
  0x52   : > { %v519_v4 = vshrl.u32 %v518_v1, 7  ;;  %416 = vst [vmem:[#allocation2] sm:$0xff] %v6854_v7  ;;  %417 = vst [vmem:[#allocation2 + $0x20] sm:$0xff] %v6854_v7  ;;  %6396 = vset.pattern.permute.xlu0 %v6854_v7  ;;  %v7074_v11 = vld [vmem:[%s9304_s9 + $0xc] sm:$0x3f]  ;;  %v1328_v15 = vcombine.high %v5990_v10, %v5990_v10  ;;  %s6857_s13 = smov 121  }
  0x53   : > { %v517_v5 = vunpack.c.0.s8 %v516_v3  ;;  %418 = vst [vmem:[#allocation2 + $0x40] sm:$0xff] %v6854_v7  ;;  %420 = vst [vmem:[#allocation2 + $0x18] sm:$0xff] %v6854_v7  ;;  %v7084_v16 = vld [vmem:[%s9304_s9 + $0x6] sm:$0x3f]  ;;  %v1057_v19 = vcombine.high %v7074_v11, %v7074_v11  ;;  %s6858_s29 = smov 120   ;;  %p410_p3 = scmp.lt.s32.totalorder %s6948_s7, 1 }
  0x54   : > { %421 = vst [vmem:[#allocation2 + $0x38] sm:$0xff] %v6854_v7  ;;  %422 = vst [vmem:[#allocation2 + $0x58] sm:$0xff] %v6854_v7  ;;  %v7061_v8 = vsub.s32 0, %v519_v4  ;;  %v786_v20 = vcombine.high %v7084_v16, %v7084_v16  ;;  %s6859_s23 = smov 119   ;;  %s6860_s27 = smov 8   ;;  %vm1441_vm0 = vcmask 1039360  }
  0x55   : > { %v7059_v6 = vsub.s32 %v517_v5, %v519_v4  ;;  %423 = vst [vmem:[#allocation2 + $0x78] sm:$0xff] %v6854_v7  ;;  %s7206_s22 = scalar_select %p410_p3, %s6948_s7, 1  ;;  %vm719_vm1 = vcmask 72704   ;;  %vm1170_vm2 = vcmask 990208   ;;  %vm899_vm3 = vcmask 982016  }
  0x56   : > { %9360 = vst [vmem:[#allocation16_spill] sm:$0xff] %v7061_v8  ;;  %s6861_s20 = smov 7   ;;  %vm629_vm4 = vcmask 1043456   ;;  %vm627_vm5 = vcmask 973824   ;;  %vm990_vm6 = vcmask 64512   ;;  %vm1532_vm7 = vcmask 7168  }
  0x57   : > { %v2437_v12 = vrot.slane %v7066_v9, %v7059_v6  ;;  %v1335_v14 = vrot.slane %v5990_v10, %v7059_v6  ;;  %v1064_v17 = vrot.slane %v7074_v11, %v7059_v6  ;;  %v793_v18 = vrot.slane %v7084_v16, %v7059_v6  ;;  %s6299_s12 = sshll.u32 %s7206_s22, 6  ;;  %s6862_s22 = smov 1  }
  0x58   : > { %v1342_v51 = vrot.slane %v1328_v15, %v7059_v6  ;;  %v2444_v3 = vrot.slane %v2430_v13, %v7059_v6  ;;  %s7227_s24 = scalar_lea.vmem %s9295_s0, %s6299_s12  ;;  %vm1261_vm8 = vcmask 56320   ;;  %vm3244_vm9 = vcmask 261120   ;;  %s6308_s30 = sshll.u32 %s6948_s7, 10 }
  0x59   : > { %v2445_v21 = vcombine.high %v2437_v12, %v2437_v12  ;;  %v2453_v22 = vrot.slane %v2437_v12, %v7059_v6  ;;  %v1343_v23 = vcombine.high %v1335_v14, %v1335_v14  ;;  %v1351_v24 = vrot.slane %v1335_v14, %v7059_v6  ;;  %s9250_s7 = scalar_lea.hbm %s9305_s10, %s6308_s30  ;;  %p9446_p7 = scmp.ne.s32.totalorder %s9354_s19, 0 }
  0x5a   : > { %v1072_v25 = vcombine.high %v1064_v17, %v1064_v17  ;;  %v1080_v26 = vrot.slane %v1064_v17, %v7059_v6  ;;  %v801_v27 = vcombine.high %v793_v18, %v793_v18  ;;  %v7098_v28 = vrot.slane %v793_v18, %v7059_v6 }
  0x5b   : > { %v2467_v29 = vrot.slane %v2445_v21, %v7059_v6  ;;  %v2478_v30 = vpack.i.b16 %v2453_v22, %v2453_v22  ;;  %v1365_v31 = vrot.slane %v1343_v23, %v7059_v6  ;;  %v1376_v32 = vpack.i.b16 %v1351_v24, %v1351_v24 }
  0x5c   : > { %v1094_v33 = vrot.slane %v1072_v25, %v7059_v6  ;;  %v1105_v34 = vpack.i.b16 %v1080_v26, %v1080_v26  ;;  %v7104_v35 = vrot.slane %v801_v27, %v7059_v6  ;;  %v834_v36 = vpack.i.b16 %v7098_v28, %v7098_v28 }
  0x5d   : > { %v2483_v37 = vrot.slane %v2478_v30, %v7061_v8  ;;  %v2485_v38 = vpack.i.b16 %v2467_v29, %v2467_v29  ;;  %v1381_v39 = vrot.slane %v1376_v32, %v7061_v8  ;;  %v1383_v40 = vpack.i.b16 %v1365_v31, %v1365_v31 }
  0x5e   : > { %v1110_v41 = vrot.slane %v1105_v34, %v7061_v8  ;;  %v1112_v42 = vpack.i.b16 %v1094_v33, %v1094_v33  ;;  %v839_v43 = vrot.slane %v834_v36, %v7061_v8  ;;  %v841_v44 = vpack.i.b16 %v7104_v35, %v7104_v35  ;;  %v512_v34 = vld [vmem:[%s9304_s9] sm:$0x3f] }
  0x5f   : > { %v2490_v45 = vrot.slane %v2485_v38, %v7061_v8  ;;  %v1388_v46 = vrot.slane %v1383_v40, %v7061_v8  ;;  %v1373_v47 = vcombine.high %v1351_v24, %v1351_v24  ;;  %v1374_v48 = vcombine.high %v1365_v31, %v1365_v31 }
  0x60   : > { %v1117_v49 = vrot.slane %v1112_v42, %v7061_v8  ;;  %v846_v50 = vrot.slane %v841_v44, %v7061_v8  ;;  %v2475_v52 = vcombine.high %v2453_v22, %v2453_v22  ;;  %v1344_v59 = vcombine.high %v1342_v51, %v1342_v51 }
  0x61   : > { %v6007_v53 = vcombine.low %v2483_v37, %v2490_v45  ;;  %v5991_v54 = vcombine.low %v1381_v39, %v1388_v46  ;;  %v1390_v55 = vpack.i.b16 %v1373_v47, %v1373_v47  ;;  %v1397_v56 = vpack.i.b16 %v1374_v48, %v1374_v48 }
  0x62   : > { %v5987_v57 = vcombine.low %v1110_v41, %v1117_v49  ;;  %v5983_v58 = vcombine.low %v839_v43, %v846_v50  ;;  %v1358_v60 = vrot.slane %v1342_v51, %v7059_v6  ;;  %v2476_v63 = vcombine.high %v2467_v29, %v2467_v29 }
  0x63   : > { %2534 = vrot.lane.b32.xlu1 %v6007_v53, %s6855_s21  ;;  %1432 = vrot.lane.b32.xlu0 %v5991_v54, %s6856_s11  ;;  %v1395_v61 = vrot.slane %v1390_v55, %v7061_v8  ;;  %v1402_v62 = vrot.slane %v1397_v56, %v7061_v8  ;;  %v1372_v0 = vrot.slane %v1344_v59, %v7059_v6  ;;  %vm3993_vm10 = vcmask 523264  }
  0x64   : > { %v1404_v1 = vpack.i.b16 %v1358_v60, %v1358_v60  ;;  %v2492_v2 = vpack.i.b16 %v2475_v52, %v2475_v52  ;;  %v2499_v5 = vpack.i.b16 %v2476_v63, %v2476_v63  ;;  %v1102_v7 = vcombine.high %v1080_v26, %v1080_v26 }
  0x65   : > { %v5992_v4 = vcombine.low %v1395_v61, %v1402_v62  ;;  %v1103_v9 = vcombine.high %v1094_v33, %v1094_v33  ;;  %v1411_v12 = vpack.i.b16 %v1372_v0, %v1372_v0  ;;  %v2446_v15 = vcombine.high %v2444_v3, %v2444_v3  ;;  %v6002_v62 = vld [vmem:[%s9304_s9 + $0x2a] sm:$0x3f] }
  0x66   : > { %v1409_v10 = vrot.slane %v1404_v1, %v7061_v8  ;;  %v2497_v14 = vrot.slane %v2492_v2, %v7061_v8  ;;  %v2504_v17 = vrot.slane %v2499_v5, %v7061_v8  ;;  %v2460_v13 = vrot.slane %v2444_v3, %v7059_v6 }
  0x67   : > { %1161 = vrot.lane.b32.xlu0 %v5987_v57, %s6857_s13  ;;  %890 = vrot.lane.b32.xlu1 %v5983_v58, %s6858_s29  ;;  %v1119_v18 = vpack.i.b16 %v1102_v7, %v1102_v7  ;;  %v1416_v21 = vrot.slane %v1411_v12, %v7061_v8  ;;  %v2474_v22 = vrot.slane %v2446_v15, %v7059_v6  ;;  %vm5379_vm11 = vcmask 130048  }
  0x68   : > { %v1126_v23 = vpack.i.b16 %v1103_v9, %v1103_v9  ;;  %v1071_v24 = vrot.slane %v1057_v19, %v7059_v6  ;;  %v6008_v25 = vcombine.low %v2497_v14, %v2504_v17  ;;  %v2506_v26 = vpack.i.b16 %v2460_v13, %v2460_v13 }
  0x69   : > { %v1124_v27 = vrot.slane %v1119_v18, %v7061_v8  ;;  %v831_v29 = vcombine.high %v7098_v28, %v7098_v28  ;;  %v5993_v30 = vcombine.low %v1409_v10, %v1416_v21  ;;  %v2513_v31 = vpack.i.b16 %v2474_v22, %v2474_v22 }
  0x6a   : > { %v1131_v32 = vrot.slane %v1126_v23, %v7061_v8  ;;  %v1073_v33 = vcombine.high %v1071_v24, %v1071_v24  ;;  %v2511_v11 = vrot.slane %v2506_v26, %v7061_v8  ;;  %v1087_v19 = vrot.slane %v1071_v24, %v7059_v6  ;;  %v5998_v24 = vld [vmem:[%s9304_s9 + $0x24] sm:$0x3f] }
  0x6b   : > { %1434 = vrot.lane.b32.xlu0 %v5992_v4, %s6856_s11  ;;  %v832_v36 = vcombine.high %v7104_v35, %v7104_v35  ;;  %v848_v37 = vpack.i.b16 %v831_v29, %v831_v29  ;;  %1436 = vrot.lane.b32.xlu1 %v5993_v30, %s6856_s11  ;;  %v2518_v28 = vrot.slane %v2513_v31, %v7061_v8 }
  0x6c   : > { %v5988_v38 = vcombine.low %v1124_v27, %v1131_v32  ;;  %v1101_v39 = vrot.slane %v1073_v33, %v7059_v6  ;;  %v800_v40 = vrot.slane %v786_v20, %v7059_v6  ;;  %v1133_v41 = vpack.i.b16 %v1087_v19, %v1087_v19 }
  0x6d   : > { %v853_v42 = vrot.slane %v848_v37, %v7061_v8  ;;  %v855_v43 = vpack.i.b16 %v832_v36, %v832_v36  ;;  %v521_v44 = vrot.slane %v512_v34, %v7059_v6  ;;  %v6009_v35 = vcombine.low %v2511_v11, %v2518_v28 }
  0x6e   : > { %v1140_v45 = vpack.i.b16 %v1101_v39, %v1101_v39  ;;  %v802_v46 = vcombine.high %v800_v40, %v800_v40  ;;  %v816_v47 = vrot.slane %v800_v40, %v7059_v6  ;;  %v1138_v48 = vrot.slane %v1133_v41, %v7061_v8 }
  0x6f   : > { %2536 = vrot.lane.b32.xlu0 %v6008_v25, %s6855_s21  ;;  %v860_v49 = vrot.slane %v855_v43, %v7061_v8  ;;  %v529_v50 = vcombine.high %v521_v44, %v521_v44  ;;  %v537_v16 = vrot.slane %v521_v44, %v7059_v6  ;;  %2538 = vrot.lane.b32.xlu1 %v6009_v35, %s6855_s21 }
  0x70   : > { %v1145_v20 = vrot.slane %v1140_v45, %v7061_v8  ;;  %v830_v51 = vrot.slane %v802_v46, %v7059_v6  ;;  %v862_v52 = vpack.i.b16 %v816_v47, %v816_v47  ;;  %v514_v53 = vcombine.high %v512_v34, %v512_v34 }
  0x71   : > { %v5984_v54 = vcombine.low %v853_v42, %v860_v49  ;;  %v551_v55 = vrot.slane %v529_v50, %v7059_v6  ;;  %v562_v56 = vpack.i.b16 %v537_v16, %v537_v16  ;;  %v559_v57 = vcombine.high %v537_v16, %v537_v16  ;;  %v5994_v42 = vld [vmem:[%s9304_s9 + $0x1e] sm:$0x3f] }
  0x72   : > { %v5989_v58 = vcombine.low %v1138_v48, %v1145_v20  ;;  %v867_v59 = vrot.slane %v862_v52, %v7061_v8  ;;  %v869_v60 = vpack.i.b16 %v830_v51, %v830_v51  ;;  %v528_v61 = vrot.slane %v514_v53, %v7059_v6 }
  0x73   : > { %v567_v63 = vrot.slane %v562_v56, %v7061_v8  ;;  %v569_v0 = vpack.i.b16 %v551_v55, %v551_v55  ;;  %v560_v1 = vcombine.high %v551_v55, %v551_v55  ;;  %v576_v2 = vpack.i.b16 %v559_v57, %v559_v57  ;;  %1163 = vrot.lane.b32.xlu1 %v5988_v38, %s6857_s13 }
  0x74   : > { %1165 = vrot.lane.b32.xlu0 %v5989_v58, %s6857_s13  ;;  %v874_v3 = vrot.slane %v869_v60, %v7061_v8  ;;  %v530_v4 = vcombine.high %v528_v61, %v528_v61  ;;  %v544_v5 = vrot.slane %v528_v61, %v7059_v6  ;;  %v2168_v12 = vrot.slane %v6002_v62, %v7059_v6 }
  0x75   : > { %v574_v7 = vrot.slane %v569_v0, %v7061_v8  ;;  %v581_v9 = vrot.slane %v576_v2, %v7061_v8  ;;  %v583_v10 = vpack.i.b16 %v560_v1, %v560_v1  ;;  %v2161_v13 = vcombine.high %v6002_v62, %v6002_v62 }
  0x76   : > { %v5985_v14 = vcombine.low %v867_v59, %v874_v3  ;;  %v558_v15 = vrot.slane %v530_v4, %v7059_v6  ;;  %v590_v17 = vpack.i.b16 %v544_v5, %v544_v5  ;;  %v2176_v22 = vcombine.high %v2168_v12, %v2168_v12 }
  0x77   : > { %v5979_v18 = vcombine.low %v567_v63, %v574_v7  ;;  %v588_v21 = vrot.slane %v583_v10, %v7061_v8  ;;  %v2184_v23 = vrot.slane %v2168_v12, %v7059_v6  ;;  %v2175_v27 = vrot.slane %v2161_v13, %v7059_v6  ;;  %v465_v13 = vld [vmem:[%s7049_s25 + $0x28] sm:$0xff] }
  0x78   : > { %892 = vrot.lane.b32.xlu0 %v5984_v54, %s6858_s29  ;;  %894 = vrot.lane.b32.xlu1 %v5985_v14, %s6858_s29  ;;  %v595_v25 = vrot.slane %v590_v17, %v7061_v8  ;;  %v597_v26 = vpack.i.b16 %v558_v15, %v558_v15  ;;  %v2198_v30 = vrot.slane %v2176_v22, %v7059_v6  ;;  %v464_v17 = vld [vmem:[%s7049_s25 + $0x20] sm:$0xff] }
  0x79   : > { %v5980_v29 = vcombine.low %v581_v9, %v588_v21  ;;  %v2209_v31 = vpack.i.b16 %v2184_v23, %v2184_v23  ;;  %v2206_v32 = vcombine.high %v2184_v23, %v2184_v23  ;;  %v2177_v34 = vcombine.high %v2175_v27, %v2175_v27 }
  0x7a   : > { %v602_v33 = vrot.slane %v597_v26, %v7061_v8  ;;  %v2191_v11 = vrot.slane %v2175_v27, %v7059_v6  ;;  %v1899_v19 = vrot.slane %v5998_v24, %v7059_v6  ;;  %v2216_v37 = vpack.i.b16 %v2198_v30, %v2198_v30  ;;  %v428_v26 = vld [vmem:[%s7227_s24 + $0x20] sm:$0xff] }
  0x7b   : > { %v2214_v36 = vrot.slane %v2209_v31, %v7061_v8  ;;  %v2207_v28 = vcombine.high %v2198_v30, %v2198_v30  ;;  %v2223_v38 = vpack.i.b16 %v2206_v32, %v2206_v32  ;;  %v2205_v40 = vrot.slane %v2177_v34, %v7059_v6  ;;  %v429_v32 = vld [vmem:[%s7227_s24 + $0x28] sm:$0xff] }
  0x7c   : > { %618 = vrot.lane.b32.xlu0 %v5979_v18, %s6859_s23  ;;  %620 = vrot.lane.b32.xlu1 %v5980_v29, %s6859_s23  ;;  %v5981_v39 = vcombine.low %v595_v25, %v602_v33  ;;  %v2237_v41 = vpack.i.b16 %v2191_v11, %v2191_v11  ;;  %v2221_v43 = vrot.slane %v2216_v37, %v7061_v8  ;;  %v461_v25 = vld [vmem:[%s7049_s25 + $0x8] sm:$0xff]  ;;  %v424_v33 = vld [vmem:[%s7227_s24] sm:$0xff] }
  0x7d   : > { %v2228_v44 = vrot.slane %v2223_v38, %v7061_v8  ;;  %v2230_v35 = vpack.i.b16 %v2207_v28, %v2207_v28  ;;  %v1907_v45 = vcombine.high %v1899_v19, %v1899_v19  ;;  %v2244_v47 = vpack.i.b16 %v2205_v40, %v2205_v40  ;;  %v425_v34 = vld [vmem:[%s7227_s24 + $0x8] sm:$0xff]  ;;  %v462_v28 = vld [vmem:[%s7049_s25 + $0x10] sm:$0xff]  ;;  %v463_v38 = vld [vmem:[%s7049_s25 + $0x18] sm:$0xff] }
  0x7e   : > { %v2242_v46 = vrot.slane %v2237_v41, %v7061_v8  ;;  %v1915_v48 = vrot.slane %v1899_v19, %v7059_v6  ;;  %v1892_v49 = vcombine.high %v5998_v24, %v5998_v24  ;;  %v6003_v50 = vcombine.low %v2214_v36, %v2221_v43  ;;  %v460_v24 = vld [vmem:[%s7049_s25] sm:$0xff] }
  0x7f   : > { %v2235_v16 = vrot.slane %v2230_v35, %v7061_v8  ;;  %v1929_v20 = vrot.slane %v1907_v45, %v7059_v6  ;;  %v1630_v51 = vrot.slane %v5994_v42, %v7059_v6  ;;  %v2249_v52 = vrot.slane %v2244_v47, %v7061_v8  ;;  %v426_v35 = vld [vmem:[%s7227_s24 + $0x10] sm:$0xff]  ;;  %v427_v45 = vld [vmem:[%s7227_s24 + $0x18] sm:$0xff] }
  0x80   : > { %622 = vrot.lane.b32.xlu0 %v5981_v39, %s6859_s23  ;;  %v1940_v53 = vpack.i.b16 %v1915_v48, %v1915_v48  ;;  %v1937_v54 = vcombine.high %v1915_v48, %v1915_v48  ;;  %v1906_v55 = vrot.slane %v1892_v49, %v7059_v6  ;;  %2265 = vrot.lane.b32.xlu1 %v6003_v50, %s6860_s27  ;;  %v466_v39 = vld [vmem:[%s7049_s25 + $0x30] sm:$0xff] }
  0x81   : > { %v6004_v56 = vcombine.low %v2228_v44, %v2235_v16  ;;  %v1947_v57 = vpack.i.b16 %v1929_v20, %v1929_v20  ;;  %v1938_v58 = vcombine.high %v1929_v20, %v1929_v20  ;;  %v1638_v59 = vcombine.high %v1630_v51, %v1630_v51  ;;  %v467_v44 = vld [vmem:[%s7049_s25 + $0x38] sm:$0xff]  ;;  %v430_v50 = vld [vmem:[%s7227_s24 + $0x30] sm:$0xff] }
  0x82   : > { %v6005_v60 = vcombine.low %v2242_v46, %v2249_v52  ;;  %v1945_v61 = vrot.slane %v1940_v53, %v7061_v8  ;;  %v1954_v62 = vpack.i.b16 %v1937_v54, %v1937_v54  ;;  %v1908_v63 = vcombine.high %v1906_v55, %v1906_v55  ;;  %v431_v16 = vld [vmem:[%s7227_s24 + $0x38] sm:$0xff] }
  0x83   : > { %v1952_v0 = vrot.slane %v1947_v57, %v7061_v8  ;;  %v1961_v1 = vpack.i.b16 %v1938_v58, %v1938_v58  ;;  %v1922_v2 = vrot.slane %v1906_v55, %v7059_v6  ;;  %v1646_v3 = vrot.slane %v1630_v51, %v7059_v6 }
  0x84   : > { %2267 = vrot.lane.b32.xlu0 %v6004_v56, %s6860_s27  ;;  %v1959_v4 = vrot.slane %v1954_v62, %v7061_v8  ;;  %v1936_v5 = vrot.slane %v1908_v63, %v7059_v6  ;;  %v1660_v7 = vrot.slane %v1638_v59, %v7059_v6  ;;  %v1623_v9 = vcombine.high %v5994_v42, %v5994_v42 }
  0x85   : > { %2269 = vrot.lane.b32.xlu1 %v6005_v60, %s6860_s27  ;;  %v5999_v10 = vcombine.low %v1945_v61, %v1952_v0  ;;  %v1966_v12 = vrot.slane %v1961_v1, %v7061_v8  ;;  %v1968_v14 = vpack.i.b16 %v1922_v2, %v1922_v2  ;;  %v1671_v15 = vpack.i.b16 %v1646_v3, %v1646_v3 }
  0x86   : > { %v1975_v18 = vpack.i.b16 %v1936_v5, %v1936_v5  ;;  %v1678_v21 = vpack.i.b16 %v1660_v7, %v1660_v7  ;;  %v1668_v22 = vcombine.high %v1646_v3, %v1646_v3  ;;  %v1669_v23 = vcombine.high %v1660_v7, %v1660_v7 }
  0x87   : > { %v6000_v27 = vcombine.low %v1959_v4, %v1966_v12  ;;  %v1973_v29 = vrot.slane %v1968_v14, %v7061_v8  ;;  %v1676_v30 = vrot.slane %v1671_v15, %v7061_v8  ;;  %v1637_v31 = vrot.slane %v1623_v9, %v7059_v6 }
  0x88   : > { %1996 = vrot.lane.b32.xlu0 %v5999_v10, %s6861_s20  ;;  %v1980_v11 = vrot.slane %v1975_v18, %v7061_v8  ;;  %v1683_v19 = vrot.slane %v1678_v21, %v7061_v8  ;;  %v1685_v36 = vpack.i.b16 %v1668_v22, %v1668_v22  ;;  %v1692_v37 = vpack.i.b16 %v1669_v23, %v1669_v23 }
  0x89   : > { %1998 = vrot.lane.b32.xlu1 %v6000_v27, %s6861_s20  ;;  %v1639_v40 = vcombine.high %v1637_v31, %v1637_v31  ;;  %v1653_v41 = vrot.slane %v1637_v31, %v7059_v6  ;;  %v7254_v42 = vpack.c.bf16 %v465_v13, %v464_v17  ;;  %v7256_v43 = vpack.c.bf16 %v461_v25, %v460_v24 }
  0x8a   : > { %v6001_v46 = vcombine.low %v1973_v29, %v1980_v11  ;;  %v5995_v47 = vcombine.low %v1676_v30, %v1683_v19  ;;  %v1690_v48 = vrot.slane %v1685_v36, %v7061_v8  ;;  %v1697_v49 = vrot.slane %v1692_v37, %v7061_v8  ;;  %v1324_v29 = vld [vmem:[#allocation2 + $0x78] sm:$0xf] }
  0x8b   : > { %v1667_v20 = vrot.slane %v1639_v40, %v7059_v6  ;;  %v1699_v51 = vpack.i.b16 %v1653_v41, %v1653_v41  ;;  %494 = vst [vmem:[#allocation2 + $0x68] sm:$0xff] %v7254_v42  ;;  %492 = vst [vmem:[#allocation2 + $0x48] sm:$0xff] %v7256_v43  ;;  %v7268_v52 = vpack.c.bf16 %v429_v32, %v428_v26  ;;  %v1320_v30 = vld [vmem:[#allocation2 + $0x58] sm:$0xf] }
  0x8c   : > { %v7270_v53 = vpack.c.bf16 %v425_v34, %v424_v33  ;;  %2000 = vrot.lane.b32.xlu0 %v6001_v46, %s6861_s20  ;;  %v5996_v54 = vcombine.low %v1690_v48, %v1697_v49  ;;  %v7273_v55 = vpack.c.bf16 %v463_v38, %v462_v28  ;;  %v7275_v56 = vpack.c.bf16 %v467_v44, %v466_v39  ;;  %v1316_v36 = vld [vmem:[#allocation2 + $0x38] sm:$0xf] }
  0x8d   : > { %v7277_v57 = vpack.c.bf16 %v427_v45, %v426_v35  ;;  %1727 = vrot.lane.b32.xlu1 %v5995_v47, %s6862_s22  ;;  %v1704_v6 = vrot.slane %v1699_v51, %v7061_v8  ;;  %v1706_v58 = vpack.i.b16 %v1667_v20, %v1667_v20  ;;  %458 = vst [vmem:[#allocation2 + $0x28] sm:$0xff] %v7268_v52  ;;  %v1312_v37 = vld [vmem:[#allocation2 + $0x18] sm:$0xf] }
  0x8e   : > { %456 = vst [vmem:[#allocation2 + $0x8] sm:$0xff] %v7270_v53  ;;  %v7283_v59 = vpack.c.bf16 %v431_v16, %v430_v50  ;;  %493 = vst [vmem:[#allocation2 + $0x50] sm:$0xff] %v7273_v55  ;;  %v1053_v38 = vld [vmem:[#allocation2 + $0x78] sm:$0xf] }
  0x8f   : > { %495 = vst [vmem:[#allocation2 + $0x70] sm:$0xff] %v7275_v56  ;;  %457 = vst [vmem:[#allocation2 + $0x10] sm:$0xff] %v7277_v57  ;;  %v1711_v60 = vrot.slane %v1706_v58, %v7061_v8  ;;  %v1049_v39 = vld [vmem:[#allocation2 + $0x58] sm:$0xf] }
  0x90   : > { %459 = vst [vmem:[#allocation2 + $0x30] sm:$0xff] %v7283_v59  ;;  %1729 = vrot.lane.b32.xlu0 %v5996_v54, %s6862_s22 }
  0x91   : > { %v5997_v61 = vcombine.low %v1704_v6, %v1711_v60 }
  0x92   : > { %v7300_v5 = vld [vmem:[#allocation2 + $0x64] sm:$0xff] }
  0x93   : > { %1731 = vrot.lane.b32.xlu1 %v5997_v61, %s6862_s22  ;;  %v7302_v7 = vld [vmem:[#allocation2 + $0x44] sm:$0xff] }
  0x94   : > { %v7313_v15 = vld [vmem:[#allocation2 + $0x24] sm:$0xff] }
  0x95   : > { %v7315_v17 = vld [vmem:[#allocation2 + $0x4] sm:$0xff] }
  0x96   : > { %v1605_v8 = vld [vmem:[#allocation2 + $0xc] sm:$0xff] }
  0xd5   : > { %v7292_v62 = vpop.permute.xlu1 %2534  ;;  %v1433_v63 = vpop.permute.xlu0 %1432 }
  0xd6   : > { %v2540_v0 = vrot.slane %v7292_v62, 4  ;;  %v1438_v1 = vrot.slane %v1433_v63, 4 }
  0xd8   : > { %v1442_v2 = vsel %vm1441_vm0, %v1438_v1, %v1433_v63  ;;  %v2543_v4 = vsel %vm719_vm1, %v2540_v0, %v7292_v62  ;;  %v7378_v62 = vld [vmem:[#allocation2 + $0x54] sm:$0xff] }
  0xd9   : > { %v1463_v3 = vmul.bf16 0, %v1442_v2  ;;  %v2564_v9 = vmul.bf16 %v2543_v4, %v7300_v5  ;;  %v2560_v10 = vmul.bf16 %v2543_v4, %v7302_v7  ;;  %v7310_v12 = vpop.permute.xlu0 %1161  ;;  %v2556_v13 = vmul.bf16 %v2543_v4, %v7313_v15  ;;  %v7327_v22 = vpop.permute.xlu1 %890  ;;  %v7376_v2 = vld [vmem:[#allocation2 + $0x4c] sm:$0xff] }
  0xda   : > { %v1167_v14 = vrot.slane %v7310_v12, 4  ;;  %v2552_v18 = vmul.bf16 %v2543_v4, %v7315_v17  ;;  %v896_v24 = vrot.slane %v7327_v22, 4  ;;  %v7384_v4 = vld [vmem:[#allocation2 + $0x74] sm:$0xff] }
  0xdb   : > { %1507 = vrot.lane.b32.xlu1 %v1463_v3, %s6862_s22  ;;  %1499 = vrot.lane.b32.xlu0 %v1463_v3, %s6862_s22 }
  0xdc   : > { %v1171_v21 = vsel %vm1170_vm2, %v1167_v14, %v7310_v12  ;;  %v900_v25 = vsel %vm899_vm3, %v896_v24, %v7327_v22 }
  0xdd   : > { %v1192_v23 = vmul.bf16 0, %v1171_v21  ;;  %v1435_v26 = vpop.permute.xlu0 %1434  ;;  %v1437_v27 = vpop.permute.xlu1 %1436  ;;  %v7338_v32 = vmul.bf16 0, %v900_v25 }
  0xde   : > { %v1440_v31 = vrot.slane %v1437_v27, 4  ;;  %v1439_v19 = vrot.slane %v1435_v26, 4 }
  0xdf   : > { %2608 = vrot.lane.b32.xlu1 %v2564_v9, %s6859_s23  ;;  %2600 = vrot.lane.b32.xlu0 %v2560_v10, %s6859_s23  ;;  %v7386_v9 = vld [vmem:[#allocation2 + $0x6c] sm:$0xff] }
  0xe0   : > { %v1466_v33 = vmul.bf16 %v1440_v31, %v1324_v29  ;;  %v1462_v34 = vmul.bf16 %v1440_v31, %v1320_v30  ;;  %v1458_v41 = vmul.bf16 %v1440_v31, %v1316_v36  ;;  %v1454_v44 = vmul.bf16 %v1440_v31, %v1312_v37  ;;  %v7402_v29 = vld [vmem:[#allocation2 + $0x14] sm:$0xff] }
  0xe1   : > { %v2537_v11 = vpop.permute.xlu0 %2536  ;;  %v1443_v35 = vsel %vm629_vm4, %v1438_v1, %v1439_v19  ;;  %v1445_v45 = vsel %vm629_vm4, %v1439_v19, %v1440_v31  ;;  %v2539_v50 = vpop.permute.xlu1 %2538 }
  0xe2   : > { %v1444_v48 = vsel %vm1441_vm0, %v1443_v35, %v1435_v26  ;;  %v1446_v49 = vsel %vm1441_vm0, %v1445_v45, %v1437_v27  ;;  %v2541_v16 = vrot.slane %v2537_v11, 4  ;;  %v7359_v20 = vrot.slane %v2539_v50, 4  ;;  %v7400_v27 = vld [vmem:[#allocation2 + $0xc] sm:$0xff] }
  0xe3   : > { %1491 = vrot.lane.b32.xlu1 %v1463_v3, %s6862_s22  ;;  %1483 = vrot.lane.b32.xlu0 %v1463_v3, %s6862_s22  ;;  %v1460_v51 = vmul.bf16 %v7256_v43, %v1444_v48  ;;  %v1461_v54 = vmul.bf16 %v7273_v55, %v1446_v49  ;;  %v1465_v60 = vmul.bf16 %v7275_v56, %v1446_v49 }
  0xe4   : > { %v2544_v6 = vsel %vm629_vm4, %v2540_v0, %v2541_v16  ;;  %v2546_v58 = vsel %vm629_vm4, %v2541_v16, %v7359_v20  ;;  %v1464_v61 = vmul.bf16 %v7254_v42, %v1444_v48  ;;  %v1453_v21 = vmul.bf16 %v7277_v57, %v1446_v49 }
  0xe5   : > { %v2545_v63 = vsel %vm719_vm1, %v2544_v6, %v2537_v11  ;;  %v2547_v1 = vsel %vm719_vm1, %v2546_v58, %v2539_v50  ;;  %v1457_v25 = vmul.bf16 %v7283_v59, %v1446_v49  ;;  %v1456_v26 = vmul.bf16 %v7268_v52, %v1444_v48  ;;  %v7410_v11 = vld [vmem:[#allocation2 + $0x2c] sm:$0xff] }
  0xe6   : > { %v7346_v28 = vpop.permute.xlu0 %1165  ;;  %v2561_v0 = vmul.bf16 %v2545_v63, %v7376_v2  ;;  %v2562_v3 = vmul.bf16 %v2547_v1, %v7378_v62  ;;  %v2566_v10 = vmul.bf16 %v2547_v1, %v7384_v4  ;;  %v2553_v31 = vmul.bf16 %v2545_v63, %v7400_v27 }
  0xe7   : > { %2592 = vrot.lane.b32.xlu1 %v2556_v13, %s6859_s23  ;;  %2584 = vrot.lane.b32.xlu0 %v2552_v18, %s6859_s23  ;;  %v7349_v40 = vrot.slane %v7346_v28, 4  ;;  %v2565_v13 = vmul.bf16 %v2545_v63, %v7386_v9  ;;  %v1452_v18 = vmul.bf16 %v7270_v53, %v1444_v48 }
  0xe9   : > { %v1195_v46 = vmul.bf16 %v7349_v40, %v1053_v38  ;;  %v1191_v47 = vmul.bf16 %v7349_v40, %v1049_v39  ;;  %v2557_v38 = vmul.bf16 %v2545_v63, %v7410_v11 }
  0xeb   : > { %1236 = vrot.lane.b32.xlu1 %v1192_v23, %s6861_s20  ;;  %1228 = vrot.lane.b32.xlu0 %v1192_v23, %s6861_s20 }
  0xef   : > { %1220 = vrot.lane.b32.xlu1 %v1192_v23, %s6861_s20  ;;  %1212 = vrot.lane.b32.xlu0 %v1192_v23, %s6861_s20  ;;  %v1164_v23 = vpop.permute.xlu1 %1163 }
  0xf0   : > { %v1168_v30 = vrot.slane %v1164_v23, 4 }
  0xf2   : > { %v1172_v19 = vsel %vm629_vm4, %v1167_v14, %v1168_v30  ;;  %v1174_v36 = vsel %vm629_vm4, %v1168_v30, %v7349_v40 }
  0xf3   : > { %965 = vrot.lane.b32.xlu1 %v7338_v32, %s6860_s27  ;;  %957 = vrot.lane.b32.xlu0 %v7338_v32, %s6860_s27  ;;  %v1173_v39 = vsel %vm1170_vm2, %v1172_v19, %v1164_v23  ;;  %v895_v35 = vpop.permute.xlu1 %894  ;;  %v1045_v19 = vld [vmem:[#allocation2 + $0x38] sm:$0xf] }
  0xf4   : > { %v1189_v12 = vmul.bf16 %v7256_v43, %v1173_v39  ;;  %v1181_v48 = vmul.bf16 %v7270_v53, %v1173_v39  ;;  %v1185_v58 = vmul.bf16 %v7268_v52, %v1173_v39 }
  0xf7   : > { %1513 = vrot.lane.b32.xlu1 %v1466_v33, %s6862_s22  ;;  %1505 = vrot.lane.b32.xlu0 %v1462_v34, %s6862_s22  ;;  %v2554_v33 = vmul.bf16 %v2547_v1, %v7402_v29  ;;  %v7408_v34 = vld [vmem:[#allocation2 + $0x34] sm:$0xff] }
  0xf8   : > { %v2558_v37 = vmul.bf16 %v2547_v1, %v7408_v34 }
  0xfb   : > { %1497 = vrot.lane.b32.xlu1 %v1458_v41, %s6862_s22  ;;  %1489 = vrot.lane.b32.xlu0 %v1454_v44, %s6862_s22  ;;  %v1175_v41 = vsel %vm1170_vm2, %v1174_v36, %v7346_v28  ;;  %v893_v44 = vpop.permute.xlu0 %892  ;;  %v7434_v28 = vrot.slane %v895_v35, 4  ;;  %v1041_v36 = vld [vmem:[#allocation2 + $0x18] sm:$0xf] }
  0xfc   : > { %v1190_v14 = vmul.bf16 %v7273_v55, %v1175_v41  ;;  %v1194_v45 = vmul.bf16 %v7275_v56, %v1175_v41  ;;  %v1182_v49 = vmul.bf16 %v7277_v57, %v1175_v41  ;;  %v1186_v6 = vmul.bf16 %v7283_v59, %v1175_v41 }
  0xff   : > { %1242 = vrot.lane.b32.xlu1 %v1195_v46, %s6861_s20  ;;  %1234 = vrot.lane.b32.xlu0 %v1191_v47, %s6861_s20  ;;  %v1193_v46 = vmul.bf16 %v7254_v42, %v1173_v39  ;;  %v897_v47 = vrot.slane %v893_v44, 4 }
 0x101   : > { %v901_v50 = vsel %vm629_vm4, %v896_v24, %v897_v47  ;;  %v903_v16 = vsel %vm629_vm4, %v897_v47, %v7434_v28 }
 0x103   : > { %1501 = vrot.lane.b32.xlu1 %v1460_v51, %s6862_s22  ;;  %1503 = vrot.lane.b32.xlu0 %v1461_v54, %s6862_s22  ;;  %v619_v51 = vpop.permute.xlu0 %618  ;;  %v621_v54 = vpop.permute.xlu1 %620 }
 0x104   : > { %v625_v30 = vrot.slane %v621_v54, 4 }
 0x107   : > { %1511 = vrot.lane.b32.xlu1 %v1465_v60, %s6862_s22  ;;  %1509 = vrot.lane.b32.xlu0 %v1464_v61, %s6862_s22  ;;  %v902_v60 = vsel %vm899_vm3, %v901_v50, %v893_v44  ;;  %v904_v61 = vsel %vm899_vm3, %v903_v16, %v895_v35  ;;  %v623_v63 = vpop.permute.xlu0 %622  ;;  %v7453_v1 = vpop.permute.xlu1 %2265 }
 0x108   : > { %v918_v22 = vmul.bf16 %v7256_v43, %v902_v60  ;;  %v919_v24 = vmul.bf16 %v7273_v55, %v904_v61 }
 0x10b   : > { %2602 = vrot.lane.b32.xlu1 %v2561_v0, %s6859_s23  ;;  %2604 = vrot.lane.b32.xlu0 %v2562_v3, %s6859_s23  ;;  %v923_v0 = vmul.bf16 %v7275_v56, %v904_v61  ;;  %v922_v3 = vmul.bf16 %v7254_v42, %v902_v60 }
 0x10f   : > { %2612 = vrot.lane.b32.xlu1 %v2566_v10, %s6859_s23  ;;  %2610 = vrot.lane.b32.xlu0 %v2565_v13, %s6859_s23  ;;  %v7461_v10 = vpop.permute.xlu0 %2267  ;;  %v7463_v13 = vpop.permute.xlu1 %2269 }
 0x113   : > { %1485 = vrot.lane.b32.xlu1 %v1452_v18, %s6862_s22  ;;  %1487 = vrot.lane.b32.xlu0 %v1453_v21, %s6862_s22  ;;  %v910_v18 = vmul.bf16 %v7270_v53, %v902_v60  ;;  %v7469_v21 = vpop.permute.xlu0 %1996  ;;  %v7471_v23 = vpop.permute.xlu1 %1998 }
 0x117   : > { %1495 = vrot.lane.b32.xlu1 %v1457_v25, %s6862_s22  ;;  %1493 = vrot.lane.b32.xlu0 %v1456_v26, %s6862_s22  ;;  %v911_v25 = vmul.bf16 %v7277_v57, %v904_v61  ;;  %v624_v26 = vrot.slane %v619_v51, 4  ;;  %v7482_v39 = vpop.permute.xlu0 %2000  ;;  %v7484_v41 = vpop.permute.xlu1 %1727 }
 0x11b   : > { %2586 = vrot.lane.b32.xlu1 %v2553_v31, %s6859_s23  ;;  %2588 = vrot.lane.b32.xlu0 %v2554_v33, %s6859_s23  ;;  %v915_v31 = vmul.bf16 %v7283_v59, %v904_v61  ;;  %v914_v33 = vmul.bf16 %v7268_v52, %v902_v60  ;;  %v778_v60 = vld [vmem:[#allocation2 + $0x58] sm:$0xf] }
 0x11f   : > { %2596 = vrot.lane.b32.xlu1 %v2558_v37, %s6859_s23  ;;  %2594 = vrot.lane.b32.xlu0 %v2557_v38, %s6859_s23  ;;  %v630_v37 = vsel %vm629_vm4, %v624_v26, %v625_v30  ;;  %v7480_v38 = vrot.slane %v623_v63, 4 }
 0x120   : > { %v631_v44 = vsel %vm627_vm5, %v630_v37, %v621_v54 }
 0x121   : > { %v632_v35 = vsel %vm629_vm4, %v625_v30, %v7480_v38  ;;  %v647_v47 = vmul.bf16 %v7256_v43, %v631_v44  ;;  %v643_v30 = vmul.bf16 %v7268_v52, %v631_v44  ;;  %v507_v52 = vld [vmem:[#allocation2 + $0x58] sm:$0xf] }
 0x123   : > { %1230 = vrot.lane.b32.xlu1 %v1189_v12, %s6861_s20  ;;  %1232 = vrot.lane.b32.xlu0 %v1190_v14, %s6861_s20  ;;  %v1183_v12 = vmul.bf16 %v7349_v40, %v1041_v36  ;;  %v628_v14 = vsel %vm627_vm5, %v624_v26, %v619_v51 }
 0x127   : > { %1240 = vrot.lane.b32.xlu1 %v1194_v45, %s6861_s20  ;;  %1238 = vrot.lane.b32.xlu0 %v1193_v46, %s6861_s20  ;;  %v7496_v45 = vpop.permute.xlu0 %1729  ;;  %v7498_v46 = vpop.permute.xlu1 %1731 }
 0x12b   : > { %1214 = vrot.lane.b32.xlu1 %v1181_v48, %s6861_s20  ;;  %1216 = vrot.lane.b32.xlu0 %v1182_v49, %s6861_s20  ;;  %v646_v48 = vmul.bf16 0, %v628_v14 }
 0x12f   : > { %1224 = vrot.lane.b32.xlu1 %v1186_v6, %s6861_s20  ;;  %1222 = vrot.lane.b32.xlu0 %v1185_v58, %s6861_s20  ;;  %v651_v6 = vmul.bf16 %v7254_v42, %v631_v44  ;;  %v782_v58 = vld [vmem:[#allocation2 + $0x78] sm:$0xf] }
 0x133   : > { %959 = vrot.lane.b32.xlu1 %v918_v22, %s6860_s27  ;;  %961 = vrot.lane.b32.xlu0 %v919_v24, %s6860_s27  ;;  %v924_v22 = vmul.bf16 %v7434_v28, %v782_v58  ;;  %v920_v24 = vmul.bf16 %v7434_v28, %v778_v60 }
 0x137   : > { %969 = vrot.lane.b32.xlu1 %v923_v0, %s6860_s27  ;;  %967 = vrot.lane.b32.xlu0 %v922_v3, %s6860_s27 }
 0x13b   : > { %943 = vrot.lane.b32.xlu1 %v910_v18, %s6860_s27  ;;  %941 = vrot.lane.b32.xlu0 %v7338_v32, %s6860_s27 }
 0x13f   : > { %949 = vrot.lane.b32.xlu1 %v7338_v32, %s6860_s27  ;;  %945 = vrot.lane.b32.xlu0 %v911_v25, %s6860_s27  ;;  %v1187_v32 = vmul.bf16 %v7349_v40, %v1045_v19  ;;  %v633_v40 = vsel %vm627_vm5, %v632_v35, %v623_v63  ;;  %v639_v63 = vmul.bf16 %v7270_v53, %v631_v44  ;;  %v2272_v19 = vrot.slane %v7461_v10, 4 }
 0x140   : > { %v648_v16 = vmul.bf16 %v7273_v55, %v633_v40  ;;  %v652_v54 = vmul.bf16 %v7275_v56, %v633_v40  ;;  %v640_v18 = vmul.bf16 %v7277_v57, %v633_v40  ;;  %v644_v53 = vmul.bf16 %v7283_v59, %v633_v40 }
 0x141   : > { %v2271_v57 = vrot.slane %v7453_v1, 4  ;;  %v7559_v44 = vrot.slane %v7463_v13, 4  ;;  %v649_v40 = vmul.bf16 %v7480_v38, %v507_v52 }
 0x143   : > { %953 = vrot.lane.b32.xlu1 %v915_v31, %s6860_s27  ;;  %951 = vrot.lane.b32.xlu0 %v914_v33, %s6860_s27  ;;  %v774_v31 = vld [vmem:[#allocation2 + $0x38] sm:$0xf]  ;;  %v2275_v14 = vsel %vm629_vm4, %v2271_v57, %v2272_v19 }
 0x144   : > { %v770_v33 = vld [vmem:[#allocation2 + $0x18] sm:$0xf] }
 0x145   : > { %v912_v59 = vmul.bf16 %v7434_v28, %v770_v33  ;;  %v503_v33 = vld [vmem:[#allocation2 + $0x38] sm:$0xf] }
 0x147   : > { %1226 = vrot.lane.b32.xlu1 %v1187_v32, %s6861_s20  ;;  %1218 = vrot.lane.b32.xlu0 %v1183_v12, %s6861_s20  ;;  %v916_v32 = vmul.bf16 %v7434_v28, %v774_v31  ;;  %v511_v12 = vld [vmem:[#allocation2 + $0x78] sm:$0xf]  ;;  %v7567_v28 = vsel %vm990_vm6, %v2271_v57, %v7453_v1  ;;  %s409_s20 = scalar_lea.vmem [#allocation10], %s5966_s2  ;;  %s5850_s2 = scalar_lea.sflag [#allocation7], %s7043_s26 }
 0x148   : > { %v2291_v1 = vmul.bf16 %v7302_v7, %v7567_v28 }
 0x14b   : > { %688 = vrot.lane.b32.xlu1 %v647_v47, %s6855_s21  ;;  %686 = vrot.lane.b32.xlu0 %v646_v48, %s6855_s21 }
 0x14d   : > { %v7504_v49 = vpop.permute.xlu1 %1507  ;;  %v7506_v50 = vpop.permute.xlu0 %1499 }
 0x14f   : > { %694 = vrot.lane.b32.xlu1 %v646_v48, %s6855_s21  ;;  %690 = vrot.lane.b32.xlu0 %v648_v16, %s6855_s21  ;;  %v7571_v16 = vsel %vm990_vm6, %v2275_v14, %v7461_v10 }
 0x150   : > { %v2292_v60 = vmul.bf16 %v7376_v2, %v7571_v16  ;;  %v2296_v31 = vmul.bf16 %v7386_v9, %v7571_v16 }
 0x151   : > { %v7511_v51 = vpop.permute.xlu1 %2608  ;;  %v7513_v43 = vpop.permute.xlu0 %2600 }
 0x153   : > { %698 = vrot.lane.b32.xlu1 %v652_v54, %s6855_s21  ;;  %696 = vrot.lane.b32.xlu0 %v651_v6, %s6855_s21  ;;  %v2277_v54 = vsel %vm629_vm4, %v2272_v19, %v7559_v44  ;;  %v1523_v19 = vrot.slane %v7506_v50, 4 }
 0x154   : > { %v7587_v10 = vsel %vm990_vm6, %v2277_v54, %v7463_v13 }
 0x155   : > { %v7519_v61 = vpop.permute.xlu1 %1491  ;;  %v7521_v55 = vpop.permute.xlu0 %1483 }
 0x157   : > { %971 = vrot.lane.b32.xlu1 %v924_v22, %s6860_s27  ;;  %963 = vrot.lane.b32.xlu0 %v920_v24, %s6860_s27 }
 0x159   : > { %v7527_v56 = vpop.permute.xlu1 %2592  ;;  %v7529_v42 = vpop.permute.xlu0 %2584 }
 0x15b   : > { %672 = vrot.lane.b32.xlu1 %v639_v63, %s6855_s21  ;;  %670 = vrot.lane.b32.xlu0 %v646_v48, %s6855_s21  ;;  %v2295_v63 = vmul.bf16 %v7300_v5, %v7567_v28 }
 0x15d   : > { %v7534_v0 = vpop.permute.xlu1 %1236  ;;  %v7536_v3 = vpop.permute.xlu0 %1228 }
 0x15f   : > { %678 = vrot.lane.b32.xlu1 %v646_v48, %s6855_s21  ;;  %674 = vrot.lane.b32.xlu0 %v640_v18, %s6855_s21  ;;  %v653_v48 = vmul.bf16 %v7480_v38, %v511_v12  ;;  %v2293_v18 = vmul.bf16 %v7378_v62, %v7587_v10  ;;  %v499_v12 = vld [vmem:[#allocation2 + $0x18] sm:$0xf] }
 0x161   : > { %v7541_v25 = vpop.permute.xlu1 %1220  ;;  %v7543_v26 = vpop.permute.xlu0 %1212 }
 0x163   : > { %682 = vrot.lane.b32.xlu1 %v644_v53, %s6855_s21  ;;  %680 = vrot.lane.b32.xlu0 %v643_v30, %s6855_s21  ;;  %v2297_v30 = vmul.bf16 %v7384_v4, %v7587_v10 }
 0x165   : > { %v7551_v36 = vpop.permute.xlu1 %965  ;;  %v7553_v37 = vpop.permute.xlu0 %957 }
 0x167   : > { %955 = vrot.lane.b32.xlu1 %v916_v32, %s6860_s27  ;;  %947 = vrot.lane.b32.xlu0 %v912_v59, %s6860_s27 }
 0x169   : > { %v1514_v35 = vpop.permute.xlu1 %1513  ;;  %v1506_v47 = vpop.permute.xlu0 %1505 }
 0x16a   : > { %v1526_v57 = vrot.slane %v1506_v47, 4 }
 0x16b   : > { %700 = vrot.lane.b32.xlu1 %v653_v48, %s6855_s21  ;;  %692 = vrot.lane.b32.xlu0 %v649_v40, %s6855_s21  ;;  %v645_v40 = vmul.bf16 %v7480_v38, %v503_v33 }
 0x16d   : > { %v7577_v6 = vpop.permute.xlu1 %1497  ;;  %v7579_v58 = vpop.permute.xlu0 %1489 }
 0x16f   : > { %2333 = vrot.lane.b32.xlu1 %v2292_v60, %s6858_s29  ;;  %2331 = vrot.lane.b32.xlu0 %v2291_v1, %s6858_s29 }
 0x171   : > { %v7591_v22 = vpop.permute.xlu1 %1242  ;;  %v7593_v24 = vpop.permute.xlu0 %1234 }
 0x173   : > { %2339 = vrot.lane.b32.xlu1 %v2295_v63, %s6858_s29  ;;  %2335 = vrot.lane.b32.xlu0 %v2293_v18, %s6858_s29  ;;  %v641_v18 = vmul.bf16 %v7480_v38, %v499_v12  ;;  %v2283_v38 = vmul.bf16 %v7315_v17, %v7567_v28 }
 0x175   : > { %v1502_v13 = vpop.permute.xlu1 %1501  ;;  %v1504_v53 = vpop.permute.xlu0 %1503 }
 0x176   : > { %v1524_v32 = vrot.slane %v1502_v13, 4  ;;  %v1525_v59 = vrot.slane %v1504_v53, 4 }
 0x177   : > { %2343 = vrot.lane.b32.xlu1 %v2297_v30, %s6858_s29  ;;  %2341 = vrot.lane.b32.xlu0 %v2296_v31, %s6858_s29  ;;  %v1527_v30 = vrot.slane %v7504_v49, 4  ;;  %v1530_v31 = vrot.slane %v1514_v35, 4 }
 0x178   : > { %v1544_v52 = vsel %vm629_vm4, %v1523_v19, %v1524_v32  ;;  %v1546_v14 = vsel %vm629_vm4, %v1524_v32, %v1525_v59  ;;  %v1548_v48 = vsel %vm629_vm4, %v1525_v59, %v1526_v57  ;;  %v2002_v19 = vrot.slane %v7469_v21, 4 }
 0x179   : > { %v7614_v54 = vsel %vm1532_vm7, %v7506_v50, %v1544_v52  ;;  %v7617_v47 = vsel %vm1532_vm7, %v1502_v13, %v1546_v14  ;;  %v1549_v60 = vsel %vm1532_vm7, %v1504_v53, %v1548_v48  ;;  %v1512_v1 = vpop.permute.xlu1 %1511  ;;  %v1510_v63 = vpop.permute.xlu0 %1509  ;;  %v2003_v13 = vrot.slane %v7471_v23, 4 }
 0x17a   : > { %1574 = vst [vmem:[#allocation3 + $0x150] sm:$0xff] %v7614_v54  ;;  %1575 = vst [vmem:[#allocation3 + $0x158] sm:$0xff] %v7617_v47  ;;  %v1529_v33 = vrot.slane %v1512_v1, 4  ;;  %v1528_v50 = vrot.slane %v1510_v63, 4  ;;  %v2284_v32 = vmul.bf16 %v7400_v27, %v7571_v16  ;;  %v2624_v59 = vrot.slane %v7513_v43, 4 }
 0x17b   : > { %1576 = vst [vmem:[#allocation3 + $0x160] sm:$0xff] %v1549_v60  ;;  %684 = vrot.lane.b32.xlu1 %v645_v40, %s6855_s21  ;;  %676 = vrot.lane.b32.xlu0 %v641_v18, %s6855_s21  ;;  %s6863_s21 = smov 64  }
 0x17c   : > { %v1554_v35 = vsel %vm629_vm4, %v1529_v33, %v1530_v31  ;;  %v1550_v53 = vsel %vm629_vm4, %v1527_v30, %v1528_v50  ;;  %v1552_v57 = vsel %vm629_vm4, %v1528_v50, %v1529_v33  ;;  %v2006_v31 = vsel %vm629_vm4, %v2002_v19, %v2003_v13 }
 0x17d   : > { %v1555_v12 = vsel %vm1532_vm7, %v1512_v1, %v1554_v35  ;;  %v7639_v52 = vsel %vm1532_vm7, %v7504_v49, %v1550_v53  ;;  %v7642_v14 = vsel %vm1532_vm7, %v1510_v63, %v1552_v57  ;;  %v2603_v17 = vpop.permute.xlu1 %2602  ;;  %v7644_v48 = vpop.permute.xlu0 %2604  ;;  %v2287_v63 = vmul.bf16 %v7313_v15, %v7567_v28  ;;  %v1616_v49 = vld [vmem:[#allocation2 + $0x64] sm:$0xff] }
 0x17e   : > { %9361 = vst [vmem:[#allocation17_spill] sm:$0xff] %v7644_v48  ;;  %1579 = vst [vmem:[#allocation3 + $0x178] sm:$0xff] %v1555_v12  ;;  %v2625_v40 = vrot.slane %v2603_v17, 4  ;;  %v9313_v60 = vrot.slane %v7644_v48, 4  ;;  %v7669_v35 = vrot.slane %v7482_v39, 4  ;;  %v2628_v15 = vrot.slane %v7511_v51, 4 }
 0x17f   : > { %1577 = vst [vmem:[#allocation3 + $0x168] sm:$0xff] %v7639_v52  ;;  %1578 = vst [vmem:[#allocation3 + $0x170] sm:$0xff] %v7642_v14  ;;  %2317 = vrot.lane.b32.xlu1 %v2284_v32, %s6858_s29  ;;  %2315 = vrot.lane.b32.xlu0 %v2283_v38, %s6858_s29  ;;  %v2285_v38 = vmul.bf16 %v7402_v29, %v7587_v10 }
 0x180   : > { %v2644_v33 = vsel %vm629_vm4, %v2624_v59, %v2625_v40  ;;  %v2646_v50 = vsel %vm629_vm4, %v2625_v40, %v9313_v60  ;;  %v7686_v40 = vsel %vm1261_vm8, %v2002_v19, %v7469_v21  ;;  %v2008_v19 = vsel %vm629_vm4, %v2003_v13, %v7669_v35 }
 0x181   : > { %v7674_v28 = vsel %vm627_vm5, %v7513_v43, %v2644_v33  ;;  %v7677_v53 = vsel %vm627_vm5, %v2603_v17, %v2646_v50  ;;  %v7679_v57 = vpop.permute.xlu1 %2612  ;;  %v2611_v32 = vpop.permute.xlu0 %2610  ;;  %v2289_v43 = vmul.bf16 %v7408_v34, %v7587_v10  ;;  %v2288_v17 = vmul.bf16 %v7410_v11, %v7571_v16 }
 0x182   : > { %9362 = vst [vmem:[#allocation18_spill] sm:$0xff] %v7679_v57  ;;  %2674 = vst [vmem:[#allocation3 + $0x330] sm:$0xff] %v7674_v28  ;;  %v9314_v59 = vrot.slane %v7679_v57, 4  ;;  %v2629_v12 = vrot.slane %v2611_v32, 4  ;;  %v7696_v33 = vsel %vm1261_vm8, %v2006_v31, %v7471_v23  ;;  %v1515_v50 = vrot.slane %v7521_v55, 4 }
 0x183   : > { %2675 = vst [vmem:[#allocation3 + $0x338] sm:$0xff] %v7677_v53  ;;  %2323 = vrot.lane.b32.xlu1 %v2287_v63, %s6858_s29  ;;  %2319 = vrot.lane.b32.xlu0 %v2285_v38, %s6858_s29  ;;  %v1518_v10 = vrot.slane %v7579_v58, 4  ;;  %v2022_v13 = vmul.bf16 %v7302_v7, %v7686_v40  ;;  %v1613_v58 = vld [vmem:[#allocation2 + $0x4c] sm:$0xff] }
 0x184   : > { %v2650_v60 = vsel %vm629_vm4, %v2628_v15, %v2629_v12  ;;  %v2652_v21 = vsel %vm629_vm4, %v2629_v12, %v9314_v59 }
 0x185   : > { %v7708_v16 = vsel %vm627_vm5, %v7511_v51, %v2650_v60  ;;  %v7711_v23 = vsel %vm627_vm5, %v2611_v32, %v2652_v21  ;;  %v1486_v63 = vpop.permute.xlu1 %1485  ;;  %v1488_v31 = vpop.permute.xlu0 %1487  ;;  %v2145_v60 = vld [vmem:[#allocation2 + $0x1c] sm:$0xf] }
 0x186   : > { %v6410_v38 = vld [vmem:[#allocation3 + $0x158] ss:$24 sps:$4 sm:$0xff]   ;;  %v6412_v15 = vld [vmem:[#allocation3 + $0x154] ss:$24 sps:$4 sm:$0xff]   ;;  %2677 = vst [vmem:[#allocation3 + $0x348] sm:$0xff] %v7708_v16  ;;  %2678 = vst [vmem:[#allocation3 + $0x350] sm:$0xff] %v7711_v23  ;;  %v2286_v51 = vmul.bf16 %v7559_v44, %v2145_v60 }
 0x187   : > { %v1516_v12 = vrot.slane %v1486_v63, 4  ;;  %v1517_v59 = vrot.slane %v1488_v31, 4  ;;  %2327 = vrot.lane.b32.xlu1 %v2289_v43, %s6858_s29  ;;  %2325 = vrot.lane.b32.xlu0 %v2288_v17, %s6858_s29  ;;  %v2023_v43 = vmul.bf16 %v7376_v2, %v7696_v33  ;;  %v7734_v17 = vsel %vm1261_vm8, %v2008_v19, %v7482_v39 }
 0x188   : > { %3248 = vmatprep.subr.bf16.mxu0 %v6410_v38  ;;  %v1522_v2 = vrot.slane %v7577_v6, 4 }
 0x189   : > { %v1531_v21 = vsel %vm629_vm4, %v1515_v50, %v1516_v12  ;;  %v1534_v30 = vsel %vm629_vm4, %v1516_v12, %v1517_v59  ;;  %v1536_v18 = vsel %vm629_vm4, %v1517_v59, %v1518_v10  ;;  %v1496_v12 = vpop.permute.xlu1 %1495  ;;  %3249 = vmatpush1.bf16.msra.mxu0 %v6412_v15  ;;  %v1494_v59 = vpop.permute.xlu0 %1493  ;;  %v1519_v10 = vrot.slane %v7519_v61, 4 }
 0x18a   : > { %v7738_v7 = vsel %vm1532_vm7, %v7521_v55, %v1531_v21  ;;  %v7741_v32 = vsel %vm1532_vm7, %v1486_v63, %v1534_v30  ;;  %v1537_v50 = vsel %vm1532_vm7, %v1488_v31, %v1536_v18  ;;  %v1521_v39 = vrot.slane %v1496_v12, 4 }
 0x18b   : > { %1568 = vst [vmem:[#allocation3 + $0x120] sm:$0xff] %v7738_v7  ;;  %1569 = vst [vmem:[#allocation3 + $0x128] sm:$0xff] %v7741_v32  ;;  %v1520_v55 = vrot.slane %v1494_v59, 4  ;;  %2064 = vrot.lane.b32.xlu1 %v2023_v43, %s6857_s13  ;;  %2062 = vrot.lane.b32.xlu0 %v2022_v13, %s6857_s13  ;;  %v2026_v18 = vmul.bf16 %v7300_v5, %v7686_v40  ;;  %v2024_v63 = vmul.bf16 %v7378_v62, %v7734_v17 }
 0x18c   : > { %1570 = vst [vmem:[#allocation3 + $0x130] sm:$0xff] %v1537_v50  ;;  %v1542_v30 = vsel %vm629_vm4, %v1521_v39, %v1522_v2  ;;  %v2616_v31 = vrot.slane %v7529_v42, 4 }
 0x18d   : > { %v1538_v19 = vsel %vm629_vm4, %v1519_v10, %v1520_v55  ;;  %v1540_v6 = vsel %vm629_vm4, %v1520_v55, %v1521_v39  ;;  %v1543_v38 = vsel %vm1532_vm7, %v1496_v12, %v1542_v30  ;;  %v2587_v5 = vpop.permute.xlu1 %2586  ;;  %v7766_v21 = vpop.permute.xlu0 %2588  ;;  %v6413_v43 = vld [vmem:[#allocation3 + $0x338] ss:$24 sps:$4 sm:$0xff]   ;;  %v6415_v50 = vld [vmem:[#allocation3 + $0x334] ss:$24 sps:$4 sm:$0xff]   ;;  %v2027_v30 = vmul.bf16 %v7386_v9, %v7696_v33 }
 0x18e   : > { %v7761_v15 = vsel %vm1532_vm7, %v7519_v61, %v1538_v19  ;;  %v7764_v13 = vsel %vm1532_vm7, %v1494_v59, %v1540_v6  ;;  %9363 = vst [vmem:[#allocation19_spill] sm:$0xff] %v7766_v21  ;;  %1573 = vst [vmem:[#allocation3 + $0x148] sm:$0xff] %v1543_v38  ;;  %v2617_v62 = vrot.slane %v2587_v5, 4  ;;  %v9315_v12 = vrot.slane %v7766_v21, 4  ;;  %3303 = vmatprep.subr.bf16.mxu1 %v6413_v43  ;;  %v2157_v19 = vld [vmem:[#allocation2 + $0x7c] sm:$0xf] }
 0x18f   : > { %1571 = vst [vmem:[#allocation3 + $0x138] sm:$0xff] %v7761_v15  ;;  %1572 = vst [vmem:[#allocation3 + $0x140] sm:$0xff] %v7764_v13  ;;  %2070 = vrot.lane.b32.xlu1 %v2026_v18, %s6857_s13  ;;  %2066 = vrot.lane.b32.xlu0 %v2024_v63, %s6857_s13  ;;  %v2153_v18 = vld [vmem:[#allocation2 + $0x5c] sm:$0xf]  ;;  %v2620_v6 = vrot.slane %v7527_v56, 4  ;;  %v2028_v43 = vmul.bf16 %v7384_v4, %v7734_v17  ;;  %v2298_v4 = vmul.bf16 %v7559_v44, %v2157_v19  ;;  %v8112_v21 = vld [vmem:[#allocation2 + $0x6c] sm:$0xff] }
 0x190   : > { %v2632_v39 = vsel %vm629_vm4, %v2616_v31, %v2617_v62  ;;  %v2634_v55 = vsel %vm629_vm4, %v2617_v62, %v9315_v12  ;;  %3304 = vmatpush1.bf16.msra.mxu1 %v6415_v50  ;;  %1602 = vst [vmem:[#allocation3 + $0x1d0] sm:$0xff] %v8112_v21 }
 0x191   : > { %v7790_v63 = vsel %vm627_vm5, %v7529_v42, %v2632_v39  ;;  %v7793_v38 = vsel %vm627_vm5, %v2587_v5, %v2634_v55  ;;  %v7795_v31 = vpop.permute.xlu1 %2596  ;;  %v2595_v2 = vpop.permute.xlu0 %2594  ;;  %v1252_v42 = vrot.slane %v7536_v3, 4  ;;  %v7810_v39 = vld [vmem:[#allocation2 + $0x4] sm:$0xff]  ;;  %v1255_v55 = vrot.slane %v7593_v24, 4 }
 0x192   : > { %9364 = vst [vmem:[#allocation20_spill] sm:$0xff] %v7795_v31  ;;  %2668 = vst [vmem:[#allocation3 + $0x300] sm:$0xff] %v7790_v63  ;;  %v9316_v9 = vrot.slane %v7795_v31, 4  ;;  %v2621_v62 = vrot.slane %v2595_v2, 4  ;;  %v7838_v24 = vld [vmem:[#allocation2 + $0x24] sm:$0xff] }
 0x193   : > { %2669 = vst [vmem:[#allocation3 + $0x308] sm:$0xff] %v7793_v38  ;;  %2074 = vrot.lane.b32.xlu1 %v2028_v43, %s6857_s13  ;;  %2072 = vrot.lane.b32.xlu0 %v2027_v30, %s6857_s13  ;;  %v8126_v31 = vld [vmem:[#allocation2 + $0x4] sm:$0xff] }
 0x194   : > { %v2638_v5 = vsel %vm629_vm4, %v2620_v6, %v2621_v62  ;;  %v2640_v50 = vsel %vm629_vm4, %v2621_v62, %v9316_v9  ;;  %v2294_v6 = vmul.bf16 %v7559_v44, %v2153_v18  ;;  %1592 = vst [vmem:[#allocation3 + $0x180] sm:$0xff] %v8126_v31 }
 0x195   : > { %v7815_v12 = vsel %vm627_vm5, %v7527_v56, %v2638_v5  ;;  %v7818_v30 = vsel %vm627_vm5, %v2595_v2, %v2640_v50  ;;  %v1231_v43 = vpop.permute.xlu1 %1230  ;;  %v1233_v10 = vpop.permute.xlu0 %1232  ;;  %v2014_v56 = vmul.bf16 %v7686_v40, %v7810_v39 }
 0x196   : > { %v6416_v59 = vld [vmem:[#allocation3 + $0x128] ss:$24 sps:$4 sm:$0xff]   ;;  %v6418_v61 = vld [vmem:[#allocation3 + $0x124] ss:$24 sps:$4 sm:$0xff]   ;;  %2671 = vst [vmem:[#allocation3 + $0x318] sm:$0xff] %v7815_v12  ;;  %2672 = vst [vmem:[#allocation3 + $0x320] sm:$0xff] %v7818_v30 }
 0x197   : > { %v1253_v19 = vrot.slane %v1231_v43, 4  ;;  %v1254_v62 = vrot.slane %v1233_v10, 4  ;;  %2345 = vrot.lane.b32.xlu1 %v2298_v4, %s6858_s29  ;;  %2337 = vrot.lane.b32.xlu0 %v2294_v6, %s6858_s29 }
 0x198   : > { %3250 = vmatprep.subr.bf16.mxu0 %v6416_v59  ;;  %v2015_v59 = vmul.bf16 %v7400_v27, %v7696_v33  ;;  %v2018_v27 = vmul.bf16 %v7686_v40, %v7838_v24 }
 0x199   : > { %v1273_v5 = vsel %vm629_vm4, %v1252_v42, %v1253_v19  ;;  %v1275_v50 = vsel %vm629_vm4, %v1253_v19, %v1254_v62  ;;  %v1277_v9 = vsel %vm629_vm4, %v1254_v62, %v1255_v55  ;;  %v1241_v42 = vpop.permute.xlu1 %1240  ;;  %3251 = vmatpush1.bf16.msra.mxu0 %v6418_v61  ;;  %v1239_v19 = vpop.permute.xlu0 %1238  ;;  %v1256_v55 = vrot.slane %v7534_v0, 4 }
 0x19a   : > { %v7842_v4 = vsel %vm1261_vm8, %v7536_v3, %v1273_v5  ;;  %v7845_v6 = vsel %vm1261_vm8, %v1231_v43, %v1275_v50  ;;  %v1278_v18 = vsel %vm1261_vm8, %v1233_v10, %v1277_v9  ;;  %v1259_v62 = vrot.slane %v7591_v22, 4 }
 0x19b   : > { %1303 = vst [vmem:[#allocation3 + $0xf0] sm:$0xff] %v7842_v4  ;;  %1304 = vst [vmem:[#allocation3 + $0xf8] sm:$0xff] %v7845_v6  ;;  %v1258_v3 = vrot.slane %v1241_v42, 4  ;;  %v1257_v43 = vrot.slane %v1239_v19, 4  ;;  %v1734_v5 = vrot.slane %v7496_v45, 4  ;;  %2048 = vrot.lane.b32.xlu1 %v2015_v59, %s6857_s13  ;;  %2046 = vrot.lane.b32.xlu0 %v2014_v56, %s6857_s13  ;;  %v2016_v9 = vmul.bf16 %v7402_v29, %v7734_v17 }
 0x19c   : > { %1305 = vst [vmem:[#allocation3 + $0x100] sm:$0xff] %v1278_v18  ;;  %v1244_v18 = vrot.slane %v7543_v26, 4 }
 0x19d   : > { %v1283_v61 = vsel %vm629_vm4, %v1258_v3, %v1259_v62  ;;  %v1279_v22 = vsel %vm629_vm4, %v1256_v55, %v1257_v43  ;;  %v1281_v10 = vsel %vm629_vm4, %v1257_v43, %v1258_v3  ;;  %v1215_v40 = vpop.permute.xlu1 %1214  ;;  %v7873_v62 = vpop.permute.xlu0 %1216  ;;  %v6419_v55 = vld [vmem:[#allocation3 + $0x308] ss:$24 sps:$4 sm:$0xff]   ;;  %v6421_v2 = vld [vmem:[#allocation3 + $0x304] ss:$24 sps:$4 sm:$0xff]   ;;  %v1733_v3 = vrot.slane %v7484_v41, 4 }
 0x19e   : > { %v1284_v50 = vsel %vm1261_vm8, %v1241_v42, %v1283_v61  ;;  %v7868_v59 = vsel %vm1261_vm8, %v7534_v0, %v1279_v22  ;;  %v7871_v56 = vsel %vm1261_vm8, %v1239_v19, %v1281_v10  ;;  %v1245_v29 = vrot.slane %v1215_v40, 4  ;;  %v2149_v43 = vld [vmem:[#allocation2 + $0x3c] sm:$0xf]  ;;  %3305 = vmatprep.subr.bf16.mxu1 %v6419_v55  ;;  %v6424_v19 = vld [vmem:[#allocation3 + $0x160] ss:$24 sps:$4 sm:$0xff]  }
 0x19f   : > { %1308 = vst [vmem:[#allocation3 + $0x118] sm:$0xff] %v1284_v50  ;;  %1306 = vst [vmem:[#allocation3 + $0x108] sm:$0xff] %v7868_v59  ;;  %v9319_v42 = vrot.slane %v7873_v62, 4  ;;  %2054 = vrot.lane.b32.xlu1 %v2018_v27, %s6857_s13  ;;  %2050 = vrot.lane.b32.xlu0 %v2016_v9, %s6857_s13  ;;  %v2020_v27 = vmul.bf16 %v7408_v34, %v7734_v17  ;;  %v2019_v9 = vmul.bf16 %v7410_v11, %v7696_v33  ;;  %v6425_v0 = vld [vmem:[#allocation8 + $0x20] ss:$12 sps:$4 sm:$0xff]  }
 0x1a0   : > { %1307 = vst [vmem:[#allocation3 + $0x110] sm:$0xff] %v7871_v56  ;;  %v1260_v10 = vsel %vm629_vm4, %v1244_v18, %v1245_v29  ;;  %v1248_v61 = vrot.slane %v7541_v25, 4  ;;  %3306 = vmatpush1.bf16.msra.mxu1 %v6421_v2  ;;  %v1737_v34 = vsel %vm629_vm4, %v1733_v3, %v1734_v5  ;;  %v7914_v33 = vrot.slane %v7498_v46, 4  ;;  %v6422_v17 = vld [vmem:[#allocation3 + $0x15c] ss:$24 sps:$4 sm:$0xff]  }
 0x1a1   : > { %v1263_v50 = vsel %vm629_vm4, %v1245_v29, %v9319_v42  ;;  %v7900_v22 = vsel %vm1261_vm8, %v7543_v26, %v1260_v10  ;;  %v7905_v29 = vpop.permute.xlu1 %1224  ;;  %v1223_v55 = vpop.permute.xlu0 %1222  ;;  %3334 = vmatprep.subr.bf16.mxu1 %v6424_v19  ;;  %v2290_v2 = vmul.bf16 %v7559_v44, %v2149_v43  ;;  %v981_v43 = vrot.slane %v7553_v37, 4 }
 0x1a2   : > { %v7903_v18 = vsel %vm1261_vm8, %v1215_v40, %v1263_v50  ;;  %1297 = vst [vmem:[#allocation3 + $0xc0] sm:$0xff] %v7900_v22  ;;  %v9320_v11 = vrot.slane %v7905_v29, 4  ;;  %v1249_v26 = vrot.slane %v1223_v55, 4  ;;  %v7921_v40 = vsel %vm1532_vm7, %v1733_v3, %v7484_v41  ;;  %v6428_v50 = vld [vmem:[#allocation3 + $0x130] ss:$24 sps:$4 sm:$0xff]  }
 0x1a3   : > { %1298 = vst [vmem:[#allocation3 + $0xc8] sm:$0xff] %v7903_v18  ;;  %2058 = vrot.lane.b32.xlu1 %v2020_v27, %s6857_s13  ;;  %2056 = vrot.lane.b32.xlu0 %v2019_v9, %s6857_s13  ;;  %v1612_v27 = vld [vmem:[#allocation2 + $0x44] sm:$0xff]  ;;  %v7931_v9 = vsel %vm1532_vm7, %v1737_v34, %v7496_v45 }
 0x1a4   : > { %v1267_v10 = vsel %vm629_vm4, %v1248_v61, %v1249_v26  ;;  %v1269_v19 = vsel %vm629_vm4, %v1249_v26, %v9320_v11  ;;  %6085 = vmatmul.mubr.msk.bf16.vlgmr.msra.gmra.mxu1 %vm3244_vm9, %v6425_v0 }
 0x1a5   : > { %v7936_v41 = vsel %vm1261_vm8, %v7541_v25, %v1267_v10  ;;  %v7939_v3 = vsel %vm1261_vm8, %v1223_v55, %v1269_v19  ;;  %v960_v61 = vpop.permute.xlu1 %959  ;;  %3335 = vmatpush1.bf16.msra.mxu1 %v6422_v17  ;;  %v7941_v0 = vpop.permute.xlu0 %961  ;;  %v1739_v17 = vsel %vm629_vm4, %v1734_v5, %v7914_v33  ;;  %v6426_v10 = vld [vmem:[#allocation3 + $0x12c] ss:$24 sps:$4 sm:$0xff]   ;;  %v1753_v5 = vmul.bf16 %v7921_v40, %v1612_v27 }
 0x1a6   : > { %v6431_v44 = vld [vmem:[#allocation3 + $0xf4] ss:$24 sps:$4 sm:$0xff]   ;;  %1300 = vst [vmem:[#allocation3 + $0xd8] sm:$0xff] %v7936_v41  ;;  %1301 = vst [vmem:[#allocation3 + $0xe0] sm:$0xff] %v7939_v3  ;;  %v982_v60 = vrot.slane %v960_v61, 4  ;;  %v9317_v34 = vrot.slane %v7941_v0, 4  ;;  %3336 = vmatprep.subr.bf16.mxu1 %v6428_v50  ;;  %v1754_v50 = vmul.bf16 %v7931_v9, %v1613_v58 }
 0x1a7   : > { %v6429_v26 = vld [vmem:[#allocation3 + $0xf8] ss:$24 sps:$4 sm:$0xff]   ;;  %2329 = vrot.lane.b32.xlu1 %v2290_v2, %s6858_s29  ;;  %2321 = vrot.lane.b32.xlu0 %v2286_v51, %s6858_s29  ;;  %v985_v27 = vrot.slane %v7551_v36, 4  ;;  %v9373_v48 = vrot.slane %v7941_v0, 4 }
 0x1a8   : > { %v1002_v25 = vsel %vm629_vm4, %v981_v43, %v982_v60  ;;  %v1004_v55 = vsel %vm629_vm4, %v982_v60, %v9317_v34  ;;  %3252 = vmatprep.subr.bf16.mxu0 %v6429_v26  ;;  %v6434_v45 = vld [vmem:[#allocation3 + $0x100] ss:$24 sps:$4 sm:$0xff]   ;;  %v7977_v26 = vsel %vm1532_vm7, %v1739_v17, %v7498_v46  ;;  %v6432_v60 = vld [vmem:[#allocation3 + $0xfc] ss:$24 sps:$4 sm:$0xff]  }
 0x1a9   : > { %v7967_v2 = vsel %vm990_vm6, %v7553_v37, %v1002_v25  ;;  %v7970_v51 = vsel %vm990_vm6, %v960_v61, %v1004_v55  ;;  %v7972_v19 = vpop.permute.xlu1 %969  ;;  %3253 = vmatpush1.bf16.msra.mxu0 %v6431_v44  ;;  %3337 = vmatpush1.bf16.msra.mxu1 %v6426_v10  ;;  %v968_v43 = vpop.permute.xlu0 %967  ;;  %v1614_v44 = vld [vmem:[#allocation2 + $0x54] sm:$0xff] }
 0x1aa   : > { %1032 = vst [vmem:[#allocation3 + $0x90] sm:$0xff] %v7967_v2  ;;  %1033 = vst [vmem:[#allocation3 + $0x98] sm:$0xff] %v7970_v51  ;;  %v9318_v37 = vrot.slane %v7972_v19, 4  ;;  %v986_v61 = vrot.slane %v968_v43, 4  ;;  %3338 = vmatprep.subr.bf16.mxu1 %v6434_v45  ;;  %v1755_v45 = vmul.bf16 %v7977_v26, %v1614_v44  ;;  %v1884_v44 = vld [vmem:[#allocation2 + $0x5c] sm:$0xf] }
 0x1ab   : > { %1795 = vrot.lane.b32.xlu1 %v1754_v50, %s6856_s11  ;;  %1793 = vrot.lane.b32.xlu0 %v1753_v5, %s6856_s11  ;;  %v1757_v50 = vmul.bf16 %v7921_v40, %v1616_v49 }
 0x1ac   : > { %v1008_v58 = vsel %vm629_vm4, %v985_v27, %v986_v61  ;;  %v1010_v46 = vsel %vm629_vm4, %v986_v61, %v9318_v37 }
 0x1ad   : > { %v7991_v25 = vsel %vm990_vm6, %v7551_v36, %v1008_v58  ;;  %v7994_v55 = vsel %vm990_vm6, %v968_v43, %v1010_v46  ;;  %v944_v17 = vpop.permute.xlu1 %943  ;;  %3339 = vmatpush1.bf16.msra.mxu1 %v6432_v60  ;;  %v942_v10 = vpop.permute.xlu0 %941  ;;  %v6435_v5 = vld [vmem:[#allocation3 + $0xc8] ss:$24 sps:$4 sm:$0xff]   ;;  %v6437_v27 = vld [vmem:[#allocation3 + $0xc4] ss:$24 sps:$4 sm:$0xff]   ;;  %v1618_v36 = vld [vmem:[#allocation2 + $0x74] sm:$0xff] }
 0x1ae   : > { %1035 = vst [vmem:[#allocation3 + $0xa8] sm:$0xff] %v7991_v25  ;;  %1036 = vst [vmem:[#allocation3 + $0xb0] sm:$0xff] %v7994_v55  ;;  %v974_v61 = vrot.slane %v944_v17, 4  ;;  %v973_v1 = vrot.slane %v942_v10, 4  ;;  %v1617_v58 = vld [vmem:[#allocation2 + $0x6c] sm:$0xff]  ;;  %3254 = vmatprep.subr.bf16.mxu0 %v6435_v5 }
 0x1af   : > { %1801 = vrot.lane.b32.xlu1 %v1757_v50, %s6856_s11  ;;  %1797 = vrot.lane.b32.xlu0 %v1755_v45, %s6856_s11  ;;  %v1759_v50 = vmul.bf16 %v7977_v26, %v1618_v36  ;;  %v1758_v45 = vmul.bf16 %v7931_v9, %v1617_v58  ;;  %v1888_v60 = vld [vmem:[#allocation2 + $0x7c] sm:$0xf]  ;;  %v2025_v58 = vmul.bf16 %v7669_v35, %v1884_v44 }
 0x1b0   : > { %v989_v46 = vsel %vm629_vm4, %v973_v1, %v974_v61  ;;  %3255 = vmatpush1.bf16.msra.mxu0 %v6437_v27  ;;  %v2029_v36 = vmul.bf16 %v7669_v35, %v1888_v60 }
 0x1b1   : > { %v8012_v34 = vsel %vm990_vm6, %v942_v10, %v989_v46  ;;  %v950_v43 = vpop.permute.xlu1 %949  ;;  %v8014_v37 = vpop.permute.xlu0 %945 }
 0x1b2   : > { %1026 = vst [vmem:[#allocation3 + $0x60] sm:$0xff] %v8012_v34  ;;  %v9323_v49 = vrot.slane %v8014_v37, 4  ;;  %v977_v11 = vrot.slane %v950_v43, 4 }
 0x1b3   : > { %1805 = vrot.lane.b32.xlu1 %v1759_v50, %s6856_s11  ;;  %1803 = vrot.lane.b32.xlu0 %v1758_v45, %s6856_s11 }
 0x1b4   : > { %v992_v1 = vsel %vm629_vm4, %v974_v61, %v9323_v49 }
 0x1b5   : > { %v8026_v10 = vsel %vm990_vm6, %v944_v17, %v992_v1  ;;  %v8028_v5 = vpop.permute.xlu1 %953  ;;  %v952_v27 = vpop.permute.xlu0 %951  ;;  %v6438_v46 = vld [vmem:[#allocation3 + $0x98] ss:$24 sps:$4 sm:$0xff]   ;;  %v6440_v42 = vld [vmem:[#allocation3 + $0x94] ss:$24 sps:$4 sm:$0xff]  }
 0x1b6   : > { %1027 = vst [vmem:[#allocation3 + $0x68] sm:$0xff] %v8026_v10  ;;  %v9324_v50 = vrot.slane %v8028_v5, 4  ;;  %v978_v45 = vrot.slane %v952_v27, 4  ;;  %3256 = vmatprep.subr.bf16.mxu0 %v6438_v46 }
 0x1b7   : > { %2076 = vrot.lane.b32.xlu1 %v2029_v36, %s6857_s13  ;;  %2068 = vrot.lane.b32.xlu0 %v2025_v58, %s6857_s13  ;;  %v1746_v36 = vmul.bf16 %v7931_v9, %v1605_v8  ;;  %v1745_v58 = vmul.bf16 %v7810_v39, %v7921_v40  ;;  %v1749_v8 = vmul.bf16 %v7838_v24, %v7921_v40 }
 0x1b8   : > { %v996_v17 = vsel %vm629_vm4, %v977_v11, %v978_v45  ;;  %v998_v61 = vsel %vm629_vm4, %v978_v45, %v9324_v50  ;;  %3257 = vmatpush1.bf16.msra.mxu0 %v6440_v42  ;;  %v1606_v45 = vld [vmem:[#allocation2 + $0x14] sm:$0xff]  ;;  %v9366_v42 = vrot.slane %v7905_v29, 4  ;;  %v1609_v50 = vld [vmem:[#allocation2 + $0x2c] sm:$0xff] }
 0x1b9   : > { %v8041_v60 = vsel %vm990_vm6, %v950_v43, %v996_v17  ;;  %v8044_v44 = vsel %vm990_vm6, %v952_v27, %v998_v61  ;;  %v1227_v1 = vpop.permute.xlu1 %1226  ;;  %v1219_v49 = vpop.permute.xlu0 %1218  ;;  %v9367_v17 = vrot.slane %v7873_v62, 4  ;;  %v1747_v39 = vmul.bf16 %v7977_v26, %v1606_v45  ;;  %v1610_v43 = vld [vmem:[#allocation2 + $0x34] sm:$0xff] }
 0x1ba   : > { %9365 = vst [vmem:[#allocation21_spill] sm:$0xff] %v8044_v44  ;;  %1029 = vst [vmem:[#allocation3 + $0x78] sm:$0xff] %v8041_v60  ;;  %v1251_v11 = vrot.slane %v1227_v1, 4  ;;  %v1247_v46 = vrot.slane %v1219_v49, 4  ;;  %v1751_v24 = vmul.bf16 %v7977_v26, %v1610_v43  ;;  %v1750_v40 = vmul.bf16 %v7931_v9, %v1609_v50  ;;  %v1619_v26 = vld [vmem:[#allocation2 + $0x7c] sm:$0xf] }
 0x1bb   : > { %1030 = vst [vmem:[#allocation3 + $0x80] sm:$0xff] %v8044_v44  ;;  %1779 = vrot.lane.b32.xlu1 %v1746_v36, %s6856_s11  ;;  %1777 = vrot.lane.b32.xlu0 %v1745_v58, %s6856_s11  ;;  %v1615_v43 = vld [vmem:[#allocation2 + $0x5c] sm:$0xf]  ;;  %v1588_v44 = vld [vmem:[#allocation2 + $0x54] sm:$0xff] }
 0x1bc   : > { %v1271_v49 = vsel %vm629_vm4, %v9366_v42, %v1251_v11  ;;  %v1265_v61 = vsel %vm629_vm4, %v9367_v17, %v1247_v46  ;;  %1600 = vst [vmem:[#allocation3 + $0x1c0] sm:$0xff] %v1588_v44 }
 0x1bd   : > { %v1272_v1 = vsel %vm1261_vm8, %v7905_v29, %v1271_v49  ;;  %v1266_v36 = vsel %vm1261_vm8, %v7873_v62, %v1265_v61  ;;  %v689_v58 = vpop.permute.xlu1 %688  ;;  %v687_v27 = vpop.permute.xlu0 %686  ;;  %v1880_v61 = vld [vmem:[#allocation2 + $0x3c] sm:$0xf] }
 0x1be   : > { %1302 = vst [vmem:[#allocation3 + $0xe8] sm:$0xff] %v1272_v1  ;;  %1299 = vst [vmem:[#allocation3 + $0xd0] sm:$0xff] %v1266_v36  ;;  %v711_v11 = vrot.slane %v689_v58, 4  ;;  %v710_v42 = vrot.slane %v687_v27, 4 }
 0x1bf   : > { %1785 = vrot.lane.b32.xlu1 %v1749_v8, %s6856_s11  ;;  %1781 = vrot.lane.b32.xlu0 %v1747_v39, %s6856_s11  ;;  %v1876_v39 = vld [vmem:[#allocation2 + $0x1c] sm:$0xf] }
 0x1c0   : > { %v731_v29 = vsel %vm629_vm4, %v710_v42, %v711_v11  ;;  %v2021_v42 = vmul.bf16 %v7669_v35, %v1880_v61 }
 0x1c1   : > { %v8078_v62 = vsel %vm719_vm1, %v687_v27, %v731_v29  ;;  %v695_v46 = vpop.permute.xlu1 %694  ;;  %v8080_v49 = vpop.permute.xlu0 %690  ;;  %v6443_v17 = vld [vmem:[#allocation3 + $0x64] ss:$24 sps:$4 sm:$0xff]   ;;  %v2017_v29 = vmul.bf16 %v7669_v35, %v1876_v39 }
 0x1c2   : > { %9368 = vst [vmem:[#allocation22_spill] sm:$0xff] %v8078_v62  ;;  %v6441_v45 = vld [vmem:[#allocation3 + $0x68] ss:$24 sps:$4 sm:$0xff]   ;;  %761 = vst [vmem:[#allocation3 + $0x30] sm:$0xff] %v8078_v62  ;;  %v9325_v8 = vrot.slane %v8080_v49, 4  ;;  %v714_v9 = vrot.slane %v695_v46, 4 }
 0x1c3   : > { %1789 = vrot.lane.b32.xlu1 %v1751_v24, %s6856_s11  ;;  %1787 = vrot.lane.b32.xlu0 %v1750_v40, %s6856_s11  ;;  %v6444_v24 = vld [vmem:[#allocation3 + $0xcc] ss:$24 sps:$4 sm:$0xff]   ;;  %v1611_v35 = vld [vmem:[#allocation2 + $0x3c] sm:$0xf] }
 0x1c4   : > { %v733_v27 = vsel %vm629_vm4, %v711_v11, %v9325_v8  ;;  %3258 = vmatprep.subr.bf16.mxu0 %v6441_v45  ;;  %v1607_v39 = vld [vmem:[#allocation2 + $0x1c] sm:$0xf]  ;;  %v8110_v8 = vld [vmem:[#allocation2 + $0x64] sm:$0xff]  ;;  %v1752_v62 = vmul.bf16 %v7914_v33, %v1611_v35 }
 0x1c5   : > { %v8092_v50 = vsel %vm719_vm1, %v689_v58, %v733_v27  ;;  %v8094_v1 = vpop.permute.xlu1 %698  ;;  %3259 = vmatpush1.bf16.msra.mxu0 %v6443_v17  ;;  %v697_v36 = vpop.permute.xlu0 %696  ;;  %v6446_v45 = vld [vmem:[#allocation3 + $0xd0] ss:$24 sps:$4 sm:$0xff]   ;;  %1601 = vst [vmem:[#allocation3 + $0x1c8] sm:$0xff] %v8110_v8 }
 0x1c6   : > { %9369 = vst [vmem:[#allocation23_spill] sm:$0xff] %v8092_v50  ;;  %762 = vst [vmem:[#allocation3 + $0x38] sm:$0xff] %v8092_v50  ;;  %v9328_v11 = vrot.slane %v8094_v1, 4  ;;  %v715_v40 = vrot.slane %v697_v36, 4  ;;  %v8102_v58 = vld [vmem:[#allocation2 + $0x44] sm:$0xff]  ;;  %3340 = vmatprep.subr.bf16.mxu1 %v6446_v45  ;;  %v8108_v27 = vld [vmem:[#allocation2 + $0x4c] sm:$0xff]  ;;  %v1760_v45 = vmul.bf16 %v7914_v33, %v1619_v26 }
 0x1c7   : > { %2060 = vrot.lane.b32.xlu1 %v2021_v42, %s6857_s13  ;;  %2052 = vrot.lane.b32.xlu0 %v2017_v29, %s6857_s13  ;;  %1598 = vst [vmem:[#allocation3 + $0x1b0] sm:$0xff] %v8102_v58  ;;  %1599 = vst [vmem:[#allocation3 + $0x1b8] sm:$0xff] %v8108_v27  ;;  %v6450_v50 = vld [vmem:[#allocation3 + $0x9c] ss:$24 sps:$4 sm:$0xff]  }
 0x1c8   : > { %v737_v17 = vsel %vm629_vm4, %v714_v9, %v715_v40  ;;  %v739_v61 = vsel %vm629_vm4, %v715_v40, %v9328_v11  ;;  %3341 = vmatpush1.bf16.msra.mxu1 %v6444_v24  ;;  %v1756_v11 = vmul.bf16 %v7914_v33, %v1615_v43  ;;  %v9372_v24 = vrot.slane %v7972_v19, 4 }
 0x1c9   : > { %v8116_v42 = vsel %vm719_vm1, %v695_v46, %v737_v17  ;;  %v8119_v9 = vsel %vm719_vm1, %v697_v36, %v739_v61  ;;  %v972_v29 = vpop.permute.xlu1 %971  ;;  %v964_v40 = vpop.permute.xlu0 %963  ;;  %v8128_v46 = vld [vmem:[#allocation2 + $0xc] sm:$0xff]  ;;  %v8130_v17 = vld [vmem:[#allocation2 + $0x24] sm:$0xff] }
 0x1ca   : > { %9370 = vst [vmem:[#allocation24_spill] sm:$0xff] %v8116_v42  ;;  %9371 = vst [vmem:[#allocation25_spill] sm:$0xff] %v8119_v9  ;;  %v988_v36 = vrot.slane %v972_v29, 4  ;;  %v984_v26 = vrot.slane %v964_v40, 4  ;;  %v8138_v61 = vld [vmem:[#allocation2 + $0x2c] sm:$0xff] }
 0x1cb   : > { %764 = vst [vmem:[#allocation3 + $0x48] sm:$0xff] %v8116_v42  ;;  %765 = vst [vmem:[#allocation3 + $0x50] sm:$0xff] %v8119_v9  ;;  %1807 = vrot.lane.b32.xlu1 %v1760_v45, %s6856_s11  ;;  %1799 = vrot.lane.b32.xlu0 %v1756_v11, %s6856_s11  ;;  %v1591_v45 = vld [vmem:[#allocation2 + $0x74] sm:$0xff]  ;;  %v1748_v9 = vmul.bf16 %v7914_v33, %v1607_v39 }
 0x1cc   : > { %1593 = vst [vmem:[#allocation3 + $0x188] sm:$0xff] %v8128_v46  ;;  %1595 = vst [vmem:[#allocation3 + $0x198] sm:$0xff] %v8130_v17  ;;  %v1012_v43 = vsel %vm629_vm4, %v9372_v24, %v988_v36  ;;  %v1006_v57 = vsel %vm629_vm4, %v9373_v48, %v984_v26  ;;  %v2426_v26 = vld [vmem:[#allocation2 + $0x7c] sm:$0xf] }
 0x1cd   : > { %1596 = vst [vmem:[#allocation3 + $0x1a0] sm:$0xff] %v8138_v61  ;;  %v1013_v11 = vsel %vm990_vm6, %v7972_v19, %v1012_v43  ;;  %v1007_v29 = vsel %vm990_vm6, %v7941_v0, %v1006_v57  ;;  %v673_v42 = vpop.permute.xlu1 %672  ;;  %v671_v40 = vpop.permute.xlu0 %670  ;;  %1603 = vst [vmem:[#allocation3 + $0x1d8] sm:$0xff] %v1591_v45  ;;  %v2422_v24 = vld [vmem:[#allocation2 + $0x5c] sm:$0xf]  ;;  %v2567_v44 = vmul.bf16 %v7359_v20, %v2426_v26 }
 0x1ce   : > { %1037 = vst [vmem:[#allocation3 + $0xb8] sm:$0xff] %v1013_v11  ;;  %1034 = vst [vmem:[#allocation3 + $0xa0] sm:$0xff] %v1007_v29  ;;  %v703_v36 = vrot.slane %v673_v42, 4  ;;  %v702_v48 = vrot.slane %v671_v40, 4  ;;  %v2418_v0 = vld [vmem:[#allocation2 + $0x3c] sm:$0xf]  ;;  %v2563_v39 = vmul.bf16 %v7359_v20, %v2422_v24 }
 0x1cf   : > { %1791 = vrot.lane.b32.xlu1 %v1752_v62, %s6856_s11  ;;  %1783 = vrot.lane.b32.xlu0 %v1748_v9, %s6856_s11  ;;  %v2414_v9 = vld [vmem:[#allocation2 + $0x1c] sm:$0xf]  ;;  %s6866_s11 = smov [#allocation10]  }
 0x1d0   : > { %v718_v57 = vsel %vm629_vm4, %v702_v48, %v703_v36  ;;  %v6519_v45 = vld [vmem:[#allocation8 + $0x1c] ss:$12 sps:$4 sm:$0xff]   ;;  %s6781_s13 = sshll.u32 %s6866_s11, 4  ;;  %s6782_s13 = int_to_ptr.vmem [resolvable:$false] %s6781_s13 }
 0x1d1   : > { %v8166_v19 = vsel %vm719_vm1, %v671_v40, %v718_v57  ;;  %v679_v35 = vpop.permute.xlu1 %678  ;;  %v8168_v33 = vpop.permute.xlu0 %674  ;;  %v2559_v57 = vmul.bf16 %v7359_v20, %v2418_v0  ;;  %3280 = vmatprep.mubr.bf16.mxu0 %v6519_v45  ;;  %3366 = vmatprep.mubr.bf16.mxu1 %v6519_v45  ;;  %s6783_s29 = scalar_lea.vmem %s6782_s13, 2048 }
 0x1d2   : > { %v6447_v43 = vld [vmem:[#allocation3 + $0x38] ss:$24 sps:$4 sm:$0xff]   ;;  %v6449_v29 = vld [vmem:[#allocation3 + $0x34] ss:$24 sps:$4 sm:$0xff]   ;;  %755 = vst [vmem:[#allocation3] sm:$0xff] %v8166_v19  ;;  %v704_v62 = vrot.slane %v8168_v33, 4 }
 0x1d3   : > { %2614 = vrot.lane.b32.xlu1 %v2567_v44, %s6859_s23  ;;  %2606 = vrot.lane.b32.xlu0 %v2563_v39, %s6859_s23  ;;  %v706_v11 = vrot.slane %v679_v35, 4  ;;  %v2555_v44 = vmul.bf16 %v7359_v20, %v2414_v9  ;;  %v1582_v20 = vld [vmem:[#allocation2 + $0x14] sm:$0xff] }
 0x1d4   : > { %v721_v40 = vsel %vm629_vm4, %v703_v36, %v704_v62  ;;  %3260 = vmatprep.subr.bf16.mxu0 %v6447_v43  ;;  %1594 = vst [vmem:[#allocation3 + $0x190] sm:$0xff] %v1582_v20 }
 0x1d5   : > { %v8180_v48 = vsel %vm719_vm1, %v673_v42, %v721_v40  ;;  %v8182_v26 = vpop.permute.xlu1 %682  ;;  %3261 = vmatpush1.bf16.msra.mxu0 %v6449_v29  ;;  %v681_v24 = vpop.permute.xlu0 %680  ;;  %v6452_v43 = vld [vmem:[#allocation3 + $0xa0] ss:$24 sps:$4 sm:$0xff]  }
 0x1d6   : > { %756 = vst [vmem:[#allocation3 + $0x8] sm:$0xff] %v8180_v48  ;;  %v708_v39 = vrot.slane %v8182_v26, 4  ;;  %v707_v36 = vrot.slane %v681_v24, 4  ;;  %3342 = vmatprep.subr.bf16.mxu1 %v6452_v43  ;;  %v1585_v29 = vld [vmem:[#allocation2 + $0x34] sm:$0xff] }
 0x1d7   : > { %2598 = vrot.lane.b32.xlu1 %v2559_v57, %s6859_s23  ;;  %2590 = vrot.lane.b32.xlu0 %v2555_v44, %s6859_s23  ;;  %1597 = vst [vmem:[#allocation3 + $0x1a8] sm:$0xff] %v1585_v29  ;;  %v9377_v29 = vrot.slane %v8014_v37, 4 }
 0x1d8   : > { %v725_v42 = vsel %vm629_vm4, %v706_v11, %v707_v36  ;;  %v727_v0 = vsel %vm629_vm4, %v707_v36, %v708_v39  ;;  %3343 = vmatpush1.bf16.msra.mxu1 %v6450_v50  ;;  %v9374_v50 = vcombine.low %v7617_v47, %v7642_v14 }
 0x1d9   : > { %v8195_v9 = vsel %vm719_vm1, %v679_v35, %v725_v42  ;;  %v8198_v40 = vsel %vm719_vm1, %v681_v24, %v727_v0  ;;  %v956_v45 = vpop.permute.xlu1 %955  ;;  %v948_v57 = vpop.permute.xlu0 %947  ;;  %v9375_v24 = vcombine.high %v7614_v54, %v7639_v52  ;;  %v9376_v0 = vrot.slane %v8028_v5, 4 }
 0x1da   : > { %758 = vst [vmem:[#allocation3 + $0x18] sm:$0xff] %v8195_v9  ;;  %759 = vst [vmem:[#allocation3 + $0x20] sm:$0xff] %v8198_v40  ;;  %v980_v11 = vrot.slane %v956_v45, 4  ;;  %v976_v44 = vrot.slane %v948_v57, 4  ;;  %v6091_v36 = vcombine.high %v8166_v19, %v8195_v9 }
 0x1db   : > { %3887 = vrot.lane.b32.xlu1 %v9374_v50, %s6863_s21  ;;  %3885 = vrot.lane.b32.xlu0 %v9375_v24, %s6863_s21 }
 0x1dc   : > { %v1000_v20 = vsel %vm629_vm4, %v9376_v0, %v980_v11  ;;  %v994_v45 = vsel %vm629_vm4, %v9377_v29, %v976_v44  ;;  %v9378_v11 = vcombine.low %v7677_v53, %v7711_v23  ;;  %v9379_v44 = vcombine.high %v7674_v28, %v7708_v16 }
 0x1dd   : > { %v1001_v57 = vsel %vm990_vm6, %v8028_v5, %v1000_v20  ;;  %v995_v50 = vsel %vm990_vm6, %v8014_v37, %v994_v45  ;;  %v701_v24 = vpop.permute.xlu1 %700  ;;  %v693_v35 = vpop.permute.xlu0 %692  ;;  %v9380_v5 = vrot.slane %v8094_v1, 4  ;;  %v9381_v0 = vrot.slane %v8080_v49, 4 }
 0x1de   : > { %1031 = vst [vmem:[#allocation3 + $0x88] sm:$0xff] %v1001_v57  ;;  %1028 = vst [vmem:[#allocation3 + $0x70] sm:$0xff] %v995_v50  ;;  %v717_v43 = vrot.slane %v701_v24, 4  ;;  %v713_v42 = vrot.slane %v693_v35, 4 }
 0x1df   : > { %3987 = vrot.lane.b32.xlu1 %v9378_v11, %s6863_s21  ;;  %3985 = vrot.lane.b32.xlu0 %v9379_v44, %s6863_s21 }
 0x1e0   : > { %v741_v37 = vsel %vm629_vm4, %v9380_v5, %v717_v43  ;;  %v735_v20 = vsel %vm629_vm4, %v9381_v0, %v713_v42  ;;  %v9382_v43 = vcombine.low %v7674_v28, %v7708_v16  ;;  %v6456_v0 = vld [vmem:[#allocation3 + $0x6c] ss:$24 sps:$4 sm:$0xff]  }
 0x1e1   : > { %v742_v35 = vsel %vm719_vm1, %v8094_v1, %v741_v37  ;;  %v736_v29 = vsel %vm719_vm1, %v8080_v49, %v735_v20  ;;  %v2334_v45 = vpop.permute.xlu1 %2333  ;;  %v2332_v57 = vpop.permute.xlu0 %2331  ;;  %v6453_v50 = vld [vmem:[#allocation3 + $0x8] ss:$24 sps:$4 sm:$0xff]   ;;  %v6455_v24 = vld [vmem:[#allocation3 + $0x4] ss:$24 sps:$4 sm:$0xff]   ;;  %v9383_v1 = vcombine.low %v7614_v54, %v7639_v52  ;;  %v9384_v54 = vcombine.low %v7741_v32, %v7764_v13 }
 0x1e2   : > { %766 = vst [vmem:[#allocation3 + $0x58] sm:$0xff] %v742_v35  ;;  %763 = vst [vmem:[#allocation3 + $0x40] sm:$0xff] %v736_v29  ;;  %v2356_v11 = vrot.slane %v2334_v45, 4  ;;  %v2355_v44 = vrot.slane %v2332_v57, 4  ;;  %3262 = vmatprep.subr.bf16.mxu0 %v6453_v50  ;;  %v9385_v52 = vcombine.high %v7738_v7, %v7761_v15 }
 0x1e3   : > { %3983 = vrot.lane.b32.xlu1 %v9382_v43, %s6863_s21  ;;  %3883 = vrot.lane.b32.xlu0 %v9383_v1, %s6863_s21 }
 0x1e4   : > { %v2375_v49 = vsel %vm629_vm4, %v2355_v44, %v2356_v11  ;;  %3263 = vmatpush1.bf16.msra.mxu0 %v6455_v24  ;;  %v6459_v24 = vld [vmem:[#allocation3 + $0x3c] ss:$24 sps:$4 sm:$0xff]  }
 0x1e5   : > { %v8256_v42 = vsel %vm899_vm3, %v2332_v57, %v2375_v49  ;;  %v2340_v5 = vpop.permute.xlu1 %2339  ;;  %v8258_v37 = vpop.permute.xlu0 %2335  ;;  %v6458_v16 = vld [vmem:[#allocation3 + $0x70] ss:$24 sps:$4 sm:$0xff]  }
 0x1e6   : > { %2405 = vst [vmem:[#allocation3 + $0x2d0] sm:$0xff] %v8256_v42  ;;  %v2357_v28 = vrot.slane %v8258_v37, 4  ;;  %3344 = vmatprep.subr.bf16.mxu1 %v6458_v16  ;;  %v2359_v35 = vrot.slane %v2340_v5, 4 }
 0x1e7   : > { %3877 = vrot.lane.b32.xlu1 %v9384_v54, %s6863_s21  ;;  %3875 = vrot.lane.b32.xlu0 %v9385_v52, %s6863_s21 }
 0x1e8   : > { %v2377_v20 = vsel %vm629_vm4, %v2356_v11, %v2357_v28  ;;  %3345 = vmatpush1.bf16.msra.mxu1 %v6456_v0  ;;  %v9386_v11 = vcombine.low %v7793_v38, %v7818_v30  ;;  %v6473_v0 = vld [vmem:[#allocation3 + $0x100] ss:$24 sps:$4 sm:$0xff]  }
 0x1e9   : > { %v8274_v29 = vsel %vm899_vm3, %v2334_v45, %v2377_v20  ;;  %v8276_v57 = vpop.permute.xlu1 %2343  ;;  %v2342_v50 = vpop.permute.xlu0 %2341  ;;  %v6461_v49 = vld [vmem:[#allocation3 + $0x40] ss:$24 sps:$4 sm:$0xff]   ;;  %v9387_v45 = vcombine.high %v7790_v63, %v7815_v12 }
 0x1ea   : > { %2406 = vst [vmem:[#allocation3 + $0x2d8] sm:$0xff] %v8274_v29  ;;  %v2361_v43 = vrot.slane %v8276_v57, 4  ;;  %v2360_v1 = vrot.slane %v2342_v50, 4  ;;  %3346 = vmatprep.subr.bf16.mxu1 %v6461_v49 }
 0x1eb   : > { %3977 = vrot.lane.b32.xlu1 %v9386_v11, %s6863_s21  ;;  %3975 = vrot.lane.b32.xlu0 %v9387_v45, %s6863_s21 }
 0x1ec   : > { %v2381_v16 = vsel %vm629_vm4, %v2359_v35, %v2360_v1  ;;  %v2383_v54 = vsel %vm629_vm4, %v2360_v1, %v2361_v43  ;;  %3347 = vmatpush1.bf16.msra.mxu1 %v6459_v24 }
 0x1ed   : > { %v8297_v52 = vsel %vm899_vm3, %v2340_v5, %v2381_v16  ;;  %v8300_v20 = vsel %vm899_vm3, %v2342_v50, %v2383_v54  ;;  %v685_v11 = vpop.permute.xlu1 %684  ;;  %v677_v44 = vpop.permute.xlu0 %676  ;;  %v9388_v5 = vcombine.low %v7790_v63, %v7815_v12  ;;  %v9389_v50 = vcombine.low %v7738_v7, %v7761_v15  ;;  %v6466_v54 = vld [vmem:[#allocation3 + $0xc] ss:$24 sps:$4 sm:$0xff]  }
 0x1ee   : > { %2408 = vst [vmem:[#allocation3 + $0x2e8] sm:$0xff] %v8297_v52  ;;  %2409 = vst [vmem:[#allocation3 + $0x2f0] sm:$0xff] %v8300_v20  ;;  %v709_v45 = vrot.slane %v685_v11, 4  ;;  %v705_v35 = vrot.slane %v677_v44, 4 }
 0x1ef   : > { %3973 = vrot.lane.b32.xlu1 %v9388_v5, %s6863_s21  ;;  %3873 = vrot.lane.b32.xlu0 %v9389_v50, %s6863_s21 }
 0x1f0   : > { %v729_v49 = vsel %vm629_vm4, %v708_v39, %v709_v45  ;;  %v723_v12 = vsel %vm629_vm4, %v704_v62, %v705_v35  ;;  %v9390_v39 = vcombine.low %v7845_v6, %v7871_v56  ;;  %v9391_v62 = vcombine.high %v7842_v4, %v7868_v59  ;;  %v6462_v45 = vld [vmem:[#allocation3 + $0x160] ss:$24 sps:$4 sm:$0xff]  }
 0x1f1   : > { %v730_v63 = vsel %vm719_vm1, %v8182_v26, %v729_v49  ;;  %v724_v7 = vsel %vm719_vm1, %v8168_v33, %v723_v12  ;;  %v2318_v15 = vpop.permute.xlu1 %2317  ;;  %v2316_v16 = vpop.permute.xlu0 %2315 }
 0x1f2   : > { %760 = vst [vmem:[#allocation3 + $0x28] sm:$0xff] %v730_v63  ;;  %757 = vst [vmem:[#allocation3 + $0x10] sm:$0xff] %v724_v7  ;;  %v2348_v11 = vrot.slane %v2318_v15, 4  ;;  %v2347_v5 = vrot.slane %v2316_v16, 4 }
 0x1f3   : > { %3867 = vrot.lane.b32.xlu1 %v9390_v39, %s6863_s21  ;;  %3865 = vrot.lane.b32.xlu0 %v9391_v62, %s6863_s21 }
 0x1f4   : > { %v2363_v26 = vsel %vm629_vm4, %v2347_v5, %v2348_v11  ;;  %v9392_v5 = vcombine.high %v7617_v47, %v7642_v14 }
 0x1f5   : > { %v8344_v35 = vsel %vm899_vm3, %v2316_v16, %v2363_v26  ;;  %v2324_v50 = vpop.permute.xlu1 %2323  ;;  %v8346_v49 = vpop.permute.xlu0 %2319  ;;  %v6463_v12 = vld [vmem:[#allocation3 + $0x2d8] ss:$24 sps:$4 sm:$0xff]   ;;  %v6465_v63 = vld [vmem:[#allocation3 + $0x2d4] ss:$24 sps:$4 sm:$0xff]  }
 0x1f6   : > { %2399 = vst [vmem:[#allocation3 + $0x2a0] sm:$0xff] %v8344_v35  ;;  %v2349_v7 = vrot.slane %v8346_v49, 4  ;;  %3264 = vmatprep.subr.bf16.mxu0 %v6463_v12  ;;  %v2351_v62 = vrot.slane %v2324_v50, 4 }
 0x1f7   : > { %3891 = vrot.lane.b32.xlu1 %v6462_v45, %s6863_s21  ;;  %3889 = vrot.lane.b32.xlu0 %v9392_v5, %s6863_s21 }
 0x1f8   : > { %v2365_v16 = vsel %vm629_vm4, %v2348_v11, %v2349_v7  ;;  %3265 = vmatpush2.bf16.msra.mxu0 %v6465_v63  ;;  %v9393_v11 = vcombine.high %v7900_v22, %v7936_v41 }
 0x1f9   : > { %v8361_v26 = vsel %vm899_vm3, %v2318_v15, %v2365_v16  ;;  %v8363_v33 = vpop.permute.xlu1 %2327  ;;  %v2326_v39 = vpop.permute.xlu0 %2325  ;;  %v6468_v5 = vld [vmem:[#allocation3 + $0x10] ss:$24 sps:$4 sm:$0xff]   ;;  %v9394_v15 = vcombine.low %v7842_v4, %v7868_v59 }
 0x1fa   : > { %2400 = vst [vmem:[#allocation3 + $0x2a8] sm:$0xff] %v8361_v26  ;;  %v2353_v47 = vrot.slane %v8363_v33, 4  ;;  %v2352_v14 = vrot.slane %v2326_v39, 4  ;;  %3348 = vmatprep.subr.bf16.mxu1 %v6468_v5 }
 0x1fb   : > { %3855 = vrot.lane.b32.xlu1 %v9393_v11, %s6863_s21  ;;  %3863 = vrot.lane.b32.xlu0 %v9394_v15, %s6863_s21 }
 0x1fc   : > { %v2369_v12 = vsel %vm629_vm4, %v2351_v62, %v2352_v14  ;;  %v2371_v63 = vsel %vm629_vm4, %v2352_v14, %v2353_v47  ;;  %3349 = vmatpush1.bf16.msra.mxu1 %v6466_v54  ;;  %v9395_v62 = vcombine.high %v7741_v32, %v7764_v13  ;;  %v6469_v32 = vld [vmem:[#allocation3 + $0x130] ss:$24 sps:$4 sm:$0xff]  }
 0x1fd   : > { %v8382_v16 = vsel %vm899_vm3, %v2324_v50, %v2369_v12  ;;  %v8385_v45 = vsel %vm899_vm3, %v2326_v39, %v2371_v63  ;;  %v2065_v44 = vpop.permute.xlu1 %2064  ;;  %v2063_v11 = vpop.permute.xlu0 %2062  ;;  %v9396_v50 = vcombine.low %v7903_v18, %v7939_v3  ;;  %v9397_v63 = vcombine.low %v7900_v22, %v7936_v41 }
 0x1fe   : > { %2402 = vst [vmem:[#allocation3 + $0x2b8] sm:$0xff] %v8382_v16  ;;  %2403 = vst [vmem:[#allocation3 + $0x2c0] sm:$0xff] %v8385_v45  ;;  %v2087_v4 = vrot.slane %v2065_v44, 4  ;;  %v2086_v59 = vrot.slane %v2063_v11, 4 }
 0x1ff   : > { %3879 = vrot.lane.b32.xlu1 %v9395_v62, %s6863_s21  ;;  %3857 = vrot.lane.b32.xlu0 %v9396_v50, %s6863_s21 }
 0x200   : > { %v2106_v14 = vsel %vm629_vm4, %v2086_v59, %v2087_v4 }
 0x201   : > { %v8403_v5 = vsel %vm1170_vm2, %v2063_v11, %v2106_v14  ;;  %v2071_v15 = vpop.permute.xlu1 %2070  ;;  %v8405_v12 = vpop.permute.xlu0 %2066 }
 0x202   : > { %2136 = vst [vmem:[#allocation3 + $0x270] sm:$0xff] %v8403_v5  ;;  %v2088_v13 = vrot.slane %v8405_v12, 4  ;;  %v2090_v24 = vrot.slane %v2071_v15, 4 }
 0x203   : > { %3853 = vrot.lane.b32.xlu1 %v9397_v63, %s6863_s21  ;;  %3881 = vrot.lane.b32.xlu0 %v6469_v32, %s6863_s21 }
 0x204   : > { %v2108_v11 = vsel %vm629_vm4, %v2087_v4, %v2088_v13  ;;  %v9398_v4 = vcombine.low %v7970_v51, %v7994_v55 }
 0x205   : > { %v8418_v59 = vsel %vm1170_vm2, %v2065_v44, %v2108_v11  ;;  %v8420_v62 = vpop.permute.xlu1 %2074  ;;  %v2073_v50 = vpop.permute.xlu0 %2072  ;;  %v6470_v14 = vld [vmem:[#allocation3 + $0x2a8] ss:$24 sps:$4 sm:$0xff]   ;;  %v6472_v39 = vld [vmem:[#allocation3 + $0x2a4] ss:$24 sps:$4 sm:$0xff]   ;;  %v9399_v44 = vcombine.high %v7967_v2, %v7991_v25 }
 0x206   : > { %2137 = vst [vmem:[#allocation3 + $0x278] sm:$0xff] %v8418_v59  ;;  %v2092_v22 = vrot.slane %v8420_v62, 4  ;;  %v2091_v41 = vrot.slane %v2073_v50, 4  ;;  %3266 = vmatprep.subr.bf16.mxu0 %v6470_v14 }
 0x207   : > { %3847 = vrot.lane.b32.xlu1 %v9398_v4, %s6863_s21  ;;  %3845 = vrot.lane.b32.xlu0 %v9399_v44, %s6863_s21 }
 0x208   : > { %v2112_v32 = vsel %vm629_vm4, %v2090_v24, %v2091_v41  ;;  %v2114_v63 = vsel %vm629_vm4, %v2091_v41, %v2092_v22  ;;  %3267 = vmatpush2.bf16.msra.mxu0 %v6472_v39 }
 0x209   : > { %v8439_v11 = vsel %vm1170_vm2, %v2071_v15, %v2112_v32  ;;  %v8442_v54 = vsel %vm1170_vm2, %v2073_v50, %v2114_v63  ;;  %v2346_v1 = vpop.permute.xlu1 %2345  ;;  %v2338_v4 = vpop.permute.xlu0 %2337  ;;  %v9400_v15 = vcombine.high %v7845_v6, %v7871_v56 }
 0x20a   : > { %2139 = vst [vmem:[#allocation3 + $0x288] sm:$0xff] %v8439_v11  ;;  %2140 = vst [vmem:[#allocation3 + $0x290] sm:$0xff] %v8442_v54  ;;  %v2362_v24 = vrot.slane %v2346_v1, 4  ;;  %v2358_v44 = vrot.slane %v2338_v4, 4 }
 0x20b   : > { %3871 = vrot.lane.b32.xlu1 %v6473_v0, %s6863_s21  ;;  %3869 = vrot.lane.b32.xlu0 %v9400_v15, %s6863_s21 }
 0x20c   : > { %v2385_v39 = vsel %vm629_vm4, %v2361_v43, %v2362_v24  ;;  %v2379_v14 = vsel %vm629_vm4, %v2357_v28, %v2358_v44  ;;  %v9401_v43 = vcombine.high %v8012_v34, %v8041_v60  ;;  %v9402_v28 = vcombine.low %v7967_v2, %v7991_v25  ;;  %v9404_v2 = vld [vmem:[#allocation21_spill] sm:$0xff] }
 0x20d   : > { %v2386_v1 = vsel %vm899_vm3, %v8276_v57, %v2385_v39  ;;  %v2380_v0 = vsel %vm899_vm3, %v8258_v37, %v2379_v14  ;;  %v2049_v41 = vpop.permute.xlu1 %2048  ;;  %v2047_v6 = vpop.permute.xlu0 %2046  ;;  %v9403_v39 = vcombine.high %v7903_v18, %v7939_v3  ;;  %v9405_v25 = vcombine.low %v8026_v10, %v9404_v2  ;;  %v6478_v3 = vld [vmem:[#allocation3 + $0x2dc] ss:$24 sps:$4 sm:$0xff]  }
 0x20e   : > { %2410 = vst [vmem:[#allocation3 + $0x2f8] sm:$0xff] %v2386_v1  ;;  %2407 = vst [vmem:[#allocation3 + $0x2e0] sm:$0xff] %v2380_v0  ;;  %v2079_v56 = vrot.slane %v2049_v41, 4  ;;  %v2078_v32 = vrot.slane %v2047_v6, 4  ;;  %v6477_v1 = vld [vmem:[#allocation3 + $0xd0] ss:$24 sps:$4 sm:$0xff]  }
 0x20f   : > { %3835 = vrot.lane.b32.xlu1 %v9401_v43, %s6863_s21  ;;  %3843 = vrot.lane.b32.xlu0 %v9402_v28, %s6863_s21 }
 0x210   : > { %v2094_v57 = vsel %vm629_vm4, %v2078_v32, %v2079_v56 }
 0x211   : > { %v8473_v37 = vsel %vm1170_vm2, %v2047_v6, %v2094_v57  ;;  %v2055_v63 = vpop.permute.xlu1 %2054  ;;  %v8475_v4 = vpop.permute.xlu0 %2050  ;;  %v6474_v24 = vld [vmem:[#allocation3 + $0x278] ss:$24 sps:$4 sm:$0xff]   ;;  %v6476_v44 = vld [vmem:[#allocation3 + $0x274] ss:$24 sps:$4 sm:$0xff]  }
 0x212   : > { %2130 = vst [vmem:[#allocation3 + $0x240] sm:$0xff] %v8473_v37  ;;  %v2080_v15 = vrot.slane %v8475_v4, 4  ;;  %3268 = vmatprep.subr.bf16.mxu0 %v6474_v24  ;;  %v2082_v0 = vrot.slane %v2055_v63, 4 }
 0x213   : > { %3859 = vrot.lane.b32.xlu1 %v9403_v39, %s6863_s21  ;;  %3837 = vrot.lane.b32.xlu0 %v9405_v25, %s6863_s21 }
 0x214   : > { %v2096_v14 = vsel %vm629_vm4, %v2079_v56, %v2080_v15  ;;  %3269 = vmatpush2.bf16.msra.mxu0 %v6476_v44  ;;  %v9406_v56 = vcombine.low %v8012_v34, %v8041_v60 }
 0x215   : > { %v8491_v6 = vsel %vm1170_vm2, %v2049_v41, %v2096_v14  ;;  %v8493_v32 = vpop.permute.xlu1 %2058  ;;  %v2057_v18 = vpop.permute.xlu0 %2056  ;;  %v6480_v57 = vld [vmem:[#allocation3 + $0x2e0] ss:$24 sps:$4 sm:$0xff]  }
 0x216   : > { %2131 = vst [vmem:[#allocation3 + $0x248] sm:$0xff] %v8491_v6  ;;  %v2084_v43 = vrot.slane %v8493_v32, 4  ;;  %v2083_v28 = vrot.slane %v2057_v18, 4  ;;  %3350 = vmatprep.subr.bf16.mxu1 %v6480_v57  ;;  %v9411_v57 = vld [vmem:[#allocation24_spill] sm:$0xff] }
 0x217   : > { %3833 = vrot.lane.b32.xlu1 %v9406_v56, %s6863_s21  ;;  %3861 = vrot.lane.b32.xlu0 %v6477_v1, %s6863_s21  ;;  %v9407_v1 = vld [vmem:[#allocation23_spill] sm:$0xff] }
 0x218   : > { %v2100_v41 = vsel %vm629_vm4, %v2082_v0, %v2083_v28  ;;  %v2102_v24 = vsel %vm629_vm4, %v2083_v28, %v2084_v43  ;;  %3351 = vmatpush2.bf16.msra.mxu1 %v6478_v3  ;;  %v9408_v0 = vld [vmem:[#allocation25_spill] sm:$0xff] }
 0x219   : > { %v8507_v44 = vsel %vm1170_vm2, %v2055_v63, %v2100_v41  ;;  %v8510_v39 = vsel %vm1170_vm2, %v2057_v18, %v2102_v24  ;;  %v2330_v25 = vpop.permute.xlu1 %2329  ;;  %v2322_v14 = vpop.permute.xlu0 %2321  ;;  %v9409_v28 = vcombine.low %v9407_v1, %v9408_v0  ;;  %v9410_v63 = vld [vmem:[#allocation22_spill] sm:$0xff] }
 0x21a   : > { %2133 = vst [vmem:[#allocation3 + $0x258] sm:$0xff] %v8507_v44  ;;  %2134 = vst [vmem:[#allocation3 + $0x260] sm:$0xff] %v8510_v39  ;;  %v2354_v34 = vrot.slane %v2330_v25, 4  ;;  %v2350_v60 = vrot.slane %v2322_v14, 4  ;;  %v9412_v56 = vcombine.high %v9410_v63, %v9411_v57 }
 0x21b   : > { %3827 = vrot.lane.b32.xlu1 %v9409_v28, %s6863_s21 }
 0x21c   : > { %3825 = vrot.lane.b32.xlu0 %v9412_v56, %s6863_s21  ;;  %v2373_v3 = vsel %vm629_vm4, %v2353_v47, %v2354_v34  ;;  %v2367_v41 = vsel %vm629_vm4, %v2349_v7, %v2350_v60  ;;  %v6481_v56 = vld [vmem:[#allocation3 + $0xa0] ss:$24 sps:$4 sm:$0xff]   ;;  %v9413_v47 = vcombine.high %v7970_v51, %v7994_v55 }
 0x21d   : > { %v2374_v24 = vsel %vm899_vm3, %v8363_v33, %v2373_v3  ;;  %v2368_v25 = vsel %vm899_vm3, %v8346_v49, %v2367_v41  ;;  %v1796_v14 = vpop.permute.xlu1 %1795  ;;  %v1794_v28 = vpop.permute.xlu0 %1793 }
 0x21e   : > { %2404 = vst [vmem:[#allocation3 + $0x2c8] sm:$0xff] %v2374_v24  ;;  %2401 = vst [vmem:[#allocation3 + $0x2b0] sm:$0xff] %v2368_v25  ;;  %v1818_v18 = vrot.slane %v1796_v14, 4  ;;  %v1817_v50 = vrot.slane %v1794_v28, 4  ;;  %v9414_v24 = vcombine.low %v9410_v63, %v9411_v57  ;;  %v6485_v63 = vld [vmem:[#allocation3 + $0x2ac] ss:$24 sps:$4 sm:$0xff]  }
 0x21f   : > { %3851 = vrot.lane.b32.xlu1 %v6481_v56, %s6863_s21 }
 0x220   : > { %3849 = vrot.lane.b32.xlu0 %v9413_v47, %s6863_s21  ;;  %v1837_v7 = vsel %vm629_vm4, %v1817_v50, %v1818_v18 }
 0x221   : > { %v8541_v33 = vsel %vm1441_vm0, %v1794_v28, %v1837_v7  ;;  %v1802_v49 = vpop.permute.xlu1 %1801  ;;  %v8543_v34 = vpop.permute.xlu0 %1797  ;;  %v6482_v60 = vld [vmem:[#allocation3 + $0x248] ss:$24 sps:$4 sm:$0xff]   ;;  %v6484_v3 = vld [vmem:[#allocation3 + $0x244] ss:$24 sps:$4 sm:$0xff]  }
 0x222   : > { %1867 = vst [vmem:[#allocation3 + $0x210] sm:$0xff] %v8541_v33  ;;  %v1819_v41 = vrot.slane %v8543_v34, 4  ;;  %3270 = vmatprep.subr.bf16.mxu0 %v6482_v60  ;;  %v1821_v55 = vrot.slane %v1802_v49, 4 }
 0x223   : > { %3815 = vrot.lane.b32.xlu1 %v6091_v36, %s6863_s21  ;;  %3271 = vmatpush2.bf16.msra.mxu0 %v6484_v3 }
 0x224   : > { %3823 = vrot.lane.b32.xlu0 %v9414_v24, %s6863_s21  ;;  %v1839_v51 = vsel %vm629_vm4, %v1818_v18, %v1819_v41  ;;  %v9415_v18 = vcombine.low %v8180_v48, %v8198_v40 }
 0x225   : > { %v8559_v50 = vsel %vm1441_vm0, %v1796_v14, %v1839_v51  ;;  %v8561_v25 = vpop.permute.xlu1 %1805  ;;  %v1804_v28 = vpop.permute.xlu0 %1803  ;;  %v6487_v36 = vld [vmem:[#allocation3 + $0x2b0] ss:$24 sps:$4 sm:$0xff]   ;;  %v9416_v14 = vcombine.high %v8026_v10, %v9404_v2 }
 0x226   : > { %1868 = vst [vmem:[#allocation3 + $0x218] sm:$0xff] %v8559_v50  ;;  %v1823_v57 = vrot.slane %v8561_v25, 4  ;;  %v1822_v56 = vrot.slane %v1804_v28, 4  ;;  %3352 = vmatprep.subr.bf16.mxu1 %v6487_v36 }
 0x227   : > { %3839 = vrot.lane.b32.xlu1 %v9416_v14, %s6863_s21  ;;  %3353 = vmatpush2.bf16.msra.mxu1 %v6485_v63  ;;  %v6489_v14 = vld [vmem:[#allocation3 + $0x40] ss:$24 sps:$4 sm:$0xff]  }
 0x228   : > { %3817 = vrot.lane.b32.xlu0 %v9415_v18, %s6863_s21  ;;  %v1843_v47 = vsel %vm629_vm4, %v1821_v55, %v1822_v56  ;;  %v1845_v7 = vsel %vm629_vm4, %v1822_v56, %v1823_v57  ;;  %v6488_v18 = vld [vmem:[#allocation3 + $0x70] ss:$24 sps:$4 sm:$0xff]   ;;  %v9417_v55 = vcombine.low %v8166_v19, %v8195_v9 }
 0x229   : > { %v8578_v60 = vsel %vm1441_vm0, %v1802_v49, %v1843_v47  ;;  %v8581_v3 = vsel %vm1441_vm0, %v1804_v28, %v1845_v7  ;;  %v2077_v24 = vpop.permute.xlu1 %2076  ;;  %v2069_v51 = vpop.permute.xlu0 %2068 }
 0x22a   : > { %1870 = vst [vmem:[#allocation3 + $0x228] sm:$0xff] %v8578_v60  ;;  %1871 = vst [vmem:[#allocation3 + $0x230] sm:$0xff] %v8581_v3  ;;  %v2093_v10 = vrot.slane %v2077_v24, 4  ;;  %v2089_v2 = vrot.slane %v2069_v51, 4  ;;  %v6148_v49 = vcombine.high %v8559_v50, %v8581_v3 }
 0x22b   : > { %3813 = vrot.lane.b32.xlu1 %v9417_v55, %s6863_s21 }
 0x22c   : > { %3841 = vrot.lane.b32.xlu0 %v6488_v18, %s6863_s21  ;;  %v2116_v28 = vsel %vm629_vm4, %v2092_v22, %v2093_v10  ;;  %v2110_v63 = vsel %vm629_vm4, %v2088_v13, %v2089_v2  ;;  %v9418_v22 = vcombine.high %v9407_v1, %v9408_v0  ;;  %v9419_v2 = vcombine.low %v8274_v29, %v8300_v20 }
 0x22d   : > { %v2117_v56 = vsel %vm1170_vm2, %v8420_v62, %v2116_v28  ;;  %v2111_v19 = vsel %vm1170_vm2, %v8405_v12, %v2110_v63  ;;  %v1780_v9 = vpop.permute.xlu1 %1779  ;;  %v1778_v36 = vpop.permute.xlu0 %1777  ;;  %v9420_v1 = vcombine.high %v8256_v42, %v8297_v52 }
 0x22e   : > { %2141 = vst [vmem:[#allocation3 + $0x298] sm:$0xff] %v2117_v56  ;;  %2138 = vst [vmem:[#allocation3 + $0x280] sm:$0xff] %v2111_v19  ;;  %v1810_v47 = vrot.slane %v1780_v9, 4  ;;  %v1809_v7 = vrot.slane %v1778_v36, 4  ;;  %v6493_v19 = vld [vmem:[#allocation3 + $0x27c] ss:$24 sps:$4 sm:$0xff]  }
 0x22f   : > { %3831 = vrot.lane.b32.xlu1 %v6489_v14, %s6863_s21 }
 0x230   : > { %3829 = vrot.lane.b32.xlu0 %v9418_v22, %s6863_s21  ;;  %v1825_v13 = vsel %vm629_vm4, %v1809_v7, %v1810_v47 }
 0x231   : > { %v8609_v62 = vsel %vm1441_vm0, %v1778_v36, %v1825_v13  ;;  %v1786_v12 = vpop.permute.xlu1 %1785  ;;  %v8611_v24 = vpop.permute.xlu0 %1781  ;;  %v6490_v51 = vld [vmem:[#allocation3 + $0x218] ss:$24 sps:$4 sm:$0xff]   ;;  %v6492_v18 = vld [vmem:[#allocation3 + $0x214] ss:$24 sps:$4 sm:$0xff]  }
 0x232   : > { %1861 = vst [vmem:[#allocation3 + $0x1e0] sm:$0xff] %v8609_v62  ;;  %v1811_v10 = vrot.slane %v8611_v24, 4  ;;  %3272 = vmatprep.subr.bf16.mxu0 %v6490_v51  ;;  %v1813_v55 = vrot.slane %v1786_v12, 4 }
 0x233   : > { %3967 = vrot.lane.b32.xlu1 %v9419_v2, %s6863_s21  ;;  %3273 = vmatpush2.bf16.msra.mxu0 %v6492_v18 }
 0x234   : > { %3965 = vrot.lane.b32.xlu0 %v9420_v1, %s6863_s21  ;;  %v1827_v0 = vsel %vm629_vm4, %v1810_v47, %v1811_v10  ;;  %v9421_v47 = vcombine.high %v8180_v48, %v8198_v40  ;;  %v6496_v40 = vld [vmem:[#allocation3 + $0x10] ss:$24 sps:$4 sm:$0xff]   ;;  %v6161_v1 = vcombine.high %v8344_v35, %v8382_v16 }
 0x235   : > { %v8627_v28 = vsel %vm1441_vm0, %v1780_v9, %v1827_v0  ;;  %v8629_v63 = vpop.permute.xlu1 %1789  ;;  %v1788_v56 = vpop.permute.xlu0 %1787  ;;  %v6495_v7 = vld [vmem:[#allocation3 + $0x280] ss:$24 sps:$4 sm:$0xff]   ;;  %v9422_v9 = vcombine.low %v8256_v42, %v8297_v52 }
 0x236   : > { %1862 = vst [vmem:[#allocation3 + $0x1e8] sm:$0xff] %v8627_v28  ;;  %v1815_v36 = vrot.slane %v8629_v63, 4  ;;  %v1814_v14 = vrot.slane %v1788_v56, 4  ;;  %3354 = vmatprep.subr.bf16.mxu1 %v6495_v7  ;;  %v6162_v7 = vcombine.low %v8361_v26, %v8385_v45 }
 0x237   : > { %3819 = vrot.lane.b32.xlu1 %v9421_v47, %s6863_s21  ;;  %3355 = vmatpush2.bf16.msra.mxu1 %v6493_v19  ;;  %v6160_v47 = vcombine.low %v8344_v35, %v8382_v16 }
 0x238   : > { %3963 = vrot.lane.b32.xlu0 %v9422_v9, %s6863_s21  ;;  %v1831_v22 = vsel %vm629_vm4, %v1813_v55, %v1814_v14  ;;  %v1833_v13 = vsel %vm629_vm4, %v1814_v14, %v1815_v36 }
 0x239   : > { %v8644_v51 = vsel %vm1441_vm0, %v1786_v12, %v1831_v22  ;;  %v8647_v18 = vsel %vm1441_vm0, %v1788_v56, %v1833_v13  ;;  %v2061_v2 = vpop.permute.xlu1 %2060  ;;  %v2053_v48 = vpop.permute.xlu0 %2052  ;;  %v6157_v13 = vcombine.low %v8418_v59, %v8442_v54 }
 0x23a   : > { %1864 = vst [vmem:[#allocation3 + $0x1f8] sm:$0xff] %v8644_v51  ;;  %1865 = vst [vmem:[#allocation3 + $0x200] sm:$0xff] %v8647_v18  ;;  %v2085_v42 = vrot.slane %v2061_v2, 4  ;;  %v2081_v52 = vrot.slane %v2053_v48, 4  ;;  %v6156_v2 = vcombine.high %v8403_v5, %v8439_v11 }
 0x23b   : > { %3955 = vrot.lane.b32.xlu1 %v6161_v1, %s6863_s21  ;;  %v6504_v1 = vld [vmem:[#allocation3 + $0x1b8] ss:$24 sps:$4 sm:$0xff]  }
 0x23c   : > { %3821 = vrot.lane.b32.xlu0 %v6496_v40, %s6863_s21  ;;  %v2104_v12 = vsel %vm629_vm4, %v2084_v43, %v2085_v42  ;;  %v2098_v0 = vsel %vm629_vm4, %v2080_v15, %v2081_v52  ;;  %v6500_v42 = vld [vmem:[#allocation3 + $0x2e0] ss:$24 sps:$4 sm:$0xff]   ;;  %v6509_v52 = vld [vmem:[#allocation3 + $0x1b4] ss:$24 sps:$4 sm:$0xff]  }
 0x23d   : > { %v2105_v55 = vsel %vm1170_vm2, %v8493_v32, %v2104_v12  ;;  %v2099_v56 = vsel %vm1170_vm2, %v8475_v4, %v2098_v0  ;;  %v1808_v19 = vpop.permute.xlu1 %1807  ;;  %v1800_v14 = vpop.permute.xlu0 %1799  ;;  %v6510_v12 = vld [vmem:[#allocation3 + $0x188] ss:$24 sps:$4 sm:$0xff]  }
 0x23e   : > { %2135 = vst [vmem:[#allocation3 + $0x268] sm:$0xff] %v2105_v55  ;;  %2132 = vst [vmem:[#allocation3 + $0x250] sm:$0xff] %v2099_v56  ;;  %v1824_v43 = vrot.slane %v1808_v19, 4  ;;  %v1820_v9 = vrot.slane %v1800_v14, 4  ;;  %v6501_v14 = vld [vmem:[#allocation3 + $0x24c] ss:$24 sps:$4 sm:$0xff]  }
 0x23f   : > { %3953 = vrot.lane.b32.xlu1 %v6160_v47, %s6863_s21 }
 0x240   : > { %3957 = vrot.lane.b32.xlu0 %v6162_v7, %s6863_s21  ;;  %v1847_v4 = vsel %vm629_vm4, %v1823_v57, %v1824_v43  ;;  %v1841_v15 = vsel %vm629_vm4, %v1819_v41, %v1820_v9  ;;  %v9426_v9 = vld [vmem:[#allocation17_spill] sm:$0xff] }
 0x241   : > { %v1848_v32 = vsel %vm1441_vm0, %v8561_v25, %v1847_v4  ;;  %v1842_v35 = vsel %vm1441_vm0, %v8543_v34, %v1841_v15  ;;  %v1792_v16 = vpop.permute.xlu1 %1791  ;;  %v1784_v22 = vpop.permute.xlu0 %1783  ;;  %v6497_v48 = vld [vmem:[#allocation3 + $0x1e8] ss:$24 sps:$4 sm:$0xff]   ;;  %v6499_v57 = vld [vmem:[#allocation3 + $0x1e4] ss:$24 sps:$4 sm:$0xff]   ;;  %v9427_v4 = vrot.slane %v9426_v9, 4 }
 0x242   : > { %1872 = vst [vmem:[#allocation3 + $0x238] sm:$0xff] %v1848_v32  ;;  %1869 = vst [vmem:[#allocation3 + $0x220] sm:$0xff] %v1842_v35  ;;  %v1816_v40 = vrot.slane %v1792_v16, 4  ;;  %v1812_v41 = vrot.slane %v1784_v22, 4  ;;  %3274 = vmatprep.subr.bf16.mxu0 %v6497_v48  ;;  %v6155_v32 = vcombine.low %v8403_v5, %v8439_v11  ;;  %v6515_v35 = vld [vmem:[#allocation3 + $0x184] ss:$24 sps:$4 sm:$0xff]  }
 0x243   : > { %3947 = vrot.lane.b32.xlu1 %v6157_v13, %s6863_s21  ;;  %3275 = vmatpush2.bf16.msra.mxu0 %v6499_v57  ;;  %v6151_v13 = vcombine.high %v8473_v37, %v8507_v44  ;;  %v8716_v11 = vld [vmem:[#allocation8 + $0x18] ss:$12 sps:$4 sm:$0xff]  }
 0x244   : > { %3945 = vrot.lane.b32.xlu0 %v6156_v2, %s6863_s21  ;;  %v1835_v34 = vsel %vm629_vm4, %v1815_v36, %v1816_v40  ;;  %v1829_v25 = vsel %vm629_vm4, %v1811_v10, %v1812_v41  ;;  %3276 = vmatprep.subr.bf16.mxu0 %v6504_v1  ;;  %v9423_v10 = vcombine.high %v8274_v29, %v8300_v20  ;;  %v6506_v2 = vld [vmem:[#allocation3 + $0x21c] ss:$24 sps:$4 sm:$0xff]   ;;  %v9428_v40 = vld [vmem:[#allocation20_spill] sm:$0xff] }
 0x245   : > { %v1836_v0 = vsel %vm1441_vm0, %v8629_v63, %v1835_v34  ;;  %v1830_v55 = vsel %vm1441_vm0, %v8611_v24, %v1829_v25  ;;  %v2615_v56 = vpop.permute.xlu1 %2614  ;;  %v2607_v19 = vpop.permute.xlu0 %2606  ;;  %v6503_v47 = vld [vmem:[#allocation3 + $0x250] ss:$24 sps:$4 sm:$0xff]   ;;  %v9424_v63 = vld [vmem:[#allocation18_spill] sm:$0xff]  ;;  %v9429_v41 = vrot.slane %v9428_v40, 4 }
 0x246   : > { %1866 = vst [vmem:[#allocation3 + $0x208] sm:$0xff] %v1836_v0  ;;  %1863 = vst [vmem:[#allocation3 + $0x1f0] sm:$0xff] %v1830_v55  ;;  %v2631_v36 = vrot.slane %v2615_v56, 4  ;;  %v2627_v7 = vrot.slane %v2607_v19, 4  ;;  %v9425_v43 = vrot.slane %v9424_v63, 4  ;;  %3356 = vmatprep.subr.bf16.mxu1 %v6503_v47  ;;  %v9430_v34 = vld [vmem:[#allocation19_spill] sm:$0xff]  ;;  %v6152_v19 = vcombine.low %v8491_v6, %v8510_v39 }
 0x247   : > { %3971 = vrot.lane.b32.xlu1 %v6500_v42, %s6863_s21  ;;  %3357 = vmatpush2.bf16.msra.mxu1 %v6501_v14  ;;  %v9431_v25 = vrot.slane %v9430_v34, 4  ;;  %v6512_v14 = vld [vmem:[#allocation3 + $0x1ec] ss:$24 sps:$4 sm:$0xff]   ;;  %v6516_v47 = vld [vmem:[#allocation3 + $0x2b0] ss:$24 sps:$4 sm:$0xff]  }
 0x248   : > { %3969 = vrot.lane.b32.xlu0 %v9423_v10, %s6863_s21  ;;  %v2654_v24 = vsel %vm629_vm4, %v9425_v43, %v2631_v36  ;;  %v2648_v15 = vsel %vm629_vm4, %v9427_v4, %v2627_v7  ;;  %3277 = vmatpush2.bf16.msra.mxu0 %v6509_v52  ;;  %v6522_v52 = vld [vmem:[#allocation3 + $0x1c0] ss:$24 sps:$4 sm:$0xff]   ;;  %v9432_v7 = vcombine.high %v8361_v26, %v8385_v45  ;;  %v6520_v10 = vld [vmem:[#allocation3 + $0x1bc] ss:$24 sps:$4 sm:$0xff]  }
 0x249   : > { %v2655_v16 = vsel %vm627_vm5, %v9424_v63, %v2654_v24  ;;  %v2649_v29 = vsel %vm627_vm5, %v9426_v9, %v2648_v15  ;;  %v2599_v20 = vpop.permute.xlu1 %2598  ;;  %v2591_v22 = vpop.permute.xlu0 %2590  ;;  %v6508_v5 = vld [vmem:[#allocation3 + $0x220] ss:$24 sps:$4 sm:$0xff]   ;;  %3278 = vmatprep.subr.bf16.mxu0 %v6510_v12  ;;  %v6150_v24 = vcombine.low %v8473_v37, %v8507_v44 }
 0x24a   : > { %2679 = vst [vmem:[#allocation3 + $0x358] sm:$0xff] %v2655_v16  ;;  %2676 = vst [vmem:[#allocation3 + $0x340] sm:$0xff] %v2649_v29  ;;  %v2623_v48 = vrot.slane %v2599_v20, 4  ;;  %v2619_v57 = vrot.slane %v2591_v22, 4  ;;  %3358 = vmatprep.subr.bf16.mxu1 %v6508_v5  ;;  %v8742_v15 = vld [vmem:[#allocation2 + $0x60] sm:$0xff]  ;;  %v6147_v16 = vcombine.low %v8559_v50, %v8581_v3  ;;  %v6146_v29 = vcombine.high %v8541_v33, %v8578_v60 }
 0x24b   : > { %3935 = vrot.lane.b32.xlu1 %v6151_v13, %s6863_s21  ;;  %3359 = vmatpush2.bf16.msra.mxu1 %v6506_v2 }
 0x24c   : > { %3943 = vrot.lane.b32.xlu0 %v6155_v32, %s6863_s21  ;;  %v2642_v1 = vsel %vm629_vm4, %v9429_v41, %v2623_v48  ;;  %v2636_v42 = vsel %vm629_vm4, %v9431_v25, %v2619_v57  ;;  %3279 = vmatpush2.bf16.msra.mxu0 %v6515_v35  ;;  %v6527_v32 = vld [vmem:[#allocation3 + $0x190] ss:$24 sps:$4 sm:$0xff]   ;;  %v6525_v35 = vld [vmem:[#allocation3 + $0x18c] ss:$24 sps:$4 sm:$0xff]   ;;  %v6530_v41 = vld [vmem:[#allocation3 + $0x280] ss:$24 sps:$4 sm:$0xff]  }
 0x24d   : > { %v2643_v0 = vsel %vm627_vm5, %v9428_v40, %v2642_v1  ;;  %v2637_v12 = vsel %vm627_vm5, %v9430_v34, %v2636_v42  ;;  %v8728_v55 = vpop.permute.xlu1 %3887  ;;  %v3886_v56 = vpop.permute.xlu0 %3885  ;;  %v6514_v36 = vld [vmem:[#allocation3 + $0x1f0] ss:$24 sps:$4 sm:$0xff]   ;;  %v9433_v1 = vcombine.high %v8418_v59, %v8442_v54  ;;  %v6145_v59 = vcombine.low %v8541_v33, %v8578_v60 }
 0x24e   : > { %2673 = vst [vmem:[#allocation3 + $0x328] sm:$0xff] %v2643_v0  ;;  %2670 = vst [vmem:[#allocation3 + $0x310] sm:$0xff] %v2637_v12  ;;  %3360 = vmatprep.subr.bf16.mxu1 %v6514_v36  ;;  %v4023_v5 = vsel %vm3993_vm10, %v3886_v56, %v8728_v55  ;;  %v6721_v42 = vld [vmem:[#allocation8 + $0x20] ss:$12 sps:$4 sm:$0xff]   ;;  %v6141_v12 = vcombine.high %v8609_v62, %v8644_v51  ;;  %v9434_v36 = vcombine.high %v8491_v6, %v8510_v39 }
 0x24f   : > { %3959 = vrot.lane.b32.xlu1 %v9432_v7, %s6863_s21  ;;  %3281 = vmatmul.mubr.bf16.vlgmr.msra.gmra.mxu0 %v8716_v11  ;;  %v8802_v7 = vld [vmem:[#allocation8 + $0x8] ss:$12 sps:$4 sm:$0xff]  }
 0x250   : > { %3937 = vrot.lane.b32.xlu0 %v6152_v19, %s6863_s21  ;;  %3361 = vmatpush2.bf16.msra.mxu1 %v6512_v14  ;;  %v6142_v14 = vcombine.low %v8627_v28, %v8647_v18 }
 0x251   : > { %v8738_v63 = vpop.permute.xlu1 %3987  ;;  %v3986_v43 = vpop.permute.xlu0 %3985  ;;  %v2866_v9 = vld [vmem:[#allocation3 + $0x33c] sm:$0xff]  ;;  %v2868_v4 = vld [vmem:[#allocation3 + $0x354] sm:$0xff]  ;;  %3409 = vmatprep.mubr.bf16.mxu0 %v8742_v15  ;;  %3362 = vmatprep.subr.bf16.mxu1 %v6522_v52 }
 0x252   : > { %v8745_v26 = vcombine.low %v2866_v9, %v2868_v4  ;;  %v8747_v45 = vcombine.high %v2866_v9, %v2868_v4  ;;  %v4063_v40 = vsel %vm3993_vm10, %v3986_v43, %v8738_v63 }
 0x253   : > { %3933 = vrot.lane.b32.xlu1 %v6150_v24, %s6863_s21  ;;  %v6531_v24 = vld [vmem:[#allocation3 + $0x250] ss:$24 sps:$4 sm:$0xff]  }
 0x254   : > { %3961 = vrot.lane.b32.xlu0 %v6516_v47, %s6863_s21  ;;  %3389 = vmatprep.subr.bf16.mxu0 %v8747_v45 }
 0x255   : > { %v3984_v37 = vpop.permute.xlu1 %3983  ;;  %3363 = vmatpush2.bf16.msra.mxu1 %v6520_v10  ;;  %3390 = vmatpush1.bf16.msra.mxu0 %v8745_v26  ;;  %v3884_v44 = vpop.permute.xlu0 %3883  ;;  %v2862_v20 = vld [vmem:[#allocation3 + $0x30c] sm:$0xff]  ;;  %v2864_v22 = vld [vmem:[#allocation3 + $0x324] sm:$0xff] }
 0x256   : > { %3364 = vmatprep.subr.bf16.mxu1 %v6527_v32  ;;  %v8757_v13 = vcombine.low %v2862_v20, %v2864_v22  ;;  %v8759_v2 = vcombine.high %v2862_v20, %v2864_v22  ;;  %v4062_v34 = vsel %vm3993_vm10, %v3984_v37, %v3986_v43  ;;  %v4022_v25 = vsel %vm3993_vm10, %v3884_v44, %v3886_v56  ;;  %v6533_v44 = vld [vmem:[#allocation3 + $0x220] ss:$24 sps:$4 sm:$0xff]   ;;  %v6610_v20 = vld [vmem:[#allocation8 + $0x4] ss:$12 sps:$4 sm:$0xff]  }
 0x257   : > { %3927 = vrot.lane.b32.xlu1 %v6147_v16, %s6863_s21  ;;  %v6140_v43 = vcombine.low %v8609_v62, %v8644_v51  ;;  %v9435_v62 = vcombine.low %v8108_v27, %v8112_v21  ;;  %v9436_v51 = vcombine.high %v8102_v58, %v8110_v8 }
 0x258   : > { %3925 = vrot.lane.b32.xlu0 %v6146_v29, %s6863_s21  ;;  %3391 = vmatprep.subr.bf16.mxu0 %v8759_v2 }
 0x259   : > { %v8764_v48 = vpop.permute.xlu1 %3877  ;;  %3365 = vmatpush2.bf16.msra.mxu1 %v6525_v35  ;;  %3392 = vmatpush1.bf16.msra.mxu0 %v8757_v13  ;;  %v3876_v57 = vpop.permute.xlu0 %3875 }
 0x25a   : > { %4141 = vmatprep.subr.bf16.mxu0 %v4023_v5  ;;  %4196 = vmatprep.subr.bf16.mxu1 %v4063_v40  ;;  %v4019_v54 = vsel %vm3993_vm10, %v3876_v57, %v8764_v48  ;;  %v9438_v5 = vcombine.high %v8126_v31, %v8130_v17 }
 0x25b   : > { %3951 = vrot.lane.b32.xlu1 %v6530_v41, %s6863_s21 }
 0x25c   : > { %3949 = vrot.lane.b32.xlu0 %v9433_v1, %s6863_s21  ;;  %3367 = vmatmul.mubr.bf16.vlgmr.msra.gmra.mxu1 %v8716_v11 }
 0x25d   : > { %6086 = vmatmul.mubr.msk.bf16.vlgmr.msra.gmra.mxu0 %vm3244_vm9, %v6721_v42  ;;  %v8780_v52 = vpop.permute.xlu1 %3977  ;;  %4197 = vmatpush1.bf16.msra.mxu1 %v4062_v34  ;;  %v3976_v0 = vpop.permute.xlu0 %3975  ;;  %v6535_v42 = vld [vmem:[#allocation3 + $0x1c0] ss:$24 sps:$4 sm:$0xff]  }
 0x25e   : > { %4142 = vmatpush1.bf16.msra.mxu0 %v4022_v25  ;;  %v4059_v11 = vsel %vm3993_vm10, %v3976_v0, %v8780_v52  ;;  %4216 = vmatprep.mubr.bf16.mxu1 %v8742_v15  ;;  %v9440_v25 = vcombine.low %v8126_v31, %v8130_v17 }
 0x25f   : > { %4143 = vmatprep.subr.bf16.mxu0 %v4019_v54  ;;  %3915 = vrot.lane.b32.xlu1 %v6141_v12, %s6863_s21  ;;  %v9441_v12 = vcombine.high %v8108_v27, %v8112_v21  ;;  %v9443_v27 = vcombine.high %v8128_v46, %v8138_v61 }
 0x260   : > { %3923 = vrot.lane.b32.xlu0 %v6145_v59, %s6863_s21  ;;  %4198 = vmatprep.subr.bf16.mxu1 %v4059_v11  ;;  %v6536_v11 = vld [vmem:[#allocation3 + $0x340] ss:$24 sps:$4 sm:$0xff]  }
 0x261   : > { %v3974_v56 = vpop.permute.xlu1 %3973  ;;  %v3874_v19 = vpop.permute.xlu0 %3873  ;;  %4173 = vmatprep.mubr.bf16.mxu0 %v6610_v20 }
 0x262   : > { %v4058_v33 = vsel %vm3993_vm10, %v3974_v56, %v3976_v0  ;;  %v4018_v60 = vsel %vm3993_vm10, %v3874_v19, %v3876_v57  ;;  %v9437_v57 = vcombine.low %v8102_v58, %v8110_v8  ;;  %v9439_v8 = vcombine.low %v8128_v46, %v8138_v61 }
 0x263   : > { %3939 = vrot.lane.b32.xlu1 %v9434_v36, %s6863_s21  ;;  %4144 = vmatpush1.bf16.msra.mxu0 %v4018_v60  ;;  %v9442_v19 = vcombine.high %v7677_v53, %v7711_v23  ;;  %v6538_v53 = vld [vmem:[#allocation3 + $0x310] ss:$24 sps:$4 sm:$0xff]  }
 0x264   : > { %3917 = vrot.lane.b32.xlu0 %v6142_v14, %s6863_s21  ;;  %4199 = vmatpush1.bf16.msra.mxu1 %v4058_v33  ;;  %v6537_v14 = vld [vmem:[#allocation3 + $0x190] ss:$24 sps:$4 sm:$0xff]  }
 0x265   : > { %v3868_v47 = vpop.permute.xlu1 %3867  ;;  %v3866_v10 = vpop.permute.xlu0 %3865 }
 0x266   : > { %v4015_v9 = vsel %vm3993_vm10, %v3866_v10, %v3868_v47 }
 0x267   : > { %3913 = vrot.lane.b32.xlu1 %v6140_v43, %s6863_s21  ;;  %4145 = vmatprep.subr.bf16.mxu0 %v4015_v9  ;;  %v9444_v43 = vcombine.high %v7793_v38, %v7818_v30  ;;  %v6539_v9 = vld [vmem:[#allocation3 + $0x158] ss:$24 sps:$4 sm:$0xff]  }
 0x268   : > { %3941 = vrot.lane.b32.xlu0 %v6531_v24, %s6863_s21  ;;  %6180 = vmatmul.mubr.msk.bf16.vlgmr.msra.gmra.mxu1 %vm3244_vm9, %v8802_v7 }
 0x269   : > { %v3892_v6 = vpop.permute.xlu1 %3891  ;;  %v3890_v39 = vpop.permute.xlu0 %3889  ;;  %4259 = vmatprep.mubr.bf16.mxu1 %v6610_v20  ;;  %v6547_v20 = vld [vmem:[#allocation3 + $0x12c] ss:$24 sps:$4 sm:$0xff]  }
 0x26a   : > { %v4025_v4 = vsel %vm3993_vm10, %v3890_v39, %v3892_v6  ;;  %v4024_v32 = vsel %vm3993_vm10, %v8728_v55, %v3890_v39  ;;  %v6541_v6 = vld [vmem:[#allocation3 + $0x15c] ss:$24 sps:$4 sm:$0xff]  }
 0x26b   : > { %3907 = vrot.lane.b32.xlu1 %v9435_v62, %s6863_s21  ;;  %4227 = vmatprep.subr.bf16.mxu1 %v4025_v4  ;;  %v6543_v4 = vld [vmem:[#allocation3 + $0x338] ss:$24 sps:$4 sm:$0xff]  }
 0x26c   : > { %3905 = vrot.lane.b32.xlu0 %v9436_v51, %s6863_s21  ;;  %4228 = vmatpush1.bf16.msra.mxu1 %v4024_v32 }
 0x26d   : > { %v3856_v35 = vpop.permute.xlu1 %3855  ;;  %v3864_v37 = vpop.permute.xlu0 %3863 }
 0x26e   : > { %v4014_v16 = vsel %vm3993_vm10, %v3864_v37, %v3866_v10  ;;  %v6545_v37 = vld [vmem:[#allocation3 + $0x154] ss:$24 sps:$4 sm:$0xff]  }
 0x26f   : > { %3931 = vrot.lane.b32.xlu1 %v6533_v44, %s6863_s21  ;;  %4146 = vmatpush1.bf16.msra.mxu0 %v4014_v16  ;;  %v6546_v44 = vld [vmem:[#allocation3 + $0x334] ss:$24 sps:$4 sm:$0xff]  }
 0x270   : > { %3929 = vrot.lane.b32.xlu0 %v6148_v49, %s6863_s21  ;;  %v6143_v49 = vcombine.high %v8627_v28, %v8647_v18  ;;  %v6534_v18 = vld [vmem:[#allocation3 + $0x1f0] ss:$24 sps:$4 sm:$0xff]  }
 0x271   : > { %v3880_v55 = vpop.permute.xlu1 %3879  ;;  %v3858_v29 = vpop.permute.xlu0 %3857 }
 0x272   : > { %v4011_v22 = vsel %vm3993_vm10, %v3856_v35, %v3858_v29  ;;  %v4020_v58 = vsel %vm3993_vm10, %v8764_v48, %v3880_v55 }
 0x273   : > { %3895 = vrot.lane.b32.xlu1 %v9438_v5, %s6863_s21  ;;  %4147 = vmatprep.subr.bf16.mxu0 %v4011_v22  ;;  %v6549_v22 = vld [vmem:[#allocation3 + $0x128] ss:$24 sps:$4 sm:$0xff]  }
 0x274   : > { %3903 = vrot.lane.b32.xlu0 %v9437_v57, %s6863_s21 }
 0x275   : > { %v3854_v50 = vpop.permute.xlu1 %3853  ;;  %v3882_v3 = vpop.permute.xlu0 %3881 }
 0x276   : > { %v4010_v40 = vsel %vm3993_vm10, %v3854_v50, %v3856_v35  ;;  %v4021_v41 = vsel %vm3993_vm10, %v3880_v55, %v3882_v3  ;;  %v6551_v50 = vld [vmem:[#allocation3 + $0x308] ss:$24 sps:$4 sm:$0xff]  }
 0x277   : > { %3919 = vrot.lane.b32.xlu1 %v6143_v49, %s6863_s21  ;;  %4148 = vmatpush1.bf16.msra.mxu0 %v4010_v40 }
 0x278   : > { %3897 = vrot.lane.b32.xlu0 %v9439_v8, %s6863_s21  ;;  %4229 = vmatprep.subr.bf16.mxu1 %v4021_v41 }
 0x279   : > { %4230 = vmatpush1.bf16.msra.mxu1 %v4020_v58  ;;  %v3848_v1 = vpop.permute.xlu1 %3847  ;;  %v3846_v28 = vpop.permute.xlu0 %3845  ;;  %v6553_v58 = vld [vmem:[#allocation3 + $0x304] ss:$24 sps:$4 sm:$0xff]  }
 0x27a   : > { %v4007_v34 = vsel %vm3993_vm10, %v3846_v28, %v3848_v1 }
 0x27b   : > { %3893 = vrot.lane.b32.xlu1 %v9440_v25, %s6863_s21  ;;  %4149 = vmatprep.subr.bf16.mxu0 %v4007_v34  ;;  %v6555_v25 = vld [vmem:[#allocation3 + $0xfc] ss:$24 sps:$4 sm:$0xff]  }
 0x27c   : > { %3921 = vrot.lane.b32.xlu0 %v6534_v18, %s6863_s21 }
 0x27d   : > { %v3872_v0 = vpop.permute.xlu1 %3871  ;;  %v3870_v54 = vpop.permute.xlu0 %3869 }
 0x27e   : > { %v4017_v59 = vsel %vm3993_vm10, %v3870_v54, %v3872_v0  ;;  %v4016_v48 = vsel %vm3993_vm10, %v3868_v47, %v3870_v54 }
 0x27f   : > { %3911 = vrot.lane.b32.xlu1 %v6535_v42, %s6863_s21  ;;  %4231 = vmatprep.subr.bf16.mxu1 %v4017_v59  ;;  %v6557_v42 = vld [vmem:[#allocation3 + $0xf8] ss:$24 sps:$4 sm:$0xff]  }
 0x280   : > { %3909 = vrot.lane.b32.xlu0 %v9441_v12, %s6863_s21  ;;  %4232 = vmatpush1.bf16.msra.mxu1 %v4016_v48  ;;  %v6559_v48 = vld [vmem:[#allocation3 + $0x164] ss:$24 sps:$4 sm:$0xff]   ;;  %v6560_v12 = vld [vmem:[#allocation3 + $0x160] ss:$24 sps:$4 sm:$0xff]  }
 0x281   : > { %v3836_v31 = vpop.permute.xlu1 %3835  ;;  %v3844_v17 = vpop.permute.xlu0 %3843 }
 0x282   : > { %v4006_v56 = vsel %vm3993_vm10, %v3844_v17, %v3846_v28 }
 0x283   : > { %3991 = vrot.lane.b32.xlu1 %v6536_v11, %s6863_s21  ;;  %4150 = vmatpush1.bf16.msra.mxu0 %v4006_v56  ;;  %v6561_v56 = vld [vmem:[#allocation3 + $0xc8] ss:$24 sps:$4 sm:$0xff]  }
 0x284   : > { %3989 = vrot.lane.b32.xlu0 %v9442_v19, %s6863_s21  ;;  %v6563_v19 = vld [vmem:[#allocation3 + $0xf4] ss:$24 sps:$4 sm:$0xff]  }
 0x285   : > { %v3860_v33 = vpop.permute.xlu1 %3859  ;;  %v3838_v60 = vpop.permute.xlu0 %3837 }
 0x286   : > { %v4003_v21 = vsel %vm3993_vm10, %v3836_v31, %v3838_v60  ;;  %v4012_v46 = vsel %vm3993_vm10, %v3858_v29, %v3860_v33 }
 0x287   : > { %3901 = vrot.lane.b32.xlu1 %v6537_v14, %s6863_s21  ;;  %4151 = vmatprep.subr.bf16.mxu0 %v4003_v21 }
 0x288   : > { %3899 = vrot.lane.b32.xlu0 %v9443_v27, %s6863_s21  ;;  %v6564_v27 = vld [vmem:[#allocation3 + $0x130] ss:$24 sps:$4 sm:$0xff]  }
 0x289   : > { %v3834_v36 = vpop.permute.xlu1 %3833  ;;  %v3862_v47 = vpop.permute.xlu0 %3861 }
 0x28a   : > { %v4002_v23 = vsel %vm3993_vm10, %v3834_v36, %v3836_v31  ;;  %v4013_v10 = vsel %vm3993_vm10, %v3860_v33, %v3862_v47  ;;  %v6565_v36 = vld [vmem:[#allocation3 + $0xcc] ss:$24 sps:$4 sm:$0xff]  }
 0x28b   : > { %3981 = vrot.lane.b32.xlu1 %v6538_v53, %s6863_s21  ;;  %4152 = vmatpush1.bf16.msra.mxu0 %v4002_v23 }
 0x28c   : > { %3979 = vrot.lane.b32.xlu0 %v9444_v43, %s6863_s21  ;;  %4233 = vmatprep.subr.bf16.mxu1 %v4013_v10  ;;  %v6567_v43 = vld [vmem:[#allocation3 + $0xc4] ss:$24 sps:$4 sm:$0xff]  }
 0x28d   : > { %4234 = vmatpush1.bf16.msra.mxu1 %v4012_v46  ;;  %v3828_v61 = vpop.permute.xlu1 %3827  ;;  %v6568_v46 = vld [vmem:[#allocation3 + $0x134] ss:$24 sps:$4 sm:$0xff]  }
 0x28e   : > { %v3826_v24 = vpop.permute.xlu0 %3825 }
 0x28f   : > { %v3999_v39 = vsel %vm3993_vm10, %v3826_v24, %v3828_v61  ;;  %4893 = vrot.lane.b32.xlu1 %v6541_v6, %s6863_s21  ;;  %v6569_v6 = vld [vmem:[#allocation3 + $0x9c] ss:$24 sps:$4 sm:$0xff]  }
 0x290   : > { %4891 = vrot.lane.b32.xlu0 %v6539_v9, %s6863_s21  ;;  %4153 = vmatprep.subr.bf16.mxu0 %v3999_v39  ;;  %v6571_v39 = vld [vmem:[#allocation3 + $0x98] ss:$24 sps:$4 sm:$0xff]  }
 0x291   : > { %v3852_v38 = vpop.permute.xlu1 %3851 }
 0x292   : > { %v3850_v30 = vpop.permute.xlu0 %3849 }
 0x293   : > { %v4009_v32 = vsel %vm3993_vm10, %v3850_v30, %v3852_v38  ;;  %v4008_v62 = vsel %vm3993_vm10, %v3848_v1, %v3850_v30  ;;  %4993 = vrot.lane.b32.xlu1 %v8745_v26, %s6863_s21  ;;  %v6554_v1 = vld [vmem:[#allocation3 + $0x124] ss:$24 sps:$4 sm:$0xff]  }
 0x294   : > { %4991 = vrot.lane.b32.xlu0 %v6543_v4, %s6863_s21  ;;  %4235 = vmatprep.subr.bf16.mxu1 %v4009_v32 }
 0x295   : > { %4236 = vmatpush1.bf16.msra.mxu1 %v4008_v62  ;;  %v3816_v51 = vpop.permute.xlu1 %3815  ;;  %v6573_v62 = vld [vmem:[#allocation3 + $0x104] ss:$24 sps:$4 sm:$0xff]  }
 0x296   : > { %v3824_v35 = vpop.permute.xlu0 %3823 }
 0x297   : > { %v3998_v16 = vsel %vm3993_vm10, %v3824_v35, %v3826_v24  ;;  %4989 = vrot.lane.b32.xlu1 %v6546_v44, %s6863_s21 }
 0x298   : > { %4889 = vrot.lane.b32.xlu0 %v6545_v37, %s6863_s21  ;;  %4154 = vmatpush1.bf16.msra.mxu0 %v3998_v16  ;;  %v6575_v16 = vld [vmem:[#allocation3 + $0x68] ss:$24 sps:$4 sm:$0xff]  }
 0x299   : > { %v3840_v55 = vpop.permute.xlu1 %3839 }
 0x29a   : > { %v3818_v29 = vpop.permute.xlu0 %3817  ;;  %v4004_v40 = vsel %vm3993_vm10, %v3838_v60, %v3840_v55 }
 0x29b   : > { %v3995_v57 = vsel %vm3993_vm10, %v3816_v51, %v3818_v29  ;;  %4883 = vrot.lane.b32.xlu1 %v6547_v20, %s6863_s21 }
 0x29c   : > { %4881 = vrot.lane.b32.xlu0 %v6549_v22, %s6863_s21  ;;  %4155 = vmatprep.subr.bf16.mxu0 %v3995_v57  ;;  %v6578_v57 = vld [vmem:[#allocation3 + $0xd0] ss:$24 sps:$4 sm:$0xff]  }
 0x29d   : > { %v3814_v26 = vpop.permute.xlu1 %3813 }
 0x29e   : > { %v3842_v5 = vpop.permute.xlu0 %3841  ;;  %v3994_v3 = vsel %vm3993_vm10, %v3814_v26, %v3816_v51  ;;  %v6574_v51 = vld [vmem:[#allocation3 + $0x100] ss:$24 sps:$4 sm:$0xff]   ;;  %v6579_v26 = vld [vmem:[#allocation3 + $0x6c] ss:$24 sps:$4 sm:$0xff]  }
 0x29f   : > { %v4005_v49 = vsel %vm3993_vm10, %v3840_v55, %v3842_v5  ;;  %4983 = vrot.lane.b32.xlu1 %v8757_v13, %s6863_s21  ;;  %4156 = vmatpush1.bf16.msra.mxu0 %v3994_v3  ;;  %v6577_v55 = vld [vmem:[#allocation3 + $0x94] ss:$24 sps:$4 sm:$0xff]  }
 0x2a0   : > { %4981 = vrot.lane.b32.xlu0 %v6551_v50, %s6863_s21  ;;  %4237 = vmatprep.subr.bf16.mxu1 %v4005_v49 }
 0x2a1   : > { %4238 = vmatpush1.bf16.msra.mxu1 %v4004_v40  ;;  %v3832_v41 = vpop.permute.xlu1 %3831 }
 0x2a2   : > { %v3830_v8 = vpop.permute.xlu0 %3829 }
 0x2a3   : > { %v4001_v28 = vsel %vm3993_vm10, %v3830_v8, %v3832_v41  ;;  %v4000_v18 = vsel %vm3993_vm10, %v3828_v61, %v3830_v8  ;;  %4979 = vrot.lane.b32.xlu1 %v6553_v58, %s6863_s21  ;;  %v6581_v41 = vld [vmem:[#allocation3 + $0x64] ss:$24 sps:$4 sm:$0xff]   ;;  %v6582_v8 = vld [vmem:[#allocation3 + $0xd4] ss:$24 sps:$4 sm:$0xff]  }
 0x2a4   : > { %4879 = vrot.lane.b32.xlu0 %v6554_v1, %s6863_s21  ;;  %4239 = vmatprep.subr.bf16.mxu1 %v4001_v28 }
 0x2a5   : > { %4240 = vmatpush1.bf16.msra.mxu1 %v4000_v18  ;;  %v3968_v13 = vpop.permute.xlu1 %3967  ;;  %v6583_v18 = vld [vmem:[#allocation3 + $0x3c] ss:$24 sps:$4 sm:$0xff]  }
 0x2a6   : > { %v3966_v34 = vpop.permute.xlu0 %3965 }
 0x2a7   : > { %v4055_v0 = vsel %vm3993_vm10, %v3966_v34, %v3968_v13  ;;  %4873 = vrot.lane.b32.xlu1 %v6555_v25, %s6863_s21 }
 0x2a8   : > { %4871 = vrot.lane.b32.xlu0 %v6557_v42, %s6863_s21  ;;  %4157 = vmatprep.subr.bf16.mxu0 %v4055_v0 }
 0x2a9   : > { %v3820_v54 = vpop.permute.xlu1 %3819 }
 0x2aa   : > { %v3964_v59 = vpop.permute.xlu0 %3963  ;;  %v3996_v33 = vsel %vm3993_vm10, %v3818_v29, %v3820_v54 }
 0x2ab   : > { %v4054_v31 = vsel %vm3993_vm10, %v3964_v59, %v3966_v34  ;;  %4897 = vrot.lane.b32.xlu1 %v6559_v48, %s6863_s21  ;;  %v6588_v59 = vld [vmem:[#allocation3 + $0xa0] ss:$24 sps:$4 sm:$0xff]  }
 0x2ac   : > { %4895 = vrot.lane.b32.xlu0 %v6560_v12, %s6863_s21  ;;  %4158 = vmatpush2.bf16.msra.mxu0 %v4054_v31 }
 0x2ad   : > { %v3956_v17 = vpop.permute.xlu1 %3955 }
 0x2ae   : > { %v3822_v11 = vpop.permute.xlu0 %3821 }
 0x2af   : > { %v3997_v14 = vsel %vm3993_vm10, %v3820_v54, %v3822_v11  ;;  %4861 = vrot.lane.b32.xlu1 %v6561_v56, %s6863_s21  ;;  %v6587_v54 = vld [vmem:[#allocation3 + $0xa4] ss:$24 sps:$4 sm:$0xff]   ;;  %v6591_v11 = vld [vmem:[#allocation3 + $0x34] ss:$24 sps:$4 sm:$0xff]  }
 0x2b0   : > { %4869 = vrot.lane.b32.xlu0 %v6563_v19, %s6863_s21  ;;  %4241 = vmatprep.subr.bf16.mxu1 %v3997_v14 }
 0x2b1   : > { %4242 = vmatpush1.bf16.msra.mxu1 %v3996_v33  ;;  %v3954_v60 = vpop.permute.xlu1 %3953  ;;  %v6592_v33 = vld [vmem:[#allocation3 + $0x70] ss:$24 sps:$4 sm:$0xff]  }
 0x2b2   : > { %v3958_v21 = vpop.permute.xlu0 %3957  ;;  %v4050_v47 = vsel %vm3993_vm10, %v3954_v60, %v3956_v17  ;;  %v6593_v60 = vld [vmem:[#allocation3 + $0xc] ss:$24 sps:$4 sm:$0xff]  }
 0x2b3   : > { %v4051_v53 = vsel %vm3993_vm10, %v3956_v17, %v3958_v21  ;;  %4885 = vrot.lane.b32.xlu1 %v6564_v27, %s6863_s21  ;;  %v6589_v17 = vld [vmem:[#allocation3 + $0x8] ss:$24 sps:$4 sm:$0xff]  }
 0x2b4   : > { %4863 = vrot.lane.b32.xlu0 %v6565_v36, %s6863_s21  ;;  %4159 = vmatprep.subr.bf16.mxu0 %v4051_v53 }
 0x2b5   : > { %4160 = vmatpush2.bf16.msra.mxu0 %v4050_v47  ;;  %v3948_v23 = vpop.permute.xlu1 %3947 }
 0x2b6   : > { %v3946_v10 = vpop.permute.xlu0 %3945 }
 0x2b7   : > { %v4047_v61 = vsel %vm3993_vm10, %v3946_v10, %v3948_v23  ;;  %4859 = vrot.lane.b32.xlu1 %v6567_v43, %s6863_s21 }
 0x2b8   : > { %4887 = vrot.lane.b32.xlu0 %v6568_v46, %s6863_s21  ;;  %4161 = vmatprep.subr.bf16.mxu0 %v4047_v61 }
 0x2b9   : > { %v3972_v24 = vpop.permute.xlu1 %3971 }
 0x2ba   : > { %v3970_v9 = vpop.permute.xlu0 %3969 }
 0x2bb   : > { %v4057_v38 = vsel %vm3993_vm10, %v3970_v9, %v3972_v24  ;;  %v4056_v30 = vsel %vm3993_vm10, %v3968_v13, %v3970_v9  ;;  %4853 = vrot.lane.b32.xlu1 %v6569_v6, %s6863_s21  ;;  %v6585_v13 = vld [vmem:[#allocation3 + $0x38] ss:$24 sps:$4 sm:$0xff]   ;;  %v6597_v24 = vld [vmem:[#allocation3 + $0x44] ss:$24 sps:$4 sm:$0xff]  }
 0x2bc   : > { %4851 = vrot.lane.b32.xlu0 %v6571_v39, %s6863_s21  ;;  %4243 = vmatprep.subr.bf16.mxu1 %v4057_v38  ;;  %v6598_v9 = vld [vmem:[#allocation3 + $0x40] ss:$24 sps:$4 sm:$0xff]  }
 0x2bd   : > { %4244 = vmatpush2.bf16.msra.mxu1 %v4056_v30  ;;  %v3936_v4 = vpop.permute.xlu1 %3935 }
 0x2be   : > { %v3944_v32 = vpop.permute.xlu0 %3943 }
 0x2bf   : > { %v4046_v35 = vsel %vm3993_vm10, %v3944_v32, %v3946_v10  ;;  %4877 = vrot.lane.b32.xlu1 %v6573_v62, %s6863_s21  ;;  %v6596_v10 = vld [vmem:[#allocation3 + $0x74] ss:$24 sps:$4 sm:$0xff]   ;;  %v6601_v32 = vld [vmem:[#allocation3 + $0x2d8] ss:$24 sps:$4 sm:$0xff]  }
 0x2c0   : > { %4875 = vrot.lane.b32.xlu0 %v6574_v51, %s6863_s21  ;;  %4162 = vmatpush2.bf16.msra.mxu0 %v4046_v35 }
 0x2c1   : > { %v3960_v37 = vpop.permute.xlu1 %3959 }
 0x2c2   : > { %v8929_v44 = vpop.permute.xlu0 %3937  ;;  %v4052_v3 = vsel %vm3993_vm10, %v3958_v21, %v3960_v37 }
 0x2c3   : > { %v4043_v29 = vsel %vm3993_vm10, %v3936_v4, %v8929_v44  ;;  %4841 = vrot.lane.b32.xlu1 %v6575_v16, %s6863_s21 }
 0x2c4   : > { %4849 = vrot.lane.b32.xlu0 %v6577_v55, %s6863_s21  ;;  %4163 = vmatprep.subr.bf16.mxu0 %v4043_v29 }
 0x2c5   : > { %v3934_v20 = vpop.permute.xlu1 %3933 }
 0x2c6   : > { %v3962_v22 = vpop.permute.xlu0 %3961  ;;  %v4042_v5 = vsel %vm3993_vm10, %v3934_v20, %v3936_v4  ;;  %v6599_v4 = vld [vmem:[#allocation3 + $0x2dc] ss:$24 sps:$4 sm:$0xff]   ;;  %v6605_v20 = vld [vmem:[#allocation3 + $0x2a8] ss:$24 sps:$4 sm:$0xff]  }
 0x2c7   : > { %v4053_v50 = vsel %vm3993_vm10, %v3960_v37, %v3962_v22  ;;  %4865 = vrot.lane.b32.xlu1 %v6578_v57, %s6863_s21  ;;  %4164 = vmatpush2.bf16.msra.mxu0 %v4042_v5  ;;  %v6603_v37 = vld [vmem:[#allocation3 + $0x10] ss:$24 sps:$4 sm:$0xff]   ;;  %v6607_v22 = vld [vmem:[#allocation3 + $0x14] ss:$24 sps:$4 sm:$0xff]  }
 0x2c8   : > { %4843 = vrot.lane.b32.xlu0 %v6579_v26, %s6863_s21  ;;  %4245 = vmatprep.subr.bf16.mxu1 %v4053_v50  ;;  %v6608_v5 = vld [vmem:[#allocation8] ss:$12 sps:$4 sm:$0xff]  }
 0x2c9   : > { %4246 = vmatpush2.bf16.msra.mxu1 %v4052_v3  ;;  %v3928_v49 = vpop.permute.xlu1 %3927 }
 0x2ca   : > { %v3926_v40 = vpop.permute.xlu0 %3925 }
 0x2cb   : > { %v4039_v58 = vsel %vm3993_vm10, %v3926_v40, %v3928_v49  ;;  %4839 = vrot.lane.b32.xlu1 %v6581_v41, %s6863_s21  ;;  %v6612_v41 = vld [vmem:[#allocation3 + $0x2ac] ss:$24 sps:$4 sm:$0xff]  }
 0x2cc   : > { %4867 = vrot.lane.b32.xlu0 %v6582_v8, %s6863_s21  ;;  %4165 = vmatprep.subr.bf16.mxu0 %v4039_v58 }
 0x2cd   : > { %v3952_v1 = vpop.permute.xlu1 %3951 }
 0x2ce   : > { %v3950_v28 = vpop.permute.xlu0 %3949 }
 0x2cf   : > { %v4049_v34 = vsel %vm3993_vm10, %v3950_v28, %v3952_v1  ;;  %v4048_v25 = vsel %vm3993_vm10, %v3948_v23, %v3950_v28  ;;  %4833 = vrot.lane.b32.xlu1 %v6583_v18, %s6863_s21  ;;  %v6595_v23 = vld [vmem:[#allocation3 + $0x4] ss:$24 sps:$4 sm:$0xff]  }
 0x2d0   : > { %4831 = vrot.lane.b32.xlu0 %v6585_v13, %s6863_s21  ;;  %4247 = vmatprep.subr.bf16.mxu1 %v4049_v34  ;;  %v6614_v18 = vld [vmem:[#allocation3 + $0x27c] ss:$24 sps:$4 sm:$0xff]   ;;  %v6616_v13 = vld [vmem:[#allocation3 + $0x278] ss:$24 sps:$4 sm:$0xff]  }
 0x2d1   : > { %4248 = vmatpush2.bf16.msra.mxu1 %v4048_v25  ;;  %v3916_v42 = vpop.permute.xlu1 %3915 }
 0x2d2   : > { %v3924_v0 = vpop.permute.xlu0 %3923 }
 0x2d3   : > { %v4038_v48 = vsel %vm3993_vm10, %v3924_v0, %v3926_v40  ;;  %4857 = vrot.lane.b32.xlu1 %v6587_v54, %s6863_s21  ;;  %v6611_v40 = vld [vmem:[#allocation3 + $0x2a4] ss:$24 sps:$4 sm:$0xff]  }
 0x2d4   : > { %4855 = vrot.lane.b32.xlu0 %v6588_v59, %s6863_s21  ;;  %4166 = vmatpush2.bf16.msra.mxu0 %v4038_v48  ;;  %v6618_v54 = vld [vmem:[#allocation3 + $0x2e4] ss:$24 sps:$4 sm:$0xff]   ;;  %v6619_v59 = vld [vmem:[#allocation3 + $0x2e0] ss:$24 sps:$4 sm:$0xff]  }
 0x2d5   : > { %v3940_v12 = vpop.permute.xlu1 %3939 }
 0x2d6   : > { %v8950_v31 = vpop.permute.xlu0 %3917  ;;  %v4044_v36 = vsel %vm3993_vm10, %v8929_v44, %v3940_v12  ;;  %v6604_v44 = vld [vmem:[#allocation3 + $0x2d4] ss:$24 sps:$4 sm:$0xff]  }
 0x2d7   : > { %v4035_v56 = vsel %vm3993_vm10, %v3916_v42, %v8950_v31  ;;  %4821 = vrot.lane.b32.xlu1 %v6589_v17, %s6863_s21  ;;  %v6620_v17 = vld [vmem:[#allocation3 + $0x248] ss:$24 sps:$4 sm:$0xff]  }
 0x2d8   : > { %4829 = vrot.lane.b32.xlu0 %v6591_v11, %s6863_s21  ;;  %4167 = vmatprep.subr.bf16.mxu0 %v4035_v56  ;;  %v6622_v11 = vld [vmem:[#allocation3 + $0x274] ss:$24 sps:$4 sm:$0xff]  }
 0x2d9   : > { %v3914_v19 = vpop.permute.xlu1 %3913 }
 0x2da   : > { %v3942_v14 = vpop.permute.xlu0 %3941  ;;  %v4034_v21 = vsel %vm3993_vm10, %v3914_v19, %v3916_v42 }
 0x2db   : > { %v4045_v27 = vsel %vm3993_vm10, %v3940_v12, %v3942_v14  ;;  %4845 = vrot.lane.b32.xlu1 %v6592_v33, %s6863_s21  ;;  %4168 = vmatpush2.bf16.msra.mxu0 %v4034_v21  ;;  %v6624_v21 = vld [vmem:[#allocation3 + $0x24c] ss:$24 sps:$4 sm:$0xff]  }
 0x2dc   : > { %4823 = vrot.lane.b32.xlu0 %v6593_v60, %s6863_s21  ;;  %4249 = vmatprep.subr.bf16.mxu1 %v4045_v27  ;;  %v6623_v60 = vld [vmem:[#allocation3 + $0x2b0] ss:$24 sps:$4 sm:$0xff]  }
 0x2dd   : > { %4250 = vmatpush2.bf16.msra.mxu1 %v4044_v36  ;;  %v3908_v47 = vpop.permute.xlu1 %3907 }
 0x2de   : > { %v3906_v53 = vpop.permute.xlu0 %3905 }
 0x2df   : > { %v4031_v43 = vsel %vm3993_vm10, %v3906_v53, %v3908_v47  ;;  %4819 = vrot.lane.b32.xlu1 %v6595_v23, %s6863_s21 }
 0x2e0   : > { %4847 = vrot.lane.b32.xlu0 %v6596_v10, %s6863_s21  ;;  %4169 = vmatprep.subr.bf16.mxu0 %v4031_v43  ;;  %v6628_v43 = vld [vmem:[#allocation3 + $0x21c] ss:$24 sps:$4 sm:$0xff]  }
 0x2e1   : > { %v3932_v46 = vpop.permute.xlu1 %3931 }
 0x2e2   : > { %v3930_v61 = vpop.permute.xlu0 %3929 }
 0x2e3   : > { %v4041_v6 = vsel %vm3993_vm10, %v3930_v61, %v3932_v46  ;;  %v4040_v39 = vsel %vm3993_vm10, %v3928_v49, %v3930_v61  ;;  %4837 = vrot.lane.b32.xlu1 %v6597_v24, %s6863_s21  ;;  %v6630_v61 = vld [vmem:[#allocation3 + $0x218] ss:$24 sps:$4 sm:$0xff]  }
 0x2e4   : > { %4835 = vrot.lane.b32.xlu0 %v6598_v9, %s6863_s21  ;;  %4251 = vmatprep.subr.bf16.mxu1 %v4041_v6  ;;  %v6632_v6 = vld [vmem:[#allocation3 + $0x284] ss:$24 sps:$4 sm:$0xff]  }
 0x2e5   : > { %4252 = vmatpush2.bf16.msra.mxu1 %v4040_v39  ;;  %v3896_v38 = vpop.permute.xlu1 %3895  ;;  %v6633_v39 = vld [vmem:[#allocation3 + $0x280] ss:$24 sps:$4 sm:$0xff]  }
 0x2e6   : > { %v3904_v30 = vpop.permute.xlu0 %3903 }
 0x2e7   : > { %v4030_v62 = vsel %vm3993_vm10, %v3904_v30, %v3906_v53  ;;  %4973 = vrot.lane.b32.xlu1 %v6599_v4, %s6863_s21  ;;  %v6627_v53 = vld [vmem:[#allocation3 + $0x2b4] ss:$24 sps:$4 sm:$0xff]  }
 0x2e8   : > { %4971 = vrot.lane.b32.xlu0 %v6601_v32, %s6863_s21  ;;  %4170 = vmatpush2.bf16.msra.mxu0 %v4030_v62  ;;  %v6634_v32 = vld [vmem:[#allocation3 + $0x1e8] ss:$24 sps:$4 sm:$0xff]   ;;  %v6636_v62 = vld [vmem:[#allocation3 + $0x214] ss:$24 sps:$4 sm:$0xff]  }
 0x2e9   : > { %v3920_v51 = vpop.permute.xlu1 %3919 }
 0x2ea   : > { %v3898_v35 = vpop.permute.xlu0 %3897  ;;  %v4036_v50 = vsel %vm3993_vm10, %v8950_v31, %v3920_v51 }
 0x2eb   : > { %v4027_v16 = vsel %vm3993_vm10, %v3896_v38, %v3898_v35  ;;  %4825 = vrot.lane.b32.xlu1 %v6603_v37, %s6863_s21 }
 0x2ec   : > { %4969 = vrot.lane.b32.xlu0 %v6604_v44, %s6863_s21  ;;  %4171 = vmatprep.subr.bf16.mxu0 %v4027_v16  ;;  %v6637_v44 = vld [vmem:[#allocation3 + $0x250] ss:$24 sps:$4 sm:$0xff]  }
 0x2ed   : > { %v3894_v55 = vpop.permute.xlu1 %3893 }
 0x2ee   : > { %v3922_v29 = vpop.permute.xlu0 %3921  ;;  %v4026_v57 = vsel %vm3993_vm10, %v3894_v55, %v3896_v38 }
 0x2ef   : > { %v4037_v26 = vsel %vm3993_vm10, %v3920_v51, %v3922_v29  ;;  %4961 = vrot.lane.b32.xlu1 %v6605_v20, %s6863_s21  ;;  %4172 = vmatpush2.bf16.msra.mxu0 %v4026_v57  ;;  %v6638_v29 = vld [vmem:[#allocation3 + $0x1ec] ss:$24 sps:$4 sm:$0xff]  }
 0x2f0   : > { %4827 = vrot.lane.b32.xlu0 %v6607_v22, %s6863_s21  ;;  %4253 = vmatprep.subr.bf16.mxu1 %v4037_v26  ;;  %v9035_v20 = vld [vmem:[#allocation8 + $0x38] ss:$12 sps:$4 sm:$0xff]  }
 0x2f1   : > { %4254 = vmatpush2.bf16.msra.mxu1 %v4036_v50  ;;  %v3912_v3 = vpop.permute.xlu1 %3911  ;;  %v6640_v26 = vld [vmem:[#allocation3 + $0x1e4] ss:$24 sps:$4 sm:$0xff]  }
 0x2f2   : > { %v3910_v49 = vpop.permute.xlu0 %3909  ;;  %4174 = vmatmul.mubr.bf16.vlgmr.msra.gmra.mxu0 %v6608_v5 }
 0x2f3   : > { %v4033_v8 = vsel %vm3993_vm10, %v3910_v49, %v3912_v3  ;;  %v4032_v58 = vsel %vm3993_vm10, %v3908_v47, %v3910_v49  ;;  %4959 = vrot.lane.b32.xlu1 %v6611_v40, %s6863_s21  ;;  %4302 = vmatprep.mubr.bf16.mxu0 %v8742_v15  ;;  %v6626_v47 = vld [vmem:[#allocation3 + $0x244] ss:$24 sps:$4 sm:$0xff]   ;;  %v6644_v49 = vld [vmem:[#allocation3 + $0x1b8] ss:$24 sps:$4 sm:$0xff]  }
 0x2f4   : > { %4963 = vrot.lane.b32.xlu0 %v6612_v41, %s6863_s21  ;;  %4255 = vmatprep.subr.bf16.mxu1 %v4033_v8  ;;  %v6642_v3 = vld [vmem:[#allocation3 + $0x1bc] ss:$24 sps:$4 sm:$0xff]  }
 0x2f5   : > { %4256 = vmatpush2.bf16.msra.mxu1 %v4032_v58  ;;  %v3992_v1 = vpop.permute.xlu1 %3991 }
 0x2f6   : > { %v3990_v28 = vpop.permute.xlu0 %3989 }
 0x2f7   : > { %v4065_v34 = vsel %vm3993_vm10, %v3990_v28, %v3992_v1  ;;  %v4064_v25 = vsel %vm3993_vm10, %v8738_v63, %v3990_v28  ;;  %4953 = vrot.lane.b32.xlu1 %v6614_v18, %s6863_s21  ;;  %v6647_v18 = vld [vmem:[#allocation3 + $0x224] ss:$24 sps:$4 sm:$0xff]  }
 0x2f8   : > { %4282 = vmatprep.subr.bf16.mxu0 %v4065_v34  ;;  %4951 = vrot.lane.b32.xlu0 %v6616_v13, %s6863_s21  ;;  %v6648_v34 = vld [vmem:[#allocation3 + $0x220] ss:$24 sps:$4 sm:$0xff]  }
 0x2f9   : > { %4283 = vmatpush1.bf16.msra.mxu0 %v4064_v25  ;;  %v3902_v42 = vpop.permute.xlu1 %3901  ;;  %v6649_v25 = vld [vmem:[#allocation3 + $0x188] ss:$24 sps:$4 sm:$0xff]  }
 0x2fa   : > { %v3900_v0 = vpop.permute.xlu0 %3899 }
 0x2fb   : > { %v4029_v48 = vsel %vm3993_vm10, %v3900_v0, %v3902_v42  ;;  %v4028_v12 = vsel %vm3993_vm10, %v3898_v35, %v3900_v0  ;;  %4977 = vrot.lane.b32.xlu1 %v6618_v54, %s6863_s21  ;;  %v6651_v42 = vld [vmem:[#allocation3 + $0x1b4] ss:$24 sps:$4 sm:$0xff]  }
 0x2fc   : > { %4257 = vmatprep.subr.bf16.mxu1 %v4029_v48  ;;  %4975 = vrot.lane.b32.xlu0 %v6619_v59, %s6863_s21  ;;  %v6667_v59 = vld [vmem:[#allocation8 + $0x34] ss:$12 sps:$4 sm:$0xff]  }
 0x2fd   : > { %4258 = vmatpush2.bf16.msra.mxu1 %v4028_v12  ;;  %v3982_v63 = vpop.permute.xlu1 %3981  ;;  %v6653_v12 = vld [vmem:[#allocation3 + $0x18c] ss:$24 sps:$4 sm:$0xff]  }
 0x2fe   : > { %v3980_v31 = vpop.permute.xlu0 %3979 }
 0x2ff   : > { %v4061_v56 = vsel %vm3993_vm10, %v3980_v31, %v3982_v63  ;;  %v4060_v19 = vsel %vm3993_vm10, %v8780_v52, %v3980_v31  ;;  %4941 = vrot.lane.b32.xlu1 %v6620_v17, %s6863_s21  ;;  %v6652_v17 = vld [vmem:[#allocation3 + $0x1f0] ss:$24 sps:$4 sm:$0xff]  }
 0x300   : > { %4284 = vmatprep.subr.bf16.mxu0 %v4061_v56  ;;  %4949 = vrot.lane.b32.xlu0 %v6622_v11, %s6863_s21 }
 0x301   : > { %4285 = vmatpush1.bf16.msra.mxu0 %v4060_v19  ;;  %v9000_v14 = vpop.permute.xlu1 %4893  ;;  %4260 = vmatmul.mubr.bf16.vlgmr.msra.gmra.mxu1 %v6608_v5  ;;  %v6641_v5 = vld [vmem:[#allocation3 + $0x254] ss:$24 sps:$4 sm:$0xff]   ;;  %v6655_v19 = vld [vmem:[#allocation3 + $0x184] ss:$24 sps:$4 sm:$0xff]  }
 0x302   : > { %v4892_v33 = vpop.permute.xlu0 %4891  ;;  %5221 = vmatprep.mubr.bf16.mxu1 %v8742_v15 }
 0x303   : > { %v5028_v27 = vsel %vm3993_vm10, %v4892_v33, %v9000_v14  ;;  %4965 = vrot.lane.b32.xlu1 %v6623_v60, %s6863_s21 }
 0x304   : > { %5146 = vmatprep.subr.bf16.mxu0 %v5028_v27  ;;  %4943 = vrot.lane.b32.xlu0 %v6624_v21, %s6863_s21  ;;  %v6656_v21 = vld [vmem:[#allocation3 + $0x1f4] ss:$24 sps:$4 sm:$0xff]  }
 0x305   : > { %6181 = vmatmul.mubr.msk.bf16.vlgmr.msra.gmra.mxu0 %vm3244_vm9, %v8802_v7  ;;  %v9009_v52 = vpop.permute.xlu1 %4993 }
 0x306   : > { %v4992_v36 = vpop.permute.xlu0 %4991  ;;  %5178 = vmatprep.mubr.bf16.mxu0 %v6667_v59 }
 0x307   : > { %v5068_v23 = vsel %vm3993_vm10, %v4992_v36, %v9009_v52  ;;  %4939 = vrot.lane.b32.xlu1 %v6626_v47, %s6863_s21  ;;  %v6658_v47 = vld [vmem:[#allocation3 + $0x1c0] ss:$24 sps:$4 sm:$0xff]  }
 0x308   : > { %5201 = vmatprep.subr.bf16.mxu1 %v5068_v23  ;;  %4967 = vrot.lane.b32.xlu0 %v6627_v53, %s6863_s21 }
 0x309   : > { %v4990_v15 = vpop.permute.xlu1 %4989 }
 0x30a   : > { %v4890_v10 = vpop.permute.xlu0 %4889  ;;  %v5067_v46 = vsel %vm3993_vm10, %v4990_v15, %v4992_v36  ;;  %v6657_v36 = vld [vmem:[#allocation3 + $0x1c4] ss:$24 sps:$4 sm:$0xff]  }
 0x30b   : > { %v5027_v7 = vsel %vm3993_vm10, %v4890_v10, %v4892_v33  ;;  %4933 = vrot.lane.b32.xlu1 %v6628_v43, %s6863_s21  ;;  %5202 = vmatpush1.bf16.msra.mxu1 %v5067_v46 }
 0x30c   : > { %5147 = vmatpush1.bf16.msra.mxu0 %v5027_v7  ;;  %4931 = vrot.lane.b32.xlu0 %v6630_v61, %s6863_s21  ;;  %v6659_v7 = vld [vmem:[#allocation3 + $0x344] ss:$24 sps:$4 sm:$0xff]  }
 0x30d   : > { %v9019_v24 = vpop.permute.xlu1 %4883 }
 0x30e   : > { %v4882_v9 = vpop.permute.xlu0 %4881 }
 0x30f   : > { %v5024_v38 = vsel %vm3993_vm10, %v4882_v9, %v9019_v24  ;;  %4957 = vrot.lane.b32.xlu1 %v6632_v6, %s6863_s21 }
 0x310   : > { %5148 = vmatprep.subr.bf16.mxu0 %v5024_v38  ;;  %4955 = vrot.lane.b32.xlu0 %v6633_v39, %s6863_s21 }
 0x311   : > { %v9025_v30 = vpop.permute.xlu1 %4983 }
 0x312   : > { %v4982_v4 = vpop.permute.xlu0 %4981 }
 0x313   : > { %v5064_v51 = vsel %vm3993_vm10, %v4982_v4, %v9025_v30  ;;  %4921 = vrot.lane.b32.xlu1 %v6634_v32, %s6863_s21 }
 0x314   : > { %5203 = vmatprep.subr.bf16.mxu1 %v5064_v51  ;;  %4929 = vrot.lane.b32.xlu0 %v6636_v62, %s6863_s21  ;;  %v6663_v62 = vld [vmem:[#allocation3 + $0x314] ss:$24 sps:$4 sm:$0xff]  }
 0x315   : > { %v4980_v35 = vpop.permute.xlu1 %4979 }
 0x316   : > { %v4880_v37 = vpop.permute.xlu0 %4879  ;;  %v5063_v16 = vsel %vm3993_vm10, %v4980_v35, %v4982_v4 }
 0x317   : > { %v5023_v55 = vsel %vm3993_vm10, %v4880_v37, %v4882_v9  ;;  %4945 = vrot.lane.b32.xlu1 %v6637_v44, %s6863_s21  ;;  %5204 = vmatpush1.bf16.msra.mxu1 %v5063_v16  ;;  %v6662_v9 = vld [vmem:[#allocation3 + $0x190] ss:$24 sps:$4 sm:$0xff]  }
 0x318   : > { %5149 = vmatpush1.bf16.msra.mxu0 %v5023_v55  ;;  %4923 = vrot.lane.b32.xlu0 %v6638_v29, %s6863_s21 }
 0x319   : > { %v9037_v22 = vpop.permute.xlu1 %4873 }
 0x31a   : > { %v4872_v57 = vpop.permute.xlu0 %4871  ;;  %6275 = vmatmul.mubr.msk.bf16.vlgmr.msra.gmra.mxu1 %vm3244_vm9, %v9035_v20 }
 0x31b   : > { %v5020_v50 = vsel %vm3993_vm10, %v4872_v57, %v9037_v22  ;;  %4919 = vrot.lane.b32.xlu1 %v6640_v26, %s6863_s21  ;;  %5264 = vmatprep.mubr.bf16.mxu1 %v6667_v59 }
 0x31c   : > { %5150 = vmatprep.subr.bf16.mxu0 %v5020_v50  ;;  %4947 = vrot.lane.b32.xlu0 %v6641_v5, %s6863_s21 }
 0x31d   : > { %v4898_v40 = vpop.permute.xlu1 %4897 }
 0x31e   : > { %v4896_v41 = vpop.permute.xlu0 %4895 }
 0x31f   : > { %v5029_v8 = vsel %vm3993_vm10, %v9000_v14, %v4896_v41  ;;  %v5030_v58 = vsel %vm3993_vm10, %v4896_v41, %v4898_v40  ;;  %4913 = vrot.lane.b32.xlu1 %v6642_v3, %s6863_s21  ;;  %v5327_v3 = vld [vmem:[%s9298_s3 + $0x8] sm:$0xff] }
 0x320   : > { %5232 = vmatprep.subr.bf16.mxu1 %v5030_v58  ;;  %4911 = vrot.lane.b32.xlu0 %v6644_v49, %s6863_s21 }
 0x321   : > { %5233 = vmatpush1.bf16.msra.mxu1 %v5029_v8  ;;  %v4862_v1 = vpop.permute.xlu1 %4861 }
 0x322   : > { %v4870_v28 = vpop.permute.xlu0 %4869 }
 0x323   : > { %v5019_v13 = vsel %vm3993_vm10, %v4870_v28, %v4872_v57  ;;  %4937 = vrot.lane.b32.xlu1 %v6647_v18, %s6863_s21 }
 0x324   : > { %5151 = vmatpush1.bf16.msra.mxu0 %v5019_v13  ;;  %4935 = vrot.lane.b32.xlu0 %v6648_v34, %s6863_s21 }
 0x325   : > { %v4886_v0 = vpop.permute.xlu1 %4885 }
 0x326   : > { %v4864_v54 = vpop.permute.xlu0 %4863  ;;  %v5025_v14 = vsel %vm3993_vm10, %v9019_v24, %v4886_v0  ;;  %v6661_v24 = vld [vmem:[#allocation3 + $0x194] ss:$24 sps:$4 sm:$0xff]  }
 0x327   : > { %v5016_v48 = vsel %vm3993_vm10, %v4862_v1, %v4864_v54  ;;  %4901 = vrot.lane.b32.xlu1 %v6649_v25, %s6863_s21 }
 0x328   : > { %5152 = vmatprep.subr.bf16.mxu0 %v5016_v48  ;;  %4909 = vrot.lane.b32.xlu0 %v6651_v42, %s6863_s21 }
 0x329   : > { %v4860_v63 = vpop.permute.xlu1 %4859 }
 0x32a   : > { %v4888_v31 = vpop.permute.xlu0 %4887  ;;  %v5015_v11 = vsel %vm3993_vm10, %v4860_v63, %v4862_v1 }
 0x32b   : > { %v5026_v56 = vsel %vm3993_vm10, %v4886_v0, %v4888_v31  ;;  %4925 = vrot.lane.b32.xlu1 %v6652_v17, %s6863_s21  ;;  %5153 = vmatpush1.bf16.msra.mxu0 %v5015_v11 }
 0x32c   : > { %4903 = vrot.lane.b32.xlu0 %v6653_v12, %s6863_s21  ;;  %5234 = vmatprep.subr.bf16.mxu1 %v5026_v56 }
 0x32d   : > { %5235 = vmatpush1.bf16.msra.mxu1 %v5025_v14  ;;  %v4854_v33 = vpop.permute.xlu1 %4853 }
 0x32e   : > { %v4852_v60 = vpop.permute.xlu0 %4851 }
 0x32f   : > { %v5012_v27 = vsel %vm3993_vm10, %v4852_v60, %v4854_v33  ;;  %4899 = vrot.lane.b32.xlu1 %v6655_v19, %s6863_s21 }
 0x330   : > { %5154 = vmatprep.subr.bf16.mxu0 %v5012_v27  ;;  %4927 = vrot.lane.b32.xlu0 %v6656_v21, %s6863_s21 }
 0x331   : > { %v4878_v53 = vpop.permute.xlu1 %4877 }
 0x332   : > { %v4876_v23 = vpop.permute.xlu0 %4875 }
 0x333   : > { %v5021_v15 = vsel %vm3993_vm10, %v9037_v22, %v4876_v23  ;;  %v5022_v10 = vsel %vm3993_vm10, %v4876_v23, %v4878_v53  ;;  %4917 = vrot.lane.b32.xlu1 %v6657_v36, %s6863_s21 }
 0x334   : > { %5236 = vmatprep.subr.bf16.mxu1 %v5022_v10  ;;  %4915 = vrot.lane.b32.xlu0 %v6658_v47, %s6863_s21 }
 0x335   : > { %5237 = vmatpush1.bf16.msra.mxu1 %v5021_v15  ;;  %v4842_v43 = vpop.permute.xlu1 %4841 }
 0x336   : > { %v4850_v46 = vpop.permute.xlu0 %4849 }
 0x337   : > { %v5011_v61 = vsel %vm3993_vm10, %v4850_v46, %v4852_v60  ;;  %4997 = vrot.lane.b32.xlu1 %v6659_v7, %s6863_s21 }
 0x338   : > { %5155 = vmatpush1.bf16.msra.mxu0 %v5011_v61  ;;  %4995 = vrot.lane.b32.xlu0 %v8747_v45, %s6863_s21 }
 0x339   : > { %v4866_v6 = vpop.permute.xlu1 %4865 }
 0x33a   : > { %v4844_v39 = vpop.permute.xlu0 %4843  ;;  %v5017_v45 = vsel %vm3993_vm10, %v4864_v54, %v4866_v6 }
 0x33b   : > { %v5008_v38 = vsel %vm3993_vm10, %v4842_v43, %v4844_v39  ;;  %4907 = vrot.lane.b32.xlu1 %v6661_v24, %s6863_s21 }
 0x33c   : > { %5156 = vmatprep.subr.bf16.mxu0 %v5008_v38  ;;  %4905 = vrot.lane.b32.xlu0 %v6662_v9, %s6863_s21 }
 0x33d   : > { %v4840_v4 = vpop.permute.xlu1 %4839 }
 0x33e   : > { %v4868_v32 = vpop.permute.xlu0 %4867  ;;  %v5007_v51 = vsel %vm3993_vm10, %v4840_v4, %v4842_v43 }
 0x33f   : > { %v5018_v35 = vsel %vm3993_vm10, %v4866_v6, %v4868_v32  ;;  %4987 = vrot.lane.b32.xlu1 %v6663_v62, %s6863_s21  ;;  %5157 = vmatpush1.bf16.msra.mxu0 %v5007_v51 }
 0x340   : > { %4985 = vrot.lane.b32.xlu0 %v8759_v2, %s6863_s21  ;;  %5238 = vmatprep.subr.bf16.mxu1 %v5018_v35  ;;  %v5326_v2 = vld [vmem:[%s9298_s3] sm:$0xff]  ;;  %s5863_s21 = sshll.u32 %s409_s20, 4  ;;  %s9252_s21 = int_to_ptr.vmem [resolvable:$true] %s5863_s21 }
 0x341   : > { %5239 = vmatpush1.bf16.msra.mxu1 %v5017_v45  ;;  %v4834_v37 = vpop.permute.xlu1 %4833  ;;  %p6784_p2 = scmp.lt.s32.totalorder %s9252_s21, %s6782_s13 }
 0x342   : > { %v4832_v44 = vpop.permute.xlu0 %4831 }
 0x343   : > { %v5004_v16 = vsel %vm3993_vm10, %v4832_v44, %v4834_v37  ;;  %5330 = vperm.xlu1 %6397, %v5326_v2  }
 0x344   : > { %5158 = vmatprep.subr.bf16.mxu0 %v5004_v16  ;;  %5335 = vperm.xlu0 %6396, %v5327_v3  }
 0x345   : > { %v4858_v55 = vpop.permute.xlu1 %4857 }
 0x346   : > { %v4856_v29 = vpop.permute.xlu0 %4855 }
 0x347   : > { %v5013_v22 = vsel %vm3993_vm10, %v4854_v33, %v4856_v29  ;;  %v5014_v57 = vsel %vm3993_vm10, %v4856_v29, %v4858_v55 }
 0x348   : > { %5240 = vmatprep.subr.bf16.mxu1 %v5014_v57 }
 0x349   : > { %5241 = vmatpush1.bf16.msra.mxu1 %v5013_v22  ;;  %v4822_v26 = vpop.permute.xlu1 %4821 }
 0x34a   : > { %v4830_v5 = vpop.permute.xlu0 %4829 }
 0x34b   : > { %v5003_v50 = vsel %vm3993_vm10, %v4830_v5, %v4832_v44 }
 0x34c   : > { %5159 = vmatpush1.bf16.msra.mxu0 %v5003_v50 }
 0x34d   : > { %v4846_v49 = vpop.permute.xlu1 %4845 }
 0x34e   : > { %v4824_v40 = vpop.permute.xlu0 %4823  ;;  %v5009_v18 = vsel %vm3993_vm10, %v4844_v39, %v4846_v49 }
 0x34f   : > { %v5000_v41 = vsel %vm3993_vm10, %v4822_v26, %v4824_v40 }
 0x350   : > { %5160 = vmatprep.subr.bf16.mxu0 %v5000_v41 }
 0x351   : > { %v4820_v8 = vpop.permute.xlu1 %4819 }
 0x352   : > { %v4848_v58 = vpop.permute.xlu0 %4847  ;;  %v4999_v1 = vsel %vm3993_vm10, %v4820_v8, %v4822_v26 }
 0x353   : > { %v5010_v28 = vsel %vm3993_vm10, %v4846_v49, %v4848_v58  ;;  %5161 = vmatpush1.bf16.msra.mxu0 %v4999_v1 }
 0x354   : > { %5242 = vmatprep.subr.bf16.mxu1 %v5010_v28 }
 0x355   : > { %5243 = vmatpush1.bf16.msra.mxu1 %v5009_v18  ;;  %v4838_v13 = vpop.permute.xlu1 %4837 }
 0x356   : > { %v4836_v34 = vpop.permute.xlu0 %4835 }
 0x357   : > { %v5005_v25 = vsel %vm3993_vm10, %v4834_v37, %v4836_v34  ;;  %v5006_v42 = vsel %vm3993_vm10, %v4836_v34, %v4838_v13 }
 0x358   : > { %5244 = vmatprep.subr.bf16.mxu1 %v5006_v42 }
 0x359   : > { %5245 = vmatpush1.bf16.msra.mxu1 %v5005_v25  ;;  %v4974_v0 = vpop.permute.xlu1 %4973 }
 0x35a   : > { %v4972_v54 = vpop.permute.xlu0 %4971 }
 0x35b   : > { %v5060_v59 = vsel %vm3993_vm10, %v4972_v54, %v4974_v0 }
 0x35c   : > { %5162 = vmatprep.subr.bf16.mxu0 %v5060_v59 }
 0x35d   : > { %v4826_v48 = vpop.permute.xlu1 %4825 }
 0x35e   : > { %v4970_v12 = vpop.permute.xlu0 %4969  ;;  %v5001_v56 = vsel %vm3993_vm10, %v4824_v40, %v4826_v48 }
 0x35f   : > { %v5059_v63 = vsel %vm3993_vm10, %v4970_v12, %v4972_v54 }
 0x360   : > { %5163 = vmatpush2.bf16.msra.mxu0 %v5059_v63  ;;  %v6665_v63 = vld [vmem:[#allocation8 + $0x30] ss:$12 sps:$4 sm:$0xff]  }
 0x361   : > { %v4962_v31 = vpop.permute.xlu1 %4961 }
 0x362   : > { %v4828_v17 = vpop.permute.xlu0 %4827 }
 0x363   : > { %v5002_v11 = vsel %vm3993_vm10, %v4826_v48, %v4828_v17 }
 0x364   : > { %5246 = vmatprep.subr.bf16.mxu1 %v5002_v11 }
 0x365   : > { %5247 = vmatpush1.bf16.msra.mxu1 %v5001_v56  ;;  %v4960_v19 = vpop.permute.xlu1 %4959 }
 0x366   : > { %v5055_v14 = vsel %vm3993_vm10, %v4960_v19, %v4962_v31  ;;  %v4964_v33 = vpop.permute.xlu0 %4963 }
 0x367   : > { %v5056_v60 = vsel %vm3993_vm10, %v4962_v31, %v4964_v33 }
 0x368   : > { %5164 = vmatprep.subr.bf16.mxu0 %v5056_v60 }
 0x369   : > { %5165 = vmatpush2.bf16.msra.mxu0 %v5055_v14  ;;  %v4954_v21 = vpop.permute.xlu1 %4953 }
 0x36a   : > { %v4952_v27 = vpop.permute.xlu0 %4951 }
 0x36b   : > { %v5052_v36 = vsel %vm3993_vm10, %v4952_v27, %v4954_v21 }
 0x36c   : > { %5166 = vmatprep.subr.bf16.mxu0 %v5052_v36 }
 0x36d   : > { %v4978_v47 = vpop.permute.xlu1 %4977 }
 0x36e   : > { %v4976_v53 = vpop.permute.xlu0 %4975 }
 0x36f   : > { %v5061_v23 = vsel %vm3993_vm10, %v4974_v0, %v4976_v53  ;;  %v5062_v15 = vsel %vm3993_vm10, %v4976_v53, %v4978_v47 }
 0x370   : > { %5248 = vmatprep.subr.bf16.mxu1 %v5062_v15 }
 0x371   : > { %5249 = vmatpush2.bf16.msra.mxu1 %v5061_v23  ;;  %v4942_v10 = vpop.permute.xlu1 %4941 }
 0x372   : > { %v4950_v43 = vpop.permute.xlu0 %4949 }
 0x373   : > { %v5051_v46 = vsel %vm3993_vm10, %v4950_v43, %v4952_v27 }
 0x374   : > { %5167 = vmatpush2.bf16.msra.mxu0 %v5051_v46 }
 0x375   : > { %v4966_v7 = vpop.permute.xlu1 %4965 }
 0x376   : > { %v4944_v61 = vpop.permute.xlu0 %4943  ;;  %v5057_v4 = vsel %vm3993_vm10, %v4964_v33, %v4966_v7  ;;  %v9131_v33 = vld [vmem:[#allocation2 + $0x60] sm:$0xff] }
 0x377   : > { %v5048_v24 = vsel %vm3993_vm10, %v4942_v10, %v4944_v61 }
 0x378   : > { %5168 = vmatprep.subr.bf16.mxu0 %v5048_v24 }
 0x379   : > { %v4940_v9 = vpop.permute.xlu1 %4939 }
 0x37a   : > { %v5047_v6 = vsel %vm3993_vm10, %v4940_v9, %v4942_v10  ;;  %v4968_v39 = vpop.permute.xlu0 %4967 }
 0x37b   : > { %5169 = vmatpush2.bf16.msra.mxu0 %v5047_v6  ;;  %v5058_v38 = vsel %vm3993_vm10, %v4966_v7, %v4968_v39 }
 0x37c   : > { %5250 = vmatprep.subr.bf16.mxu1 %v5058_v38 }
 0x37d   : > { %5251 = vmatpush2.bf16.msra.mxu1 %v5057_v4  ;;  %v4934_v32 = vpop.permute.xlu1 %4933 }
 0x37e   : > { %v4932_v62 = vpop.permute.xlu0 %4931 }
 0x37f   : > { %v5044_v51 = vsel %vm3993_vm10, %v4932_v62, %v4934_v32 }
 0x380   : > { %5170 = vmatprep.subr.bf16.mxu0 %v5044_v51 }
 0x381   : > { %v4958_v35 = vpop.permute.xlu1 %4957 }
 0x382   : > { %v4956_v45 = vpop.permute.xlu0 %4955 }
 0x383   : > { %v5053_v37 = vsel %vm3993_vm10, %v4954_v21, %v4956_v45  ;;  %v5054_v44 = vsel %vm3993_vm10, %v4956_v45, %v4958_v35 }
 0x384   : > { %5252 = vmatprep.subr.bf16.mxu1 %v5054_v44 }
 0x385   : > { %5253 = vmatpush2.bf16.msra.mxu1 %v5053_v37  ;;  %v4922_v16 = vpop.permute.xlu1 %4921 }
 0x386   : > { %v4930_v55 = vpop.permute.xlu0 %4929 }
 0x387   : > { %v5043_v29 = vsel %vm3993_vm10, %v4930_v55, %v4932_v62 }
 0x388   : > { %5171 = vmatpush2.bf16.msra.mxu0 %v5043_v29 }
 0x389   : > { %v4946_v22 = vpop.permute.xlu1 %4945 }
 0x38a   : > { %v4924_v57 = vpop.permute.xlu0 %4923  ;;  %v5049_v49 = vsel %vm3993_vm10, %v4944_v61, %v4946_v22  ;;  %v3325_v61 = vpop.f32.mrf.mxu1 }
 0x38b   : > { %v5040_v26 = vsel %vm3993_vm10, %v4922_v16, %v4924_v57 }
 0x38c   : > { %5172 = vmatprep.subr.bf16.mxu0 %v5040_v26  ;;  %v3327_v9 = vpop.f32.mrf.mxu1 }
 0x38d   : > { %v4920_v5 = vpop.permute.xlu1 %4919 }
 0x38e   : > { %v5039_v50 = vsel %vm3993_vm10, %v4920_v5, %v4922_v16  ;;  %v4948_v2 = vpop.permute.xlu0 %4947  ;;  %v3329_v39 = vpop.f32.mrf.mxu1 }
 0x38f   : > { %5173 = vmatpush2.bf16.msra.mxu0 %v5039_v50  ;;  %v5050_v3 = vsel %vm3993_vm10, %v4946_v22, %v4948_v2 }
 0x390   : > { %5254 = vmatprep.subr.bf16.mxu1 %v5050_v3  ;;  %v3331_v4 = vpop.f32.mrf.mxu1 }
 0x391   : > { %5255 = vmatpush2.bf16.msra.mxu1 %v5049_v49  ;;  %v4914_v40 = vpop.permute.xlu1 %4913 }
 0x392   : > { %v4912_v41 = vpop.permute.xlu0 %4911  ;;  %v3368_v62 = vpop.f32.mrf.mxu1 }
 0x393   : > { %v5036_v8 = vsel %vm3993_vm10, %v4912_v41, %v4914_v40 }
 0x394   : > { %5174 = vmatprep.subr.bf16.mxu0 %v5036_v8 }
 0x395   : > { %v4938_v58 = vpop.permute.xlu1 %4937 }
 0x396   : > { %v4936_v1 = vpop.permute.xlu0 %4935 }
 0x397   : > { %v5045_v28 = vsel %vm3993_vm10, %v4934_v32, %v4936_v1  ;;  %v5046_v18 = vsel %vm3993_vm10, %v4936_v1, %v4938_v58 }
 0x398   : > { %5256 = vmatprep.subr.bf16.mxu1 %v5046_v18 }
 0x399   : > { %5257 = vmatpush2.bf16.msra.mxu1 %v5045_v28  ;;  %v4902_v13 = vpop.permute.xlu1 %4901 }
 0x39a   : > { %v4910_v34 = vpop.permute.xlu0 %4909 }
 0x39b   : > { %v5035_v25 = vsel %vm3993_vm10, %v4910_v34, %v4912_v41 }
 0x39c   : > { %5175 = vmatpush2.bf16.msra.mxu0 %v5035_v25 }
 0x39d   : > { %v4926_v42 = vpop.permute.xlu1 %4925 }
 0x39e   : > { %v4904_v0 = vpop.permute.xlu0 %4903  ;;  %v5041_v17 = vsel %vm3993_vm10, %v4924_v57, %v4926_v42 }
 0x39f   : > { %v5032_v54 = vsel %vm3993_vm10, %v4902_v13, %v4904_v0 }
 0x3a0   : > { %5176 = vmatprep.subr.bf16.mxu0 %v5032_v54 }
 0x3a1   : > { %v4900_v59 = vpop.permute.xlu1 %4899 }
 0x3a2   : > { %v5031_v48 = vsel %vm3993_vm10, %v4900_v59, %v4902_v13  ;;  %v4928_v12 = vpop.permute.xlu0 %4927 }
 0x3a3   : > { %5177 = vmatpush2.bf16.msra.mxu0 %v5031_v48  ;;  %v5042_v31 = vsel %vm3993_vm10, %v4926_v42, %v4928_v12 }
 0x3a4   : > { %5258 = vmatprep.subr.bf16.mxu1 %v5042_v31 }
 0x3a5   : > { %5259 = vmatpush2.bf16.msra.mxu1 %v5041_v17  ;;  %v4918_v11 = vpop.permute.xlu1 %4917 }
 0x3a6   : > { %v4916_v56 = vpop.permute.xlu0 %4915  ;;  %5179 = vmatmul.mubr.bf16.vlgmr.msra.gmra.mxu0 %v6665_v63 }
 0x3a7   : > { %v5037_v19 = vsel %vm3993_vm10, %v4914_v40, %v4916_v56  ;;  %v5038_v14 = vsel %vm3993_vm10, %v4916_v56, %v4918_v11  ;;  %5307 = vmatprep.mubr.bf16.mxu0 %v9131_v33 }
 0x3a8   : > { %5260 = vmatprep.subr.bf16.mxu1 %v5038_v14 }
 0x3a9   : > { %5261 = vmatpush2.bf16.msra.mxu1 %v5037_v19  ;;  %v4998_v60 = vpop.permute.xlu1 %4997 }
 0x3aa   : > { %v4996_v21 = vpop.permute.xlu0 %4995 }
 0x3ab   : > { %v5069_v27 = vsel %vm3993_vm10, %v9009_v52, %v4996_v21  ;;  %v5070_v36 = vsel %vm3993_vm10, %v4996_v21, %v4998_v60  ;;  %v3282_v52 = vpop.f32.mrf.mxu0 }
 0x3ac   : > { %5287 = vmatprep.subr.bf16.mxu0 %v5070_v36  ;;  %v3326_v54 = vadd.f32 %v3325_v61, %v3282_v52 }
 0x3ad   : > { %5288 = vmatpush1.bf16.msra.mxu0 %v5069_v27  ;;  %v4908_v47 = vpop.permute.xlu1 %4907  ;;  %v3284_v24 = vpop.f32.mrf.mxu0 }
 0x3ae   : > { %v4906_v53 = vpop.permute.xlu0 %4905  ;;  %v3328_v25 = vadd.f32 %v3327_v9, %v3284_v24 }
 0x3af   : > { %v5033_v23 = vsel %vm3993_vm10, %v4904_v0, %v4906_v53  ;;  %v5034_v15 = vsel %vm3993_vm10, %v4906_v53, %v4908_v47  ;;  %v3286_v6 = vpop.f32.mrf.mxu0 }
 0x3b0   : > { %5262 = vmatprep.subr.bf16.mxu1 %v5034_v15  ;;  %v3330_v59 = vadd.f32 %v3329_v39, %v3286_v6 }
 0x3b1   : > { %5263 = vmatpush2.bf16.msra.mxu1 %v5033_v23  ;;  %v4988_v10 = vpop.permute.xlu1 %4987  ;;  %v3288_v38 = vpop.f32.mrf.mxu0 }
 0x3b2   : > { %v4986_v43 = vpop.permute.xlu0 %4985  ;;  %v3332_v0 = vadd.f32 %v3331_v4, %v3288_v38 }
 0x3b3   : > { %v5065_v46 = vsel %vm3993_vm10, %v9025_v30, %v4986_v43  ;;  %v5066_v7 = vsel %vm3993_vm10, %v4986_v43, %v4988_v10  ;;  %v3411_v32 = vpop.f32.mrf.mxu0  ;;  %v3370_v30 = vpop.f32.mrf.mxu1 }
 0x3b4   : > { %5265 = vmatmul.mubr.bf16.vlgmr.msra.gmra.mxu1 %v6665_v63  ;;  %5289 = vmatprep.subr.bf16.mxu0 %v5066_v7  ;;  %v3412_v63 = vadd.f32 %v3411_v32, %v3368_v62 }
 0x3b5   : > { %5290 = vmatpush1.bf16.msra.mxu0 %v5065_v46  ;;  %v3413_v51 = vpop.f32.mrf.mxu0  ;;  %v3372_v45 = vpop.f32.mrf.mxu1 }
 0x3b6   : > { %v3414_v17 = vadd.f32 %v3413_v51, %v3370_v30 }
 0x3b7   : > { %v3415_v35 = vpop.f32.mrf.mxu0  ;;  %v3374_v44 = vpop.f32.mrf.mxu1 }
 0x3b8   : > { %6276 = vmatmul.mubr.msk.bf16.vlgmr.msra.gmra.mxu0 %vm3244_vm9, %v9035_v20  ;;  %v3416_v53 = vadd.f32 %v3415_v35, %v3372_v45 }
 0x3b9   : > { %v3417_v37 = vpop.f32.mrf.mxu0  ;;  %v4218_v55 = vpop.f32.mrf.mxu1 }
 0x3ba   : > { %v3418_v61 = vadd.f32 %v3417_v37, %v3374_v44 }
 0x3bb   : > { %v4175_v16 = vpop.f32.mrf.mxu0  ;;  %v4220_v20 = vpop.f32.mrf.mxu1 }
 0x3bc   : > { %v4176_v11 = vadd.f32 %v4175_v16, %v3326_v54 }
 0x3bd   : > { %v4177_v29 = vpop.f32.mrf.mxu0  ;;  %v4222_v57 = vpop.f32.mrf.mxu1 }
 0x3be   : > { %v4178_v48 = vadd.f32 %v4177_v29, %v3328_v25  ;;  %v4219_v10 = vadd.f32 %v4218_v55, %v4176_v11  ;;  %v5331_v32 = vpop.permute.xlu1 %5330 }
 0x3bf   : > { %v4179_v22 = vpop.f32.mrf.mxu0  ;;  %v4224_v5 = vpop.f32.mrf.mxu1 }
 0x3c0   : > { %v4180_v56 = vadd.f32 %v4179_v22, %v3330_v59  ;;  %v4221_v21 = vadd.f32 %v4220_v20, %v4178_v48  ;;  %v5336_v62 = vpop.permute.xlu0 %5335 }
 0x3c1   : > { %v4181_v26 = vpop.f32.mrf.mxu0  ;;  %v4261_v50 = vpop.f32.mrf.mxu1 }
 0x3c2   : > { %v4182_v31 = vadd.f32 %v4181_v26, %v3332_v0  ;;  %v4262_v15 = vadd.f32 %v4261_v50, %v3412_v63  ;;  %v4223_v43 = vadd.f32 %v4222_v57, %v4180_v56 }
 0x3c3   : > { %v4263_v3 = vpop.f32.mrf.mxu1 }
 0x3c4   : > { %v4225_v23 = vadd.f32 %v4224_v5, %v4182_v31  ;;  %v4264_v46 = vadd.f32 %v4263_v3, %v3414_v17 }
 0x3c5   : > { %v4304_v2 = vpop.f32.mrf.mxu0  ;;  %v4265_v40 = vpop.f32.mrf.mxu1 }
 0x3c6   : > { %v4305_v38 = vadd.f32 %v4304_v2, %v4262_v15  ;;  %v4266_v4 = vadd.f32 %v4265_v40, %v3416_v53 }
 0x3c7   : > { %v4306_v49 = vpop.f32.mrf.mxu0  ;;  %v4267_v8 = vpop.f32.mrf.mxu1 }
 0x3c8   : > { %v4307_v30 = vadd.f32 %v4306_v49, %v4264_v46  ;;  %v4268_v55 = vadd.f32 %v4267_v8, %v3418_v61 }
 0x3c9   : > { %v4308_v41 = vpop.f32.mrf.mxu0 }
 0x3ca   : > { %v4309_v26 = vadd.f32 %v4308_v41, %v4266_v4  ;;  %v6864_v4 = vmov 1  }
 0x3cb   : > { %v4310_v58 = vpop.f32.mrf.mxu0 }
 0x3cc   : > { %v4311_v8 = vadd.f32 %v4310_v58, %v4268_v55 }
 0x3da   : > { %v5223_v1 = vpop.f32.mrf.mxu1 }
 0x3dc   : > { %v5225_v13 = vpop.f32.mrf.mxu1 }
 0x3de   : > { %v5227_v42 = vpop.f32.mrf.mxu1 }
 0x3e0   : > { %v5229_v19 = vpop.f32.mrf.mxu1 }
 0x466   : > { %v5180_v28 = vpop.f32.mrf.mxu0 }
 0x467   : > { %v5224_v27 = vadd.f32 %v5223_v1, %v5180_v28 }
 0x468   : > { %v5182_v18 = vpop.f32.mrf.mxu0 }
 0x469   : > { %v5226_v14 = vadd.f32 %v5225_v13, %v5182_v18  ;;  %v5318_v9 = vadd.f32 %v5224_v27, %v4219_v10 }
 0x46a   : > { %v5184_v34 = vpop.f32.mrf.mxu0 }
 0x46b   : > { %v5228_v36 = vadd.f32 %v5227_v42, %v5184_v34  ;;  %v5319_v7 = vadd.f32 %v5226_v14, %v4221_v21  ;;  %v9148_v37 = vadd.f32 %v5331_v32, %v5318_v9 }
 0x46c   : > { %v5186_v12 = vpop.f32.mrf.mxu0 }
 0x46d   : > { %v5230_v60 = vadd.f32 %v5229_v19, %v5186_v12  ;;  %v5322_v6 = vadd.f32 %v5228_v36, %v4223_v43  ;;  %v9144_v16 = vadd.f32 %v5331_v32, %v5319_v7  ;;  %v5356_v34 = vmul.f32 %v9148_v37, %v9148_v37  ;;  %v5378_v7 = vld [vmem:[%s9303_s8 + $0x8] sm:$0xff] }
 0x46f   : > { %v5323_v24 = vadd.f32 %v5230_v60, %v4225_v23  ;;  %v9150_v44 = vadd.f32 %v5336_v62, %v5322_v6  ;;  %v5357_v40 = vmul.f32 %v9144_v16, %v9144_v16  ;;  %v5346_v17 = vadd.f32 %v9144_v16, %v9148_v37 }
 0x471   : > { %v9146_v29 = vadd.f32 %v5336_v62, %v5323_v24  ;;  %v5360_v41 = vmul.f32 %v9150_v44, %v9150_v44  ;;  %v5364_v54 = vadd.f32 %v5357_v40, %v5356_v34 }
 0x473   : > { %v5361_v18 = vmul.f32 %v9146_v29, %v9146_v29  ;;  %v5351_v0 = vadd.f32 %v9146_v29, %v9150_v44 }
 0x474   : > { %v5266_v47 = vpop.f32.mrf.mxu1 }
 0x475   : > { %v5369_v63 = vadd.f32 %v5361_v18, %v5360_v41 }
 0x476   : > { %v5268_v52 = vpop.f32.mrf.mxu1 }
 0x478   : > { %v5309_v39 = vpop.f32.mrf.mxu0  ;;  %v5270_v35 = vpop.f32.mrf.mxu1 }
 0x479   : > { %v5310_v51 = vadd.f32 %v5309_v39, %v5266_v47  ;;  %v5377_v47 = vld [vmem:[%s9303_s8] sm:$0xff] }
 0x47a   : > { %v5311_v45 = vpop.f32.mrf.mxu0  ;;  %v5272_v3 = vpop.f32.mrf.mxu1  ;;  %6317 = vmatprep.mubr.msk.f32.mxu0 %vm5379_vm11, %v5377_v47 }
 0x47b   : > { %v5320_v20 = vadd.f32 %v5310_v51, %v4305_v38  ;;  %v5312_v22 = vadd.f32 %v5311_v45, %v5268_v52  ;;  %v5518_v38 = vld [vmem:[%s9299_s4 + $0x8] sm:$0xff] }
 0x47c   : > { %v5313_v57 = vpop.f32.mrf.mxu0 }
 0x47d   : > { %v9152_v5 = vadd.f32 %v5331_v32, %v5320_v20  ;;  %v5321_v50 = vadd.f32 %v5312_v22, %v4307_v30  ;;  %v5314_v2 = vadd.f32 %v5313_v57, %v5270_v35 }
 0x47e   : > { %v5315_v49 = vpop.f32.mrf.mxu0 }
 0x47f   : > { %v5324_v1 = vadd.f32 %v5314_v2, %v4309_v26  ;;  %v5316_v28 = vadd.f32 %v5315_v49, %v5272_v3  ;;  %v9158_v13 = vadd.f32 %v5331_v32, %v5321_v50  ;;  %v5358_v58 = vmul.f32 %v9152_v5, %v9152_v5  ;;  %v5517_v26 = vld [vmem:[%s9299_s4] sm:$0xff]  ;;  %v5538_v50 = vld [vmem:[%s9300_s5 + $0x8] sm:$0xff] }
 0x480   : > { %v5347_v21 = vadd.f32 %v5346_v17, %v9152_v5  ;;  %v5537_v2 = vld [vmem:[%s9300_s5] sm:$0xff]  ;;  %v6865_v49 = vmov 0.0  }
 0x481   : > { %v9164_v25 = vadd.f32 %v5336_v62, %v5324_v1  ;;  %v5325_v42 = vadd.f32 %v5316_v28, %v4311_v8  ;;  %v5359_v31 = vmul.f32 %v9158_v13, %v9158_v13  ;;  %v5365_v14 = vadd.f32 %v5364_v54, %v5358_v58  ;;  %v5614_v3 = vld [vmem:[#allocation4] sm:$0x1]  ;;  %5691 = vmatprep.mubr.f32.mxu1 %v6865_v49 }
 0x482   : > { %v5348_v36 = vadd.f32 %v5347_v21, %v9158_v13 }
 0x483   : > { %v9170_v59 = vadd.f32 %v5336_v62, %v5325_v42  ;;  %v5352_v48 = vadd.f32 %v5351_v0, %v9164_v25  ;;  %v5362_v12 = vmul.f32 %v9164_v25, %v9164_v25  ;;  %v5366_v27 = vadd.f32 %v5365_v14, %v5359_v31 }
 0x485   : > { %v5353_v11 = vadd.f32 %v5352_v48, %v9170_v59  ;;  %v5363_v56 = vmul.f32 %v9170_v59, %v9170_v59  ;;  %v5370_v19 = vadd.f32 %v5369_v63, %v5362_v12 }
 0x487   : > { %5354 = vadd.xlane.f32.xlu1 %v5353_v11  ;;  %v5371_v60 = vadd.f32 %v5370_v19, %v5363_v56 }
 0x489   : > { %5372 = vadd.xlane.f32.xlu0 %v5371_v60 }
 0x48b   : > { %5367 = vadd.xlane.f32.xlu1 %v5366_v27 }
 0x48d   : > { %5349 = vadd.xlane.f32.xlu0 %v5348_v36 }
 0x510   : > { %v5355_v53 = vpop.xlane.xlu1 %5354 }
 0x512   : > { %v5373_v23 = vpop.xlane.xlu0 %5372 }
 0x513   : > { %v5376_v15 = vsel %vm1532_vm7, %v5355_v53, %v5373_v23 }
 0x514   : > { %6313 = vmatprep.subr.mxu0 %v5376_v15  ;;  %v5368_v10 = vpop.xlane.xlu1 %5367 }
 0x515   : > { %6314 = vmatpush3.msra.mxu0 %v5376_v15 }
 0x516   : > { %v5350_v43 = vpop.xlane.xlu0 %5349 }
 0x517   : > { %v5375_v46 = vsel %vm1532_vm7, %v5350_v43, %v5368_v10 }
 0x518   : > { %6315 = vmatprep.subr.mxu0 %v5375_v46 }
 0x519   : > { %6316 = vmatpush3.msra.mxu0 %v5375_v46 }
 0x51a   : > { %6318 = vmatmul.mubr.msk.f32.vlgmr.msra.gmra.mxu0 %vm5379_vm11, %v5378_v7 }
 0x51b   : > { %5762 = vmatprep.mubr.f32.mxu0 %v6865_v49 }
 0x5da   : > { %v6319_v52 = vpop.f32.mrf.mxu0 }
 0x5db   : > { %v5462_v61 = vmul.f32 0.0009765625, %v6319_v52 }
 0x5dc   : > { %v5452_v24 = vpop.f32.mrf.mxu0 }
 0x5dd   : > { %v5464_v9 = vmul.f32 %v5462_v61, %v5462_v61  ;;  %v5461_v6 = vmul.f32 0.0009765625, %v5452_v24 }
 0x5df   : > { %v5463_v39 = vmul.f32 %v5461_v6, %v5461_v6  ;;  %5469 = vrot.lane.b32.xlu0 %v5464_v9, %s6862_s22 }
 0x5e1   : > { %5467 = vrot.lane.b32.xlu1 %v5463_v39, %s6862_s22 }
 0x5e3   : > { %5479 = vperm.xlu0 %6396, %v5461_v6  }
 0x5e5   : > { %5484 = vperm.xlu1 %6397, %v5462_v61  }
 0x5e7   : > { %6400 = vset.pattern.permute.xlu0 %v6864_v4 }
 0x5e9   : > { %5526 = vperm.xlu1 %6397, %v5518_v38  }
 0x5ed   : > { %6398 = vset.pattern.permute.xlu1 %v6864_v4 }
 0x651   : > { %v5470_v32 = vpop.permute.xlu0 %5469 }
 0x652   : > { %v5474_v62 = vsub.f32 %v5462_v61, %v5470_v32 }
 0x653   : > { %v5468_v51 = vpop.permute.xlu1 %5467 }
 0x654   : > { %v5476_v30 = vmax.f32 %v5474_v62, 0.0  ;;  %v5473_v35 = vsub.f32 %v5461_v6, %v5468_v51 }
 0x656   : > { %v5496_v45 = vadd.f32 1e-05, %v5476_v30  ;;  %v5475_v55 = vmax.f32 %v5473_v35, 0.0 }
 0x658   : > { %6668 = vrsqrt.f32 %v5496_v45  ;;  %v5495_v20 = vadd.f32 1e-05, %v5475_v55 }
 0x65a   : > { %6670 = vrsqrt.f32 %v5495_v20 }
 0x65e   : > { %v5480_v1 = vpop.permute.xlu0 %5479 }
 0x65f   : > { %v5487_v42 = vsub.f32 %v9148_v37, %v5480_v1  ;;  %v5488_v63 = vsub.f32 %v9144_v16, %v5480_v1  ;;  %v5489_v31 = vsub.f32 %v9152_v5, %v5480_v1 }
 0x660   : > { %v5485_v40 = vpop.permute.xlu1 %5484 }
 0x661   : > { %v5491_v28 = vsub.f32 %v9150_v44, %v5485_v40  ;;  %v5492_v18 = vsub.f32 %v9146_v29, %v5485_v40  ;;  %v5494_v41 = vsub.f32 %v9170_v59, %v5485_v40  ;;  %v5490_v44 = vsub.f32 %v9158_v13, %v5480_v1 }
 0x664   : > { %v5527_v8 = vpop.permute.xlu1 %5526 }
 0x665   : > { %v6669_v22 = vpop.eup %6668 }
 0x666   : > { %5506 = vperm.xlu1 %6398, %v6669_v22  }
 0x667   : > { %v6671_v57 = vpop.eup %6670 }
 0x668   : > { %5501 = vperm.xlu0 %6400, %v6671_v57  }
 0x66a   : > { %6399 = vset.pattern.permute.xlu1 %v9131_v33 }
 0x66b   : > { %5521 = vperm.xlu1 %6399, %v5517_v26  }
 0x66c   : > { %6401 = vset.pattern.permute.xlu0 %v9131_v33  ;;  %v5493_v33 = vsub.f32 %v9164_v25, %v5485_v40 }
 0x66d   : > { %5546 = vperm.xlu0 %6401, %v5538_v50  }
 0x66f   : > { %5541 = vperm.xlu1 %6399, %v5537_v2  }
 0x673   : > { %5617 = vperm.xlu1 %6399, %v5614_v3  }
 0x6e1   : > { %v5507_v34 = vpop.permute.xlu1 %5506 }
 0x6e2   : > { %v5513_v0 = vmul.f32 %v5507_v34, %v5491_v28  ;;  %v5514_v58 = vmul.f32 %v5507_v34, %v5492_v18  ;;  %v5515_v54 = vmul.f32 %v5507_v34, %v5493_v33  ;;  %v5516_v48 = vmul.f32 %v5507_v34, %v5494_v41 }
 0x6e3   : > { %v5502_v12 = vpop.permute.xlu0 %5501 }
 0x6e4   : > { %v5509_v17 = vmul.f32 %v5502_v12, %v5487_v42  ;;  %v5510_v29 = vmul.f32 %v5502_v12, %v5488_v63  ;;  %v5511_v11 = vmul.f32 %v5502_v12, %v5489_v31  ;;  %v5512_v25 = vmul.f32 %v5502_v12, %v5490_v44  ;;  %v5613_v31 = vld [vmem:[%s9301_s6] sm:$0x1] }
 0x6e5   : > { %v5533_v59 = vmul.f32 %v5527_v8, %v5513_v0  ;;  %v5534_v19 = vmul.f32 %v5527_v8, %v5514_v58  ;;  %v5535_v14 = vmul.f32 %v5527_v8, %v5515_v54  ;;  %v5536_v37 = vmul.f32 %v5527_v8, %v5516_v48 }
 0x6e6   : > { %v5522_v56 = vpop.permute.xlu1 %5521 }
 0x6e7   : > { %v5529_v60 = vmul.f32 %v5522_v56, %v5509_v17  ;;  %v5530_v16 = vmul.f32 %v5522_v56, %v5510_v29  ;;  %v5531_v23 = vmul.f32 %v5522_v56, %v5511_v11  ;;  %v5532_v5 = vmul.f32 %v5522_v56, %v5512_v25  ;;  %v9445_v29 = vld [vmem:[#allocation16_spill] sm:$0xff] }
 0x6e8   : > { %v5547_v21 = vpop.permute.xlu0 %5546 }
 0x6e9   : > { %v5553_v27 = vadd.f32 %v5547_v21, %v5533_v59  ;;  %v5554_v36 = vadd.f32 %v5547_v21, %v5534_v19  ;;  %v5555_v47 = vadd.f32 %v5547_v21, %v5535_v14  ;;  %v5556_v53 = vadd.f32 %v5547_v21, %v5536_v37 }
 0x6ea   : > { %v5542_v15 = vpop.permute.xlu1 %5541 }
 0x6eb   : > { %v6283_v13 = vmul.f32 -1.442695, %v5553_v27  ;;  %v6284_v10 = vmul.f32 -1.442695, %v5554_v36  ;;  %v6285_v43 = vmul.f32 -1.442695, %v5555_v47  ;;  %v5549_v46 = vadd.f32 %v5542_v15, %v5529_v60 }
 0x6ec   : > { %v6286_v7 = vmul.f32 -1.442695, %v5556_v53  ;;  %v5550_v52 = vadd.f32 %v5542_v15, %v5530_v16  ;;  %v5551_v61 = vadd.f32 %v5542_v15, %v5531_v23  ;;  %v5552_v24 = vadd.f32 %v5542_v15, %v5532_v5 }
 0x6ed   : > { %6672 = vpow2.f32 %v6283_v13  ;;  %v6279_v9 = vmul.f32 -1.442695, %v5549_v46 }
 0x6ee   : > { %6674 = vpow2.f32 %v6284_v10  ;;  %v6280_v6 = vmul.f32 -1.442695, %v5550_v52  ;;  %v6281_v39 = vmul.f32 -1.442695, %v5551_v61  ;;  %v6282_v38 = vmul.f32 -1.442695, %v5552_v24  ;;  %v5618_v17 = vpop.permute.xlu1 %5617 }
 0x6ef   : > { %6676 = vpow2.f32 %v6285_v43  ;;  %v5623_v11 = vrot.slane %v5618_v17, %v9445_v29 }
 0x6f0   : > { %6678 = vpow2.f32 %v6286_v7 }
 0x6f1   : > { %6680 = vpow2.f32 %v6279_v9 }
 0x6f2   : > { %6682 = vpow2.f32 %v6280_v6 }
 0x6f3   : > { %6684 = vpow2.f32 %v6281_v39  ;;  %v5797_v39 = vld [vmem:[%s7227_s24 + $0x20] sm:$0xff] }
 0x6f4   : > { %6686 = vpow2.f32 %v6282_v38  ;;  %v5803_v38 = vld [vmem:[%s7049_s25 + $0x10] sm:$0xff] }
 0x6fa   : > { %v6673_v4 = vpop.eup %6672 }
 0x6fb   : > { %v6675_v32 = vpop.eup %6674  ;;  %v5585_v62 = vadd.f32 1.0, %v6673_v4  ;;  %v5807_v4 = vld [vmem:[%s7049_s25 + $0x30] sm:$0xff] }
 0x6fc   : > { %v6677_v51 = vpop.eup %6676  ;;  %v5586_v30 = vadd.f32 1.0, %v6675_v32 }
 0x6fd   : > { %v6679_v35 = vpop.eup %6678  ;;  %v5587_v45 = vadd.f32 1.0, %v6677_v51  ;;  %6688 = vrcp.f32 %v5585_v62 }
 0x6fe   : > { %v6681_v55 = vpop.eup %6680  ;;  %v5588_v20 = vadd.f32 1.0, %v6679_v35  ;;  %6690 = vrcp.f32 %v5586_v30  ;;  %v5802_v35 = vld [vmem:[%s7049_s25 + $0x8] sm:$0xff] }
 0x6ff   : > { %v6683_v22 = vpop.eup %6682  ;;  %6692 = vrcp.f32 %v5587_v45  ;;  %v5581_v57 = vadd.f32 1.0, %v6681_v55  ;;  %v5806_v45 = vld [vmem:[%s7049_s25 + $0x28] sm:$0xff] }
 0x700   : > { %v6685_v26 = vpop.eup %6684  ;;  %6694 = vrcp.f32 %v5588_v20  ;;  %v5582_v50 = vadd.f32 1.0, %v6683_v22  ;;  %v5795_v20 = vld [vmem:[%s7227_s24 + $0x10] sm:$0xff] }
 0x701   : > { %v6687_v2 = vpop.eup %6686  ;;  %v5583_v3 = vadd.f32 1.0, %v6685_v26  ;;  %6696 = vrcp.f32 %v5581_v57  ;;  %v5799_v22 = vld [vmem:[%s7227_s24 + $0x30] sm:$0xff]  ;;  %v5794_v57 = vld [vmem:[%s7227_s24 + $0x8] sm:$0xff] }
 0x702   : > { %v5584_v49 = vadd.f32 1.0, %v6687_v2  ;;  %6698 = vrcp.f32 %v5582_v50 }
 0x703   : > { %6700 = vrcp.f32 %v5583_v3 }
 0x704   : > { %6702 = vrcp.f32 %v5584_v49 }
 0x70a   : > { %v6689_v40 = vpop.eup %6688 }
 0x70b   : > { %v6691_v8 = vpop.eup %6690  ;;  %v5609_v1 = vmul.f32 %v6689_v40, %v5553_v27  ;;  %v5798_v40 = vld [vmem:[%s7227_s24 + $0x28] sm:$0xff] }
 0x70c   : > { %v6693_v28 = vpop.eup %6692  ;;  %v5610_v18 = vmul.f32 %v6691_v8, %v5554_v36  ;;  %v5804_v8 = vld [vmem:[%s7049_s25 + $0x18] sm:$0xff] }
 0x70d   : > { %v6695_v33 = vpop.eup %6694  ;;  %v5611_v41 = vmul.f32 %v6693_v28, %v5555_v47 }
 0x70e   : > { %v6697_v34 = vpop.eup %6696  ;;  %5655 = vmatprep.subr.mxu1 %v5610_v18  ;;  %v5612_v42 = vmul.f32 %v6695_v33, %v5556_v53 }
 0x70f   : > { %v6699_v0 = vpop.eup %6698  ;;  %5656 = vmatpush1.msra.mxu1 %v5609_v1  ;;  %v5605_v58 = vmul.f32 %v6697_v34, %v5549_v46  ;;  %v5808_v1 = vld [vmem:[%s7049_s25 + $0x38] sm:$0xff] }
 0x710   : > { %v6701_v54 = vpop.eup %6700  ;;  %5726 = vmatprep.subr.mxu0 %v5612_v42  ;;  %v5606_v48 = vmul.f32 %v6699_v0, %v5550_v52  ;;  %v5801_v52 = vld [vmem:[%s7049_s25] sm:$0xff]  ;;  %v5796_v42 = vld [vmem:[%s7227_s24 + $0x18] sm:$0xff] }
 0x711   : > { %v6703_v12 = vpop.eup %6702  ;;  %5727 = vmatpush1.msra.mxu0 %v5611_v41  ;;  %v5607_v63 = vmul.f32 %v6701_v54, %v5551_v61  ;;  %v5805_v61 = vld [vmem:[%s7049_s25 + $0x20] sm:$0xff]  ;;  %v5800_v0 = vld [vmem:[%s7227_s24 + $0x38] sm:$0xff] }
 0x712   : > { %5657 = vmatprep.subr.mxu1 %v5606_v48  ;;  %v5608_v44 = vmul.f32 %v6703_v12, %v5552_v24  ;;  %v5793_v24 = vld [vmem:[%s7227_s24] sm:$0xff]  ;;  %s6777_s24 = scalar_lea.vmem %s9252_s21, 1024 }
 0x713   : > { %5658 = vmatpush1.msra.mxu1 %v5605_v58  ;;  %p6778_p11 = scmp.ne.s32.totalorder %s9252_s21, %s6777_s24  ;;  %p6785_p13 = scmp.lt.s32.totalorder %s6783_s29, %s6777_s24 }
 0x714   : > { %5728 = vmatprep.subr.mxu0 %v5608_v44  ;;  %6287 = vmatmul.mubr.msk.f32.vlgmr.msra.gmra.mxu1 %vm5379_vm11, %v5613_v31 }
 0x715   : > { %5729 = vmatpush1.msra.mxu0 %v5607_v63  ;;  %p6779_p12 = pnand %p6778_p11, %p9446_p7  ;;  %p6786_p0 = por %p6785_p13, %p6784_p2 }
 0x716   : > { %6288 = vmatmul.mubr.msk.f32.vlgmr.msra.gmra.mxu0 %vm5379_vm11, %v5613_v31 }
 0x717   : > { %p6780_p10 = pneg %p6779_p12 }
 0x719   : > { %p6787_p5 = pnand %p6786_p0, %p6780_p10 }
 0x7d4   : > { %v5693_v25 = vpop.f32.mrf.mxu1 }
 0x7d5   : > { %v5694_v56 = vadd.f32 %v5693_v25, %v5623_v11 }
 0x7d6   : > { %v5764_v59 = vpop.f32.mrf.mxu0  ;;  %v5695_v19 = vpop.f32.mrf.mxu1 }
 0x7d7   : > { %v6289_v14 = vmul.f32 -1.442695, %v5694_v56  ;;  %v5765_v37 = vadd.f32 %v5764_v59, %v5623_v11  ;;  %v5696_v60 = vadd.f32 %v5695_v19, %v5623_v11 }
 0x7d8   : > { %v5766_v21 = vpop.f32.mrf.mxu0 }
 0x7d9   : > { %6704 = vpow2.f32 %v6289_v14  ;;  %v6291_v27 = vmul.f32 -1.442695, %v5765_v37  ;;  %v6290_v36 = vmul.f32 -1.442695, %v5696_v60  ;;  %v5767_v47 = vadd.f32 %v5766_v21, %v5623_v11 }
 0x7db   : > { %6706 = vpow2.f32 %v6291_v27  ;;  %v6292_v53 = vmul.f32 -1.442695, %v5767_v47 }
 0x7dc   : > { %6708 = vpow2.f32 %v6290_v36 }
 0x7dd   : > { %6710 = vpow2.f32 %v6292_v53 }
 0x7e6   : > { %v6705_v16 = vpop.eup %6704 }
 0x7e7   : > { %v5781_v23 = vadd.f32 1.0, %v6705_v16 }
 0x7e8   : > { %v6707_v5 = vpop.eup %6706 }
 0x7e9   : > { %v6709_v15 = vpop.eup %6708  ;;  %6712 = vrcp.f32 %v5781_v23  ;;  %v5783_v13 = vadd.f32 1.0, %v6707_v5 }
 0x7ea   : > { %v6711_v10 = vpop.eup %6710  ;;  %v5782_v43 = vadd.f32 1.0, %v6709_v15 }
 0x7eb   : > { %6714 = vrcp.f32 %v5783_v13  ;;  %v5784_v46 = vadd.f32 1.0, %v6711_v10 }
 0x7ec   : > { %6716 = vrcp.f32 %v5782_v43 }
 0x7ed   : > { %6718 = vrcp.f32 %v5784_v46 }
 0x7f6   : > { %v6713_v7 = vpop.eup %6712 }
 0x7f7   : > { %v5812_v9 = vrot.slane %v6713_v7, %v9445_v29 }
 0x7f8   : > { %v6715_v6 = vpop.eup %6714 }
 0x7f9   : > { %v6717_v32 = vpop.eup %6716  ;;  %v5825_v62 = vmul.f32 %v5812_v9, %v5801_v52  ;;  %v5829_v51 = vmul.f32 %v5812_v9, %v5805_v61  ;;  %v5820_v30 = vrot.slane %v6715_v6, %v9445_v29 }
 0x7fa   : > { %v6719_v55 = vpop.eup %6718  ;;  %v5816_v26 = vrot.slane %v6717_v32, %v9445_v29 }
 0x7fb   : > { %v5833_v50 = vadd.f32 %v5825_v62, %v5793_v24  ;;  %v5837_v2 = vadd.f32 %v5829_v51, %v5797_v39  ;;  %v5827_v3 = vmul.f32 %v5820_v30, %v5803_v38  ;;  %v5831_v49 = vmul.f32 %v5820_v30, %v5807_v4 }
 0x7fc   : > { %v5826_v28 = vmul.f32 %v5816_v26, %v5802_v35  ;;  %v5830_v18 = vmul.f32 %v5816_v26, %v5806_v45  ;;  %v5824_v33 = vrot.slane %v6719_v55, %v9445_v29 }
 0x7fd   : > { %5841 = vst [vmem:[%s409_s20] sm:$0xff] %v5833_v50  ;;  %5845 = vst [vmem:[%s409_s20 + $0x20] sm:$0xff] %v5837_v2  ;;  %v5835_v41 = vadd.f32 %v5827_v3, %v5795_v20  ;;  %v5839_v34 = vadd.f32 %v5831_v49, %v5799_v22 }
 0x7fe   : > { %v5834_v58 = vadd.f32 %v5826_v28, %v5794_v57  ;;  %v5838_v54 = vadd.f32 %v5830_v18, %v5798_v40  ;;  %v5828_v48 = vmul.f32 %v5824_v33, %v5804_v8  ;;  %v5832_v12 = vmul.f32 %v5824_v33, %v5808_v1 }
 0x7ff   : > { %5843 = vst [vmem:[%s409_s20 + $0x10] sm:$0xff] %v5835_v41  ;;  %5847 = vst [vmem:[%s409_s20 + $0x30] sm:$0xff] %v5839_v34 }
 0x800   : > { %5842 = vst [vmem:[%s409_s20 + $0x8] sm:$0xff] %v5834_v58  ;;  %5846 = vst [vmem:[%s409_s20 + $0x28] sm:$0xff] %v5838_v54  ;;  %v5836_v63 = vadd.f32 %v5828_v48, %v5796_v42  ;;  %v5840_v31 = vadd.f32 %v5832_v12, %v5800_v0 }
 0x802   : > { %5844 = vst [vmem:[%s409_s20 + $0x18] sm:$0xff] %v5836_v63  ;;  %5848 = vst [vmem:[%s409_s20 + $0x38] sm:$0xff] %v5840_v31 }
 0x803   : > { %6790 = shalt.err (!%p6787_p5)
}
 0x804   : > { %s6791_s23 = scalar_lea.hbm %s9250_s7, 1024  ;;  %s6795_s28 = scalar_lea.hbm %s9305_s10, 2048 }
 0x805   : > { %p6792_p9 = scmp.ne.s32.totalorder %s9250_s7, %s6791_s23  ;;  %p6796_p6 = scmp.lt.s32.totalorder %s9250_s7, %s9305_s10 }
 0x806   : > { %p6797_p8 = scmp.lt.s32.totalorder %s6795_s28, %s6791_s23 }
 0x807   : > { %p6793_p1 = pnand %p6792_p9, %p9446_p7 }
 0x808   : > { %p6798_p3 = por %p6797_p8, %p6796_p6 }
 0x809   : > { %p6794_p4 = pneg %p6793_p1 }
 0x80b   : > { %p6799_p11 = pnand %p6798_p3, %p6794_p4 }
 0x80d   : > { %6802 = shalt.err (!%p6799_p11)
}
 0x80e   : > { %s6867_s25 = smov 512   ;;  %s6868_s22 = smov 32  }
 0x80f   : > { %6326 = dma.vmem_to_hbm [thread:$0]  (%p9446_p7), %s9252_s21, 1024, %s9250_s7, %s5850_s2, %s6867_s25, %s6867_s25, %s6868_s22  }
 0x810 PF: > { %s9447_s24 = sld [smem:[#allocation14_spill]]  ;;  %s5878_s11 = sand.u32 1, %s6833_s15  }
 0x811   : > { %p9449_p10 = scmp.ge.s32.totalorder %s6845_s18, 2  ;;  %s5879_s13 = scalar_lea.sflag [#allocation7], %s5878_s11 }
 0x816   : > { %p9448_p12 = scmp.ne.s32.totalorder %s9447_s24, 0 }
 0x818   : > { %p6337_p2 = pnand %p9449_p10, %p9448_p12 }
 0x81a   : > { %p6338_p13 = pneg %p6337_p2 }
 0x81c   : > { %6828 = dma.done.wait (%p6338_p13), %s5879_s13, 1024  }
 0x81d   : > { %6830 = vsyncadd (%p6338_p13), %s5879_s13, 4294966272  ;;  %s9450_s18 = sld [smem:[#allocation15_spill]]  ;;  %s9451_s15 = smov %s6837_s16 }
 0x81e   : > { %s9452_s16 = smov %s6841_s17  ;;  %s9453_s17 = smov %s6998_s14 }
 0x823   : > { %p26_p0 = scmp.ge.s32.totalorder %s9450_s18, 4  }
 0x825   :  { %28 = sbr.rel (!%p26_p0) target bundleno = 9 (0x9), region = 121 }
 0x82a   :  { %5884 = vsyncpa [#allocation6], 1 }
 0x82b   :  { %5886 = vsyncpa [#allocation6 + $0x1], 1 }
 0x82c   :  { %5887 = vsyncpa [#allocation9], 1 }
 0x82d   :  { %5888 = vsyncpa [#allocation7], 1 }
 0x82e   :  { %5890 = vsyncpa [#allocation7 + $0x1], 1 }

</bundles_post_ra>
